<compile_context>
chip_gen: v6e
topology: v6e:2x2x1
jax: 0.10.0
libtpu: 0.0.40
codegen_flags: <defaults>
</compile_context>

<pallas_src>
import functools

import jax
import jax.numpy as jnp
from jax.experimental import pallas as pl
from jax.experimental.pallas import tpu as pltpu

HIDDEN_SIZES = [200, 100, 50, 25]
LEAKY_SLOPE = 0.1            # nn.LeakyReLU(0.1) in the module spec
BN_EPS = 1e-5
LANE = 128
_HIGHEST = jax.lax.Precision.HIGHEST


def _round_up(n, m):
    return ((n + m - 1) // m) * m


def _pick_batch_tiling(batch, tile_cap):
    """Pad the batch to a multiple of 256 and choose the batch-tile size.

    Small batches -> one (or two) minimally padded tiles; large batches ->
    `tile_cap`-row tiles.  When the padded batch splits evenly we use >=2 grid
    steps so a v7x megacore can place tiles on both TensorCores.
    """
    b_pad = _round_up(max(batch, 1), 256)
    if b_pad > tile_cap:
        b_pad = _round_up(b_pad, tile_cap)
        return b_pad, tile_cap
    if b_pad >= 1024 and b_pad % 512 == 0:
        return b_pad, b_pad // 2
    return b_pad, b_pad


# -----------------------------------------------------------------------------
# Kernel: one batch tile of the whole MLP (BatchNorm already folded into weights)
# -----------------------------------------------------------------------------
def _fao_mlp_kernel(x_ref,
                    w0_ref, b0_ref, w1_ref, b1_ref,
                    w2_ref, b2_ref, w3_ref, b3_ref,
                    w4_ref, b4_ref, o_ref):
    h = x_ref[...]                                        # bf16 [tile_b, in_dim]
    for w_ref, b_ref in ((w0_ref, b0_ref), (w1_ref, b1_ref),
                         (w2_ref, b2_ref), (w3_ref, b3_ref)):
        # MXU matmul: bf16 inputs, f32 accumulation.
        acc = jnp.dot(h, w_ref[...], preferred_element_type=jnp.float32)
        acc = acc + b_ref[...]                            # f32 bias (BN shift folded in)
        # LeakyReLU(0.1) == max(a, 0.1*a).  Dropout is identity in eval mode.
        # Cast to bf16 once here: halves every inter-layer intermediate.
        h = jnp.maximum(acc, LEAKY_SLOPE * acc).astype(jnp.bfloat16)
    # Final Linear(prev, 1): multiply + cross-lane reduce (VPU/XLU) instead of
    # an N=1 MXU matmul.
    w4 = w4_ref[...].astype(jnp.float32)                  # [1, H3_pad]
    o_ref[...] = (jnp.sum(h.astype(jnp.float32) * w4, axis=-1, keepdims=True)
                  + b4_ref[...])


# -----------------------------------------------------------------------------
# Parameter construction (matches PyTorch _initialize_weights) and preparation
# -----------------------------------------------------------------------------
def init_params(key, input_size, hidden_sizes=HIDDEN_SIZES, randomize_bn=False):
    """Linear: xavier_normal_ weights, zero bias.
       BatchNorm1d: gamma=1, beta=0; fresh running stats mean=0, var=1.
       randomize_bn=True simulates trained running stats (exercises the BN path)."""
    params = []
    prev = input_size
    sizes = list(hidden_sizes) + [1]
    keys = jax.random.split(key, 3 * len(sizes))
    for idx, h in enumerate(sizes):
        kw, km, kv = keys[3 * idx], keys[3 * idx + 1], keys[3 * idx + 2]
        std = (2.0 / (prev + h)) ** 0.5                    # xavier normal
        w = std * jax.random.normal(kw, (prev, h), dtype=jnp.float32)   # [in, out]
        b = jnp.zeros((1, h), dtype=jnp.float32)
        layer = {"w": w, "b": b}
        if h != 1:
            gamma = jnp.ones((1, h), jnp.float32)
            beta = jnp.zeros((1, h), jnp.float32)
            if randomize_bn:
                mean = 0.5 * jax.random.normal(km, (1, h), jnp.float32)
                var = jnp.exp(0.5 * jax.random.normal(kv, (1, h), jnp.float32))
            else:
                mean = jnp.zeros((1, h), jnp.float32)
                var = jnp.ones((1, h), jnp.float32)
            scale = gamma / jnp.sqrt(var + BN_EPS)
            shift = beta - mean * scale
            layer.update(gamma=gamma, beta=beta, mean=mean, var=var,
                         scale=scale, shift=shift)
        params.append(layer)
        prev = h
    return params


def prepare_kernel_params(params, weight_dtype=jnp.bfloat16):
    """Fold each hidden layer's BN affine into the NEXT layer's Linear:
         (z*s + t) @ W + b  ==  z @ (s^T * W) + (t @ W + b)
       then zero-pad feature dims to multiples of 128 and cast weights."""
    n = len(params)
    folded = []
    for k, layer in enumerate(params):
        w, b = layer["w"], layer["b"]
        if k > 0:
            s = params[k - 1]["scale"]                     # [1, in]
            t = params[k - 1]["shift"]                     # [1, in]
            b = b + t @ w
            w = s.reshape(-1, 1) * w
        folded.append((w, b))

    flat = []
    for k, (w, b) in enumerate(folded):
        in_dim, out_dim = w.shape
        pad_in = in_dim if k == 0 else _round_up(in_dim, LANE)
        is_last = (k == n - 1)
        pad_out = out_dim if is_last else _round_up(out_dim, LANE)
        w_p = jnp.zeros((pad_in, pad_out), jnp.float32).at[:in_dim, :out_dim].set(w)
        b_p = jnp.zeros((1, pad_out), jnp.float32).at[:, :out_dim].set(b)
        if is_last:
            w_p = w_p.reshape(1, pad_in)                   # row vector for lane reduce
            b_p = b_p.reshape(1, 1)
        flat.append(w_p.astype(weight_dtype))              # weights: bf16 (or f32)
        flat.append(b_p)                                   # biases stay f32
    return tuple(flat)


# -----------------------------------------------------------------------------
# Pallas wrapper
# -----------------------------------------------------------------------------
@functools.partial(jax.jit, static_argnames=("tile_cap",))
def fao_forward(x, kernel_params, *, tile_cap=4096):
    """x: [B, input_size] float -> [B, 1] float32."""
    B, in_dim = x.shape
    x = x.astype(jnp.bfloat16)          # halves the only HBM stream scaling with B

    b_pad, tile_b = _pick_batch_tiling(B, tile_cap)
    if b_pad != B:
        x = jnp.pad(x, ((0, b_pad - B), (0, 0)))
    num_tiles = b_pad // tile_b

    def resident(arr):
        # Whole array as one block with a constant index -> stays VMEM-resident.
        return pl.BlockSpec(arr.shape, lambda i: (0, 0))

    in_specs = [pl.BlockSpec((tile_b, in_dim), lambda i: (i, 0))]
    in_specs += [resident(a) for a in kernel_params]
    out_specs = pl.BlockSpec((tile_b, 1), lambda i: (i, 0))

    w0, b0, w1, b1, w2, b2, w3, b3, w4, b4 = kernel_params
    flops = 2 * b_pad * (sum(int(w.shape[0]) * int(w.shape[1])
                             for w in (w0, w1, w2, w3)) + int(w4.shape[1]))
    bytes_accessed = (x.size * x.dtype.itemsize + b_pad * 4
                      + sum(int(a.size) * a.dtype.itemsize for a in kernel_params))
    cost = pl.CostEstimate(flops=flops, transcendentals=0,
                           bytes_accessed=bytes_accessed)

    out = pl.pallas_call(
        _fao_mlp_kernel,
        out_shape=jax.ShapeDtypeStruct((b_pad, 1), jnp.float32),
        grid=(num_tiles,),
        in_specs=in_specs,
        out_specs=out_specs,
        compiler_params=pltpu.CompilerParams(
            dimension_semantics=("parallel",),     # v7x: batch tiles over both TCs
            vmem_limit_bytes=48 * 1024 * 1024),
        cost_estimate=cost,
    )(x, *kernel_params)
    return out[:B]


# -----------------------------------------------------------------------------
# Pure-JAX references
# -----------------------------------------------------------------------------
def reference_forward_f32(x, params):
    """Original (unfolded) PyTorch eval semantics in true f32."""
    h = x.astype(jnp.float32)
    for layer in params[:-1]:
        h = jnp.dot(h, layer["w"], precision=_HIGHEST) + layer["b"]
        h = jnp.where(h > 0, h, LEAKY_SLOPE * h)
        # Dropout: identity in eval.  BatchNorm1d with running stats:
        h = ((h - layer["mean"]) / jnp.sqrt(layer["var"] + BN_EPS)
             * layer["gamma"] + layer["beta"])
    return jnp.dot(h, params[-1]["w"], precision=_HIGHEST) + params[-1]["b"]


def reference_forward_folded(x, kernel_params):
    """Same folded/padded parameterization (and dtypes) as the kernel."""
    w0, b0, w1, b1, w2, b2, w3, b3, w4, b4 = kernel_params
    h = x.astype(w0.dtype)
    for w, b in ((w0, b0), (w1, b1), (w2, b2), (w3, b3)):
        acc = jnp.dot(h, w, preferred_element_type=jnp.float32,
                      precision=_HIGHEST) + b
        h = jnp.maximum(acc, LEAKY_SLOPE * acc).astype(w.dtype)
    return (jnp.sum(h.astype(jnp.float32) * w4.astype(jnp.float32),
                    axis=-1, keepdims=True) + b4)


if __name__ == "__main__":
    key = jax.random.PRNGKey(0)
    k_x, k_p = jax.random.split(key)

    batch = 300                 # deliberately not a multiple of the batch tile
    input_size = 32

    x = jax.random.normal(k_x, (batch, input_size), dtype=jnp.float32)
    params = init_params(k_p, input_size, randomize_bn=True)
    kernel_params = prepare_kernel_params(params)               # bf16 weights

    out = jax.block_until_ready(fao_forward(x, kernel_params))
    assert out.shape == (batch, 1), out.shape
    assert bool(jnp.all(jnp.isfinite(out))), "non-finite kernel output"

    # (1) Kernel vs. XLA reference using the identical folded/padded/bf16 params.
    ref_bf16 = reference_forward_folded(x, kernel_params)
    assert jnp.allclose(out, ref_bf16, atol=2e-3, rtol=2e-3), \
        "kernel mismatch vs folded/bf16 reference"

    # (2) BN-fold + padding validated in pure f32 against unfolded PyTorch semantics.
    kernel_params_f32 = prepare_kernel_params(params, weight_dtype=jnp.float32)
    ref_folded_f32 = reference_forward_folded(x, kernel_params_f32)
    ref_f32 = reference_forward_f32(x, params)
    assert jnp.allclose(ref_folded_f32, ref_f32, atol=1e-4, rtol=1e-4), \
        "BN fold / padding mismatch vs f32 reference"

    print("KERNEL_OK")
</pallas_src>

<mosaic_0001>
module attributes {stable_mosaic.version = 11 : i64} {
  func.func @_fao_mlp_kernel(%arg0: i32, %arg1: memref<512x32xbf16, #tpu.memory_space<vmem>>, %arg2: memref<32x256xbf16, #tpu.memory_space<vmem>>, %arg3: memref<1x256xf32, #tpu.memory_space<vmem>>, %arg4: memref<256x128xbf16, #tpu.memory_space<vmem>>, %arg5: memref<1x128xf32, #tpu.memory_space<vmem>>, %arg6: memref<128x128xbf16, #tpu.memory_space<vmem>>, %arg7: memref<1x128xf32, #tpu.memory_space<vmem>>, %arg8: memref<128x128xbf16, #tpu.memory_space<vmem>>, %arg9: memref<1x128xf32, #tpu.memory_space<vmem>>, %arg10: memref<1x128xbf16, #tpu.memory_space<vmem>>, %arg11: memref<1x1xf32, #tpu.memory_space<vmem>>, %arg12: memref<512x1xf32, #tpu.memory_space<vmem>>) attributes {dimension_semantics = [#tpu.dimension_semantics<parallel>], iteration_bounds = array<i64: 1>, scalar_prefetch = 0 : i64, scratch_operands = 0 : i64, tpu.core_type = #tpu.core_type<tc>, window_params = [{transform_indices = @transform_0, window_bounds = array<i64: 512, 32>}, {pipeline_mode = #tpu.pipeline_mode<synchronous>, transform_indices = @transform_1, window_bounds = array<i64: 32, 256>}, {pipeline_mode = #tpu.pipeline_mode<synchronous>, transform_indices = @transform_2, window_bounds = array<i64: 1, 256>}, {pipeline_mode = #tpu.pipeline_mode<synchronous>, transform_indices = @transform_3, window_bounds = array<i64: 256, 128>}, {pipeline_mode = #tpu.pipeline_mode<synchronous>, transform_indices = @transform_4, window_bounds = array<i64: 1, 128>}, {pipeline_mode = #tpu.pipeline_mode<synchronous>, transform_indices = @transform_5, window_bounds = array<i64: 128, 128>}, {pipeline_mode = #tpu.pipeline_mode<synchronous>, transform_indices = @transform_6, window_bounds = array<i64: 1, 128>}, {pipeline_mode = #tpu.pipeline_mode<synchronous>, transform_indices = @transform_7, window_bounds = array<i64: 128, 128>}, {pipeline_mode = #tpu.pipeline_mode<synchronous>, transform_indices = @transform_8, window_bounds = array<i64: 1, 128>}, {pipeline_mode = #tpu.pipeline_mode<synchronous>, transform_indices = @transform_9, window_bounds = array<i64: 1, 128>}, {pipeline_mode = #tpu.pipeline_mode<synchronous>, transform_indices = @transform_10, window_bounds = array<i64: 1, 1>}, {transform_indices = @transform_11, window_bounds = array<i64: 512, 1>}]} {
    %c0 = arith.constant 0 : index
    %c0_0 = arith.constant 0 : index
    %0 = vector.load %arg1[%c0, %c0_0] : memref<512x32xbf16, #tpu.memory_space<vmem>>, vector<512x32xbf16>
    %c0_1 = arith.constant 0 : index
    %c0_2 = arith.constant 0 : index
    %1 = vector.load %arg2[%c0_1, %c0_2] : memref<32x256xbf16, #tpu.memory_space<vmem>>, vector<32x256xbf16>
    %cst = arith.constant dense<0.000000e+00> : vector<512x256xf32>
    %2 = tpu.matmul %0, %1, %cst {dimension_numbers = #tpu.dot_dimension_numbers<[1], [0], [0], [1], [0, 0, 1, 1], [], []>} : vector<512x32xbf16>, vector<32x256xbf16>, vector<512x256xf32> -> vector<512x256xf32>
    %c0_3 = arith.constant 0 : index
    %c0_4 = arith.constant 0 : index
    %3 = vector.load %arg3[%c0_3, %c0_4] : memref<1x256xf32, #tpu.memory_space<vmem>>, vector<1x256xf32>
    %4 = vector.broadcast %3 : vector<1x256xf32> to vector<512x256xf32>
    %5 = arith.addf %2, %4 : vector<512x256xf32>
    %cst_5 = arith.constant 1.000000e-01 : f32
    %6 = vector.broadcast %cst_5 : f32 to vector<512x256xf32>
    %7 = arith.mulf %6, %5 : vector<512x256xf32>
    %8 = arith.maximumf %5, %7 : vector<512x256xf32>
    %9 = arith.truncf %8 : vector<512x256xf32> to vector<512x256xbf16>
    %c0_6 = arith.constant 0 : index
    %c0_7 = arith.constant 0 : index
    %10 = vector.load %arg4[%c0_6, %c0_7] : memref<256x128xbf16, #tpu.memory_space<vmem>>, vector<256x128xbf16>
    %cst_8 = arith.constant dense<0.000000e+00> : vector<512x128xf32>
    %11 = tpu.matmul %9, %10, %cst_8 {dimension_numbers = #tpu.dot_dimension_numbers<[1], [0], [0], [1], [0, 0, 1, 1], [], []>} : vector<512x256xbf16>, vector<256x128xbf16>, vector<512x128xf32> -> vector<512x128xf32>
    %c0_9 = arith.constant 0 : index
    %c0_10 = arith.constant 0 : index
    %12 = vector.load %arg5[%c0_9, %c0_10] : memref<1x128xf32, #tpu.memory_space<vmem>>, vector<1x128xf32>
    %13 = vector.broadcast %12 : vector<1x128xf32> to vector<512x128xf32>
    %14 = arith.addf %11, %13 : vector<512x128xf32>
    %cst_11 = arith.constant 1.000000e-01 : f32
    %15 = vector.broadcast %cst_11 : f32 to vector<512x128xf32>
    %16 = arith.mulf %15, %14 : vector<512x128xf32>
    %17 = arith.maximumf %14, %16 : vector<512x128xf32>
    %18 = arith.truncf %17 : vector<512x128xf32> to vector<512x128xbf16>
    %c0_12 = arith.constant 0 : index
    %c0_13 = arith.constant 0 : index
    %19 = vector.load %arg6[%c0_12, %c0_13] : memref<128x128xbf16, #tpu.memory_space<vmem>>, vector<128x128xbf16>
    %cst_14 = arith.constant dense<0.000000e+00> : vector<512x128xf32>
    %20 = tpu.matmul %18, %19, %cst_14 {dimension_numbers = #tpu.dot_dimension_numbers<[1], [0], [0], [1], [0, 0, 1, 1], [], []>} : vector<512x128xbf16>, vector<128x128xbf16>, vector<512x128xf32> -> vector<512x128xf32>
    %c0_15 = arith.constant 0 : index
    %c0_16 = arith.constant 0 : index
    %21 = vector.load %arg7[%c0_15, %c0_16] : memref<1x128xf32, #tpu.memory_space<vmem>>, vector<1x128xf32>
    %22 = vector.broadcast %21 : vector<1x128xf32> to vector<512x128xf32>
    %23 = arith.addf %20, %22 : vector<512x128xf32>
    %cst_17 = arith.constant 1.000000e-01 : f32
    %24 = vector.broadcast %cst_17 : f32 to vector<512x128xf32>
    %25 = arith.mulf %24, %23 : vector<512x128xf32>
    %26 = arith.maximumf %23, %25 : vector<512x128xf32>
    %27 = arith.truncf %26 : vector<512x128xf32> to vector<512x128xbf16>
    %c0_18 = arith.constant 0 : index
    %c0_19 = arith.constant 0 : index
    %28 = vector.load %arg8[%c0_18, %c0_19] : memref<128x128xbf16, #tpu.memory_space<vmem>>, vector<128x128xbf16>
    %cst_20 = arith.constant dense<0.000000e+00> : vector<512x128xf32>
    %29 = tpu.matmul %27, %28, %cst_20 {dimension_numbers = #tpu.dot_dimension_numbers<[1], [0], [0], [1], [0, 0, 1, 1], [], []>} : vector<512x128xbf16>, vector<128x128xbf16>, vector<512x128xf32> -> vector<512x128xf32>
    %c0_21 = arith.constant 0 : index
    %c0_22 = arith.constant 0 : index
    %30 = vector.load %arg9[%c0_21, %c0_22] : memref<1x128xf32, #tpu.memory_space<vmem>>, vector<1x128xf32>
    %31 = vector.broadcast %30 : vector<1x128xf32> to vector<512x128xf32>
    %32 = arith.addf %29, %31 : vector<512x128xf32>
    %cst_23 = arith.constant 1.000000e-01 : f32
    %33 = vector.broadcast %cst_23 : f32 to vector<512x128xf32>
    %34 = arith.mulf %33, %32 : vector<512x128xf32>
    %35 = arith.maximumf %32, %34 : vector<512x128xf32>
    %36 = arith.truncf %35 : vector<512x128xf32> to vector<512x128xbf16>
    %c0_24 = arith.constant 0 : index
    %c0_25 = arith.constant 0 : index
    %37 = vector.load %arg10[%c0_24, %c0_25] : memref<1x128xbf16, #tpu.memory_space<vmem>>, vector<1x128xbf16>
    %38 = arith.extf %37 : vector<1x128xbf16> to vector<1x128xf32>
    %39 = arith.extf %36 : vector<512x128xbf16> to vector<512x128xf32>
    %40 = vector.broadcast %38 : vector<1x128xf32> to vector<512x128xf32>
    %41 = arith.mulf %39, %40 : vector<512x128xf32>
    %cst_26 = arith.constant dense<0.000000e+00> : vector<512xf32>
    %42 = vector.multi_reduction <add>, %41, %cst_26 [1] : vector<512x128xf32> to vector<512xf32>
    %43 = vector.shape_cast %42 : vector<512xf32> to vector<512x1xf32>
    %c0_27 = arith.constant 0 : index
    %c0_28 = arith.constant 0 : index
    %44 = vector.load %arg11[%c0_27, %c0_28] : memref<1x1xf32, #tpu.memory_space<vmem>>, vector<1x1xf32>
    %45 = vector.broadcast %44 : vector<1x1xf32> to vector<512x1xf32>
    %46 = arith.addf %43, %45 : vector<512x1xf32>
    %c0_29 = arith.constant 0 : index
    %c0_30 = arith.constant 0 : index
    %47 = vector.load %arg12[%c0_29, %c0_30] : memref<512x1xf32, #tpu.memory_space<vmem>>, vector<512x1xf32>
    tpu.vector_store %arg12[%c0_29, %c0_30], %46 {strides = array<i32>} : memref<512x1xf32, #tpu.memory_space<vmem>>, vector<512x1xf32>,
    return
  }
  func.func @transform_0(%arg0: i32) -> (i32, i32) {
    %c0_i32 = arith.constant 0 : i32
    %c0_i32_0 = arith.constant 0 : i32
    return %arg0, %c0_i32 : i32, i32
  }
  func.func @transform_1(%arg0: i32) -> (i32, i32) {
    %c0_i32 = arith.constant 0 : i32
    %c0_i32_0 = arith.constant 0 : i32
    %c0_i32_1 = arith.constant 0 : i32
    return %c0_i32, %c0_i32_0 : i32, i32
  }
  func.func @transform_2(%arg0: i32) -> (i32, i32) {
    %c0_i32 = arith.constant 0 : i32
    %c0_i32_0 = arith.constant 0 : i32
    %c0_i32_1 = arith.constant 0 : i32
    return %c0_i32, %c0_i32_0 : i32, i32
  }
  func.func @transform_3(%arg0: i32) -> (i32, i32) {
    %c0_i32 = arith.constant 0 : i32
    %c0_i32_0 = arith.constant 0 : i32
    %c0_i32_1 = arith.constant 0 : i32
    return %c0_i32, %c0_i32_0 : i32, i32
  }
  func.func @transform_4(%arg0: i32) -> (i32, i32) {
    %c0_i32 = arith.constant 0 : i32
    %c0_i32_0 = arith.constant 0 : i32
    %c0_i32_1 = arith.constant 0 : i32
    return %c0_i32, %c0_i32_0 : i32, i32
  }
  func.func @transform_5(%arg0: i32) -> (i32, i32) {
    %c0_i32 = arith.constant 0 : i32
    %c0_i32_0 = arith.constant 0 : i32
    %c0_i32_1 = arith.constant 0 : i32
    return %c0_i32, %c0_i32_0 : i32, i32
  }
  func.func @transform_6(%arg0: i32) -> (i32, i32) {
    %c0_i32 = arith.constant 0 : i32
    %c0_i32_0 = arith.constant 0 : i32
    %c0_i32_1 = arith.constant 0 : i32
    return %c0_i32, %c0_i32_0 : i32, i32
  }
  func.func @transform_7(%arg0: i32) -> (i32, i32) {
    %c0_i32 = arith.constant 0 : i32
    %c0_i32_0 = arith.constant 0 : i32
    %c0_i32_1 = arith.constant 0 : i32
    return %c0_i32, %c0_i32_0 : i32, i32
  }
  func.func @transform_8(%arg0: i32) -> (i32, i32) {
    %c0_i32 = arith.constant 0 : i32
    %c0_i32_0 = arith.constant 0 : i32
    %c0_i32_1 = arith.constant 0 : i32
    return %c0_i32, %c0_i32_0 : i32, i32
  }
  func.func @transform_9(%arg0: i32) -> (i32, i32) {
    %c0_i32 = arith.constant 0 : i32
    %c0_i32_0 = arith.constant 0 : i32
    %c0_i32_1 = arith.constant 0 : i32
    return %c0_i32, %c0_i32_0 : i32, i32
  }
  func.func @transform_10(%arg0: i32) -> (i32, i32) {
    %c0_i32 = arith.constant 0 : i32
    %c0_i32_0 = arith.constant 0 : i32
    %c0_i32_1 = arith.constant 0 : i32
    return %c0_i32, %c0_i32_0 : i32, i32
  }
  func.func @transform_11(%arg0: i32) -> (i32, i32) {
    %c0_i32 = arith.constant 0 : i32
    %c0_i32_0 = arith.constant 0 : i32
    return %arg0, %c0_i32 : i32, i32
  }
}

</mosaic_0001>

<bundles_post_ra>
// kernel: fao_forward.1
= control target key start
LH: loop header
LB: loop body
LE: loop exit
PB: predicated region body
PF: predicated region fallthrough
CT: control target
= control target key end

     0   :  { %v3530_v1 = vmov 0   ;;  %vm301_vm0 = vcmask 261120   ;;  %v111_v46 = vlaneseq  ;;  %vm3028_vm1 = vcmask 7168   ;;  %s4629_s1 = inlined_call_operand.vmem [shape: bf16[32,256], index: 1, kind: input, shape index: {}]   ;;  %s4630_s0 = inlined_call_operand.vmem [shape: bf16[512,32], index: 0, kind: input, shape index: {}]   ;;  %s4631_s3 = inlined_call_operand.vmem [shape: bf16[256,128], index: 3, kind: input, shape index: {}]   ;;  %s4632_s5 = inlined_call_operand.vmem [shape: bf16[128,128], index: 5, kind: input, shape index: {}]   ;;  %s4633_s2 = inlined_call_operand.vmem [shape: f32[1,256], index: 2, kind: input, shape index: {}]   ;;  %s4634_s7 = inlined_call_operand.vmem [shape: bf16[128,128], index: 7, kind: input, shape index: {}]   ;;  %s4635_s4 = inlined_call_operand.vmem [shape: f32[1,128], index: 4, kind: input, shape index: {}]   ;;  %s4636_s6 = inlined_call_operand.vmem [shape: f32[1,128], index: 6, kind: input, shape index: {}]   ;;  %s4637_s8 = inlined_call_operand.vmem [shape: f32[1,128], index: 8, kind: input, shape index: {}]   ;;  %s4638_s9 = inlined_call_operand.vmem [shape: bf16[1,128], index: 9, kind: input, shape index: {}]   ;;  %s4639_s10 = inlined_call_operand.<no memory space> [shape: f32[1,1], index: 10, kind: input, shape index: {}]   ;;  %s4640_s11 = inlined_call_operand.vmem [shape: f32[512,1], index: 11, kind: output, shape index: {}]  }
   0x1   :  { %v3458_v0 = vld [vmem:[%s4629_s1 + $0x14] ss:$8 sps:$4 sm:$0xff]   ;;  %430 = vmatprep.mubr.bf16.mxu0 %v3530_v1  ;;  %1206 = vmatprep.subr.bf16.mxu1 %v3530_v1  ;;  %v3460_v2 = vld [vmem:[%s4629_s1 + $0x10] ss:$8 sps:$4 sm:$0xff]   ;;  %v3461_v3 = vld [vmem:[%s4629_s1 + $0x4] ss:$8 sps:$4 sm:$0xff]  }
   0x2   :  { %410 = vmatprep.subr.bf16.mxu0 %v3458_v0  ;;  %v3463_v4 = vld [vmem:[%s4629_s1] ss:$8 sps:$4 sm:$0xff]   ;;  %v3466_v7 = vld [vmem:[%s4630_s0 + $0x10] sm:$0xff]   ;;  %v3483_v8 = vld [vmem:[%s4631_s3 + $0x38] sm:$0xff]   ;;  %v3793_v48 = vshrl.u32 %v111_v46, 7 }
   0x3   :  { %411 = vmatpush1.bf16.msra.mxu0 %v3460_v2  ;;  %v3464_v5 = vld [vmem:[%s4630_s0] sm:$0xff]   ;;  %v3465_v6 = vld [vmem:[%s4630_s0 + $0x8] sm:$0xff]   ;;  %1207 = vmatpush1.bf16.msra.mxu1 %v3483_v8  ;;  %v3484_v9 = vld [vmem:[%s4631_s3 + $0x30] sm:$0xff]  }
   0x4   :  { %412 = vmatprep.subr.bf16.mxu0 %v3461_v3  ;;  %v3467_v10 = vld [vmem:[%s4630_s0 + $0x18] sm:$0xff]   ;;  %1208 = vmatprep.subr.bf16.mxu1 %v3530_v1  ;;  %v3486_v11 = vld [vmem:[%s4631_s3 + $0x28] sm:$0xff]   ;;  %v3487_v12 = vld [vmem:[%s4631_s3 + $0x20] sm:$0xff]   ;;  %v117_v49 = vsub.s32 1, %v3793_v48  ;;  %v113_v50 = vsub.s32 0, %v3793_v48 }
   0x5   :  { %v3468_v13 = vld [vmem:[%s4630_s0 + $0x20] sm:$0xff]   ;;  %v3489_v14 = vld [vmem:[%s4631_s3 + $0x18] sm:$0xff]   ;;  %v3490_v15 = vld [vmem:[%s4631_s3 + $0x10] sm:$0xff]  }
   0x6   :  { %v3469_v16 = vld [vmem:[%s4630_s0 + $0x28] sm:$0xff]   ;;  %v3493_v18 = vld [vmem:[%s4631_s3] sm:$0xff]   ;;  %v3470_v19 = vld [vmem:[%s4630_s0 + $0x30] sm:$0xff]  }
   0x7   :  { %413 = vmatpush1.bf16.msra.mxu0 %v3463_v4  ;;  %1209 = vmatpush1.bf16.msra.mxu1 %v3484_v9  ;;  %v3492_v17 = vld [vmem:[%s4631_s3 + $0x8] sm:$0xff]   ;;  %v3495_v20 = vld [vmem:[%s4631_s3 + $0x78] sm:$0xff]   ;;  %v3496_v21 = vld [vmem:[%s4631_s3 + $0x70] sm:$0xff]  }
   0x8   :  { %1210 = vmatprep.subr.bf16.mxu1 %v3530_v1  ;;  %v3471_v22 = vld [vmem:[%s4630_s0 + $0x38] sm:$0xff]   ;;  %v3498_v23 = vld [vmem:[%s4631_s3 + $0x68] sm:$0xff]   ;;  %v3499_v24 = vld [vmem:[%s4631_s3 + $0x60] sm:$0xff]  }
   0x9   :  { %v3472_v25 = vld [vmem:[%s4630_s0 + $0x40] sm:$0xff]   ;;  %v3501_v26 = vld [vmem:[%s4631_s3 + $0x58] sm:$0xff]   ;;  %v3502_v27 = vld [vmem:[%s4631_s3 + $0x50] sm:$0xff]  }
   0xa   :  { %3133 = vmatmul.mubr.msk.bf16.vlgmr.msra.gmra.mxu0 %vm301_vm0, %v3464_v5  ;;  %v3473_v28 = vld [vmem:[%s4630_s0 + $0x48] sm:$0xff]   ;;  %v3505_v30 = vld [vmem:[%s4631_s3 + $0x40] sm:$0xff]   ;;  %v3474_v31 = vld [vmem:[%s4630_s0 + $0x50] sm:$0xff]  }
   0xb   :  { %440 = vmatprep.mubr.bf16.mxu0 %v3530_v1  ;;  %1211 = vmatpush1.bf16.msra.mxu1 %v3486_v11  ;;  %v3504_v29 = vld [vmem:[%s4631_s3 + $0x48] sm:$0xff]   ;;  %v3475_v32 = vld [vmem:[%s4630_s0 + $0x58] sm:$0xff]   ;;  %v3476_v33 = vld [vmem:[%s4630_s0 + $0x60] sm:$0xff]  }
   0xc   :  { %1212 = vmatprep.subr.bf16.mxu1 %v3530_v1  ;;  %v3477_v34 = vld [vmem:[%s4630_s0 + $0x68] sm:$0xff]   ;;  %v3478_v35 = vld [vmem:[%s4630_s0 + $0x70] sm:$0xff]   ;;  %v3479_v36 = vld [vmem:[%s4630_s0 + $0x78] sm:$0xff]  }
   0xd   :  { %v3480_v37 = vld [vmem:[%s4630_s0 + $0x80] sm:$0xff]   ;;  %v3481_v38 = vld [vmem:[%s4630_s0 + $0x88] sm:$0xff]   ;;  %v3482_v39 = vld [vmem:[%s4630_s0 + $0x90] sm:$0xff]  }
   0xe   :  { %v3485_v40 = vld [vmem:[%s4630_s0 + $0x98] sm:$0xff]   ;;  %v3488_v42 = vld [vmem:[%s4630_s0 + $0xa0] sm:$0xff]   ;;  %v3491_v43 = vld [vmem:[%s4630_s0 + $0xa8] sm:$0xff]  }
   0xf   :  { %1213 = vmatpush1.bf16.msra.mxu1 %v3487_v12  ;;  %v3512_v41 = vld [vmem:[%s4632_s5 + $0x38] sm:$0xff]   ;;  %v3494_v44 = vld [vmem:[%s4630_s0 + $0xb0] sm:$0xff]   ;;  %v3500_v51 = vld [vmem:[%s4630_s0 + $0xc0] sm:$0xff]  }
  0x10   :  { %1214 = vmatprep.subr.bf16.mxu1 %v3530_v1  ;;  %3281 = vmatprep.subr.bf16.mxu0 %v3512_v41  ;;  %v3497_v45 = vld [vmem:[%s4630_s0 + $0xb8] sm:$0xff]   ;;  %v3513_v47 = vld [vmem:[%s4632_s5 + $0x30] sm:$0xff]   ;;  %v109_v52 = vld [vmem:[%s4633_s2] sm:$0x3] }
  0x11   :  { %3282 = vmatpush3.bf16.msra.mxu0 %v3512_v41  ;;  %v3804_v53 = vrot.slane %v109_v52, %v117_v49  ;;  %v3808_v54 = vrot.slane %v109_v52, %v113_v50  ;;  %v3503_v60 = vld [vmem:[%s4630_s0 + $0xc8] sm:$0xff]  }
  0x12   :  { %3134 = vmatmul.mubr.msk.bf16.gmra.mxu0 %vm301_vm0, %v3465_v6  ;;  %3283 = vmatprep.subr.bf16.mxu0 %v3513_v47  ;;  %v3514_v41 = vld [vmem:[%s4632_s5 + $0x28] sm:$0xff]  }
  0x13   :  { %450 = vmatprep.mubr.bf16.mxu0 %v3530_v1  ;;  %1215 = vmatpush1.bf16.msra.mxu1 %v3489_v14  ;;  %v3506_v14 = vld [vmem:[%s4630_s0 + $0xd0] sm:$0xff]  }
  0x14   :  { %1216 = vmatprep.subr.bf16.mxu1 %v3530_v1 }
  0x15   :  { %3284 = vmatpush3.bf16.msra.mxu0 %v3513_v47 }
  0x16   :  { %3285 = vmatprep.subr.bf16.mxu0 %v3514_v41 }
  0x17   :  { %1217 = vmatpush1.bf16.msra.mxu1 %v3490_v15 }
  0x18   :  { %1218 = vmatprep.subr.bf16.mxu1 %v3530_v1 }
  0x19   :  { %3286 = vmatpush3.bf16.msra.mxu0 %v3514_v41 }
  0x1a   :  { %3135 = vmatmul.mubr.msk.bf16.gmra.mxu0 %vm301_vm0, %v3466_v7 }
  0x1b   :  { %460 = vmatprep.mubr.bf16.mxu0 %v3530_v1  ;;  %1219 = vmatpush1.bf16.msra.mxu1 %v3492_v17 }
  0x1c   :  { %1220 = vmatprep.subr.bf16.mxu1 %v3530_v1 }
  0x1f   :  { %1221 = vmatpush1.bf16.msra.mxu1 %v3493_v18 }
  0x20   :  { %1222 = vmatprep.subr.bf16.mxu1 %v3530_v1 }
  0x22   :  { %3136 = vmatmul.mubr.msk.bf16.gmra.mxu0 %vm301_vm0, %v3467_v10 }
  0x23   :  { %470 = vmatprep.mubr.bf16.mxu0 %v3530_v1  ;;  %1223 = vmatpush2.bf16.msra.mxu1 %v3495_v20 }
  0x24   :  { %1224 = vmatprep.subr.bf16.mxu1 %v3530_v1 }
  0x27   :  { %1225 = vmatpush2.bf16.msra.mxu1 %v3496_v21 }
  0x28   :  { %1226 = vmatprep.subr.bf16.mxu1 %v3530_v1 }
  0x2a   :  { %3137 = vmatmul.mubr.msk.bf16.gmra.mxu0 %vm301_vm0, %v3468_v13 }
  0x2b   :  { %480 = vmatprep.mubr.bf16.mxu0 %v3530_v1  ;;  %1227 = vmatpush2.bf16.msra.mxu1 %v3498_v23 }
  0x2c   :  { %1228 = vmatprep.subr.bf16.mxu1 %v3530_v1 }
  0x2f   :  { %1229 = vmatpush2.bf16.msra.mxu1 %v3499_v24 }
  0x30   :  { %1230 = vmatprep.subr.bf16.mxu1 %v3530_v1 }
  0x32   :  { %3138 = vmatmul.mubr.msk.bf16.gmra.mxu0 %vm301_vm0, %v3469_v16 }
  0x33   :  { %490 = vmatprep.mubr.bf16.mxu0 %v3530_v1  ;;  %1231 = vmatpush2.bf16.msra.mxu1 %v3501_v26 }
  0x34   :  { %1232 = vmatprep.subr.bf16.mxu1 %v3530_v1 }
  0x37   :  { %1233 = vmatpush2.bf16.msra.mxu1 %v3502_v27 }
  0x38   :  { %1234 = vmatprep.subr.bf16.mxu1 %v3530_v1 }
  0x3a   :  { %3139 = vmatmul.mubr.msk.bf16.gmra.mxu0 %vm301_vm0, %v3470_v19 }
  0x3b   :  { %500 = vmatprep.mubr.bf16.mxu0 %v3530_v1  ;;  %1235 = vmatpush2.bf16.msra.mxu1 %v3504_v29 }
  0x3c   :  { %1236 = vmatprep.subr.bf16.mxu1 %v3530_v1 }
  0x3f   :  { %1237 = vmatpush2.bf16.msra.mxu1 %v3505_v30 }
  0x42   :  { %3140 = vmatmul.mubr.msk.bf16.gmra.mxu0 %vm301_vm0, %v3471_v22 }
  0x43   :  { %510 = vmatprep.mubr.bf16.mxu0 %v3530_v1 }
  0x4a   :  { %3141 = vmatmul.mubr.msk.bf16.gmra.mxu0 %vm301_vm0, %v3472_v25 }
  0x4b   :  { %520 = vmatprep.mubr.bf16.mxu0 %v3530_v1 }
  0x52   :  { %3142 = vmatmul.mubr.msk.bf16.gmra.mxu0 %vm301_vm0, %v3473_v28 }
  0x53   :  { %530 = vmatprep.mubr.bf16.mxu0 %v3530_v1 }
  0x5a   :  { %3143 = vmatmul.mubr.msk.bf16.gmra.mxu0 %vm301_vm0, %v3474_v31 }
  0x5b   :  { %540 = vmatprep.mubr.bf16.mxu0 %v3530_v1 }
  0x62   :  { %3144 = vmatmul.mubr.msk.bf16.gmra.mxu0 %vm301_vm0, %v3475_v32 }
  0x63   :  { %550 = vmatprep.mubr.bf16.mxu0 %v3530_v1 }
  0x6a   :  { %3145 = vmatmul.mubr.msk.bf16.gmra.mxu0 %vm301_vm0, %v3476_v33  ;;  %v3507_v33 = vld [vmem:[%s4630_s0 + $0xd8] sm:$0xff]  }
  0x6b   :  { %560 = vmatprep.mubr.bf16.mxu0 %v3530_v1 }
  0x72   :  { %3146 = vmatmul.mubr.msk.bf16.gmra.mxu0 %vm301_vm0, %v3477_v34 }
  0x73   :  { %570 = vmatprep.mubr.bf16.mxu0 %v3530_v1 }
  0x7a   :  { %3147 = vmatmul.mubr.msk.bf16.gmra.mxu0 %vm301_vm0, %v3478_v35 }
  0x7b   :  { %580 = vmatprep.mubr.bf16.mxu0 %v3530_v1 }
  0x82   :  { %3148 = vmatmul.mubr.msk.bf16.gmra.mxu0 %vm301_vm0, %v3479_v36 }
  0x83   :  { %590 = vmatprep.mubr.bf16.mxu0 %v3530_v1 }
  0x8a   :  { %3149 = vmatmul.mubr.msk.bf16.gmra.mxu0 %vm301_vm0, %v3480_v37 }
  0x8b   :  { %600 = vmatprep.mubr.bf16.mxu0 %v3530_v1 }
  0x92   :  { %3150 = vmatmul.mubr.msk.bf16.gmra.mxu0 %vm301_vm0, %v3481_v38 }
  0x93   :  { %610 = vmatprep.mubr.bf16.mxu0 %v3530_v1 }
  0x9a   :  { %3151 = vmatmul.mubr.msk.bf16.gmra.mxu0 %vm301_vm0, %v3482_v39 }
  0x9b   :  { %620 = vmatprep.mubr.bf16.mxu0 %v3530_v1 }
  0xa2   :  { %3152 = vmatmul.mubr.msk.bf16.gmra.mxu0 %vm301_vm0, %v3485_v40 }
  0xa3   :  { %630 = vmatprep.mubr.bf16.mxu0 %v3530_v1 }
  0xaa   :  { %3153 = vmatmul.mubr.msk.bf16.gmra.mxu0 %vm301_vm0, %v3488_v42 }
  0xab   :  { %640 = vmatprep.mubr.bf16.mxu0 %v3530_v1 }
  0xb2   :  { %3154 = vmatmul.mubr.msk.bf16.gmra.mxu0 %vm301_vm0, %v3491_v43 }
  0xb3   :  { %650 = vmatprep.mubr.bf16.mxu0 %v3530_v1 }
  0xba   :  { %3155 = vmatmul.mubr.msk.bf16.gmra.mxu0 %vm301_vm0, %v3494_v44 }
  0xbb   :  { %660 = vmatprep.mubr.bf16.mxu0 %v3530_v1 }
  0xc2   :  { %3156 = vmatmul.mubr.msk.bf16.gmra.mxu0 %vm301_vm0, %v3497_v45 }
  0xc3   :  { %670 = vmatprep.mubr.bf16.mxu0 %v3530_v1 }
  0xca   :  { %v432_v55 = vpop.f32.mrf.mxu0  ;;  %3157 = vmatmul.mubr.msk.bf16.gmra.mxu0 %vm301_vm0, %v3500_v51 }
  0xcb   :  { %680 = vmatprep.mubr.bf16.mxu0 %v3530_v1  ;;  %v433_v58 = vadd.f32 %v432_v55, %v3808_v54 }
  0xcc   :  { %v434_v56 = vpop.f32.mrf.mxu0 }
  0xcd   :  { %v435_v57 = vadd.f32 %v434_v56, %v3804_v53  ;;  %v751_v3 = vmul.f32 0.1, %v433_v58 }
  0xce   :  { %v436_v59 = vpop.f32.mrf.mxu0 }
  0xcf   :  { %v437_v61 = vadd.f32 %v436_v59, %v3808_v54  ;;  %v752_v63 = vmul.f32 0.1, %v435_v57  ;;  %v879_v11 = vmax.f32 %v433_v58, %v751_v3 }
  0xd0   :  { %v438_v62 = vpop.f32.mrf.mxu0 }
  0xd1   :  { %v753_v0 = vmul.f32 0.1, %v437_v61  ;;  %v439_v2 = vadd.f32 %v438_v62, %v3804_v53  ;;  %v880_v9 = vmax.f32 %v435_v57, %v752_v63  ;;  %v3508_v57 = vld [vmem:[%s4630_s0 + $0xe0] sm:$0xff]  }
  0xd2   :  { %v442_v4 = vpop.f32.mrf.mxu0  ;;  %3158 = vmatmul.mubr.msk.bf16.gmra.mxu0 %vm301_vm0, %v3503_v60 }
  0xd3   :  { %v754_v5 = vmul.f32 0.1, %v439_v2  ;;  %690 = vmatprep.mubr.bf16.mxu0 %v3530_v1  ;;  %v881_v6 = vmax.f32 %v437_v61, %v753_v0  ;;  %v443_v12 = vadd.f32 %v442_v4, %v3808_v54 }
  0xd4   :  { %v444_v7 = vpop.f32.mrf.mxu0 }
  0xd5   :  { %v445_v8 = vadd.f32 %v444_v7, %v3804_v53  ;;  %v882_v10 = vmax.f32 %v439_v2, %v754_v5  ;;  %v1007_v18 = vpack.c.bf16 %v881_v6, %v879_v11  ;;  %v755_v22 = vmul.f32 0.1, %v443_v12 }
  0xd6   :  { %v446_v13 = vpop.f32.mrf.mxu0 }
  0xd7   :  { %v447_v15 = vadd.f32 %v446_v13, %v3808_v54  ;;  %v1008_v16 = vpack.c.bf16 %v882_v10, %v880_v9  ;;  %v756_v19 = vmul.f32 0.1, %v445_v8  ;;  %v883_v30 = vmax.f32 %v443_v12, %v755_v22  ;;  %v3509_v13 = vld [vmem:[%s4630_s0 + $0xe8] sm:$0xff]  }
  0xd8   :  { %v448_v17 = vpop.f32.mrf.mxu0 }
  0xd9   :  { %v757_v20 = vmul.f32 0.1, %v447_v15  ;;  %v449_v21 = vadd.f32 %v448_v17, %v3804_v53  ;;  %1238 = vmatprep.mubr.bf16.mxu1 %v1008_v16  ;;  %v884_v27 = vmax.f32 %v445_v8, %v756_v19 }
  0xda   :  { %v452_v23 = vpop.f32.mrf.mxu0  ;;  %3159 = vmatmul.mubr.msk.bf16.gmra.mxu0 %vm301_vm0, %v3506_v14  ;;  %1239 = vmatmul.mubr.bf16.vlgmr.msra.gmra.mxu1 %v1007_v18 }
  0xdb   :  { %v758_v24 = vmul.f32 0.1, %v449_v21  ;;  %700 = vmatprep.mubr.bf16.mxu0 %v3530_v1  ;;  %v885_v25 = vmax.f32 %v447_v15, %v757_v20  ;;  %v453_v31 = vadd.f32 %v452_v23, %v3808_v54 }
  0xdc   :  { %v454_v26 = vpop.f32.mrf.mxu0 }
  0xdd   :  { %v886_v28 = vmax.f32 %v449_v21, %v758_v24  ;;  %v455_v29 = vadd.f32 %v454_v26, %v3804_v53  ;;  %v1009_v37 = vpack.c.bf16 %v885_v25, %v883_v30  ;;  %v759_v42 = vmul.f32 0.1, %v453_v31 }
  0xde   :  { %v456_v32 = vpop.f32.mrf.mxu0 }
  0xdf   :  { %v457_v34 = vadd.f32 %v456_v32, %v3808_v54  ;;  %v1010_v35 = vpack.c.bf16 %v886_v28, %v884_v27  ;;  %v760_v38 = vmul.f32 0.1, %v455_v29  ;;  %v887_v52 = vmax.f32 %v453_v31, %v759_v42  ;;  %v3510_v32 = vld [vmem:[%s4630_s0 + $0xf0] sm:$0xff]  }
  0xe0   :  { %v458_v36 = vpop.f32.mrf.mxu0 }
  0xe1   :  { %v761_v39 = vmul.f32 0.1, %v457_v34  ;;  %v459_v40 = vadd.f32 %v458_v36, %v3804_v53  ;;  %1246 = vmatprep.mubr.bf16.mxu1 %v1010_v35  ;;  %v888_v47 = vmax.f32 %v455_v29, %v760_v38 }
  0xe2   :  { %v462_v43 = vpop.f32.mrf.mxu0  ;;  %3160 = vmatmul.mubr.msk.bf16.gmra.mxu0 %vm301_vm0, %v3507_v33  ;;  %1247 = vmatmul.mubr.bf16.gmra.mxu1 %v1009_v37 }
  0xe3   :  { %v762_v44 = vmul.f32 0.1, %v459_v40  ;;  %710 = vmatprep.mubr.bf16.mxu0 %v3530_v1  ;;  %v889_v45 = vmax.f32 %v457_v34, %v761_v39  ;;  %v463_v55 = vadd.f32 %v462_v43, %v3808_v54 }
  0xe4   :  { %v464_v46 = vpop.f32.mrf.mxu0 }
  0xe5   :  { %v890_v49 = vmax.f32 %v459_v40, %v762_v44  ;;  %v465_v51 = vadd.f32 %v464_v46, %v3804_v53  ;;  %v1011_v61 = vpack.c.bf16 %v889_v45, %v887_v52  ;;  %v763_v2 = vmul.f32 0.1, %v463_v55 }
  0xe6   :  { %v466_v56 = vpop.f32.mrf.mxu0 }
  0xe7   :  { %v467_v58 = vadd.f32 %v466_v56, %v3808_v54  ;;  %v1012_v59 = vpack.c.bf16 %v890_v49, %v888_v47  ;;  %v764_v62 = vmul.f32 0.1, %v465_v51  ;;  %v891_v10 = vmax.f32 %v463_v55, %v763_v2  ;;  %v3511_v55 = vld [vmem:[%s4630_s0 + $0xf8] sm:$0xff]  }
  0xe8   :  { %v468_v60 = vpop.f32.mrf.mxu0 }
  0xe9   :  { %v765_v63 = vmul.f32 0.1, %v467_v58  ;;  %v469_v0 = vadd.f32 %v468_v60, %v3804_v53  ;;  %1254 = vmatprep.mubr.bf16.mxu1 %v1012_v59  ;;  %v892_v7 = vmax.f32 %v465_v51, %v764_v62  ;;  %v3515_v62 = vld [vmem:[%s4632_s5 + $0x20] sm:$0xff]  }
  0xea   :  { %v472_v3 = vpop.f32.mrf.mxu0  ;;  %3161 = vmatmul.mubr.msk.bf16.gmra.mxu0 %vm301_vm0, %v3508_v57  ;;  %1255 = vmatmul.mubr.bf16.gmra.mxu1 %v1011_v61 }
  0xeb   :  { %v766_v4 = vmul.f32 0.1, %v469_v0  ;;  %720 = vmatprep.mubr.bf16.mxu0 %v3530_v1  ;;  %v893_v5 = vmax.f32 %v467_v58, %v765_v63  ;;  %v473_v11 = vadd.f32 %v472_v3, %v3808_v54  ;;  %3287 = vmatprep.subr.bf16.mxu0 %v3515_v62 }
  0xec   :  { %v474_v6 = vpop.f32.mrf.mxu0  ;;  %3288 = vmatpush3.bf16.msra.mxu0 %v3515_v62 }
  0xed   :  { %v894_v8 = vmax.f32 %v469_v0, %v766_v4  ;;  %v475_v9 = vadd.f32 %v474_v6, %v3804_v53  ;;  %v1013_v17 = vpack.c.bf16 %v893_v5, %v891_v10  ;;  %v767_v21 = vmul.f32 0.1, %v473_v11 }
  0xee   :  { %v476_v12 = vpop.f32.mrf.mxu0 }
  0xef   :  { %v477_v14 = vadd.f32 %v476_v12, %v3808_v54  ;;  %v1014_v15 = vpack.c.bf16 %v894_v8, %v892_v7  ;;  %v768_v18 = vmul.f32 0.1, %v475_v9  ;;  %v895_v29 = vmax.f32 %v473_v11, %v767_v21 }
  0xf0   :  { %v478_v16 = vpop.f32.mrf.mxu0 }
  0xf1   :  { %v769_v19 = vmul.f32 0.1, %v477_v14  ;;  %v479_v20 = vadd.f32 %v478_v16, %v3804_v53  ;;  %1262 = vmatprep.mubr.bf16.mxu1 %v1014_v15  ;;  %v896_v26 = vmax.f32 %v475_v9, %v768_v18 }
  0xf2   :  { %v482_v22 = vpop.f32.mrf.mxu0  ;;  %3162 = vmatmul.mubr.msk.bf16.gmra.mxu0 %vm301_vm0, %v3509_v13  ;;  %1263 = vmatmul.mubr.bf16.gmra.mxu1 %v1013_v17 }
  0xf3   :  { %v770_v23 = vmul.f32 0.1, %v479_v20  ;;  %730 = vmatprep.mubr.bf16.mxu0 %v3530_v1  ;;  %v897_v24 = vmax.f32 %v477_v14, %v769_v19  ;;  %v483_v30 = vadd.f32 %v482_v22, %v3808_v54 }
  0xf4   :  { %v484_v25 = vpop.f32.mrf.mxu0 }
  0xf5   :  { %v898_v27 = vmax.f32 %v479_v20, %v770_v23  ;;  %v485_v28 = vadd.f32 %v484_v25, %v3804_v53  ;;  %v1015_v36 = vpack.c.bf16 %v897_v24, %v895_v29  ;;  %v771_v40 = vmul.f32 0.1, %v483_v30 }
  0xf6   :  { %v486_v31 = vpop.f32.mrf.mxu0 }
  0xf7   :  { %v487_v33 = vadd.f32 %v486_v31, %v3808_v54  ;;  %v1016_v34 = vpack.c.bf16 %v898_v27, %v896_v26  ;;  %v772_v37 = vmul.f32 0.1, %v485_v28  ;;  %v899_v49 = vmax.f32 %v483_v30, %v771_v40 }
  0xf8   :  { %v488_v35 = vpop.f32.mrf.mxu0 }
  0xf9   :  { %v773_v38 = vmul.f32 0.1, %v487_v33  ;;  %v489_v39 = vadd.f32 %v488_v35, %v3804_v53  ;;  %1270 = vmatprep.mubr.bf16.mxu1 %v1016_v34  ;;  %v900_v45 = vmax.f32 %v485_v28, %v772_v37 }
  0xfa   :  { %v492_v41 = vpop.f32.mrf.mxu0  ;;  %3163 = vmatmul.mubr.msk.bf16.gmra.mxu0 %vm301_vm0, %v3510_v32  ;;  %1271 = vmatmul.mubr.bf16.gmra.mxu1 %v1015_v36 }
  0xfb   :  { %v774_v42 = vmul.f32 0.1, %v489_v39  ;;  %740 = vmatprep.mubr.bf16.mxu0 %v3530_v1  ;;  %v901_v43 = vmax.f32 %v487_v33, %v773_v38  ;;  %v493_v51 = vadd.f32 %v492_v41, %v3808_v54 }
  0xfc   :  { %v494_v44 = vpop.f32.mrf.mxu0 }
  0xfd   :  { %v902_v46 = vmax.f32 %v489_v39, %v774_v42  ;;  %v495_v47 = vadd.f32 %v494_v44, %v3804_v53  ;;  %v1017_v59 = vpack.c.bf16 %v901_v43, %v899_v49  ;;  %v775_v63 = vmul.f32 0.1, %v493_v51 }
  0xfe   :  { %v496_v52 = vpop.f32.mrf.mxu0 }
  0xff   :  { %v497_v56 = vadd.f32 %v496_v52, %v3808_v54  ;;  %v1018_v57 = vpack.c.bf16 %v902_v46, %v900_v45  ;;  %v776_v1 = vmul.f32 0.1, %v495_v47  ;;  %v903_v8 = vmax.f32 %v493_v51, %v775_v63 }
 0x100   :  { %v498_v58 = vpop.f32.mrf.mxu0 }
 0x101   :  { %v777_v60 = vmul.f32 0.1, %v497_v56  ;;  %v499_v61 = vadd.f32 %v498_v58, %v3804_v53  ;;  %1278 = vmatprep.mubr.bf16.mxu1 %v1018_v57  ;;  %v904_v5 = vmax.f32 %v495_v47, %v776_v1 }
 0x102   :  { %v502_v0 = vpop.f32.mrf.mxu0  ;;  %3164 = vmatmul.mubr.msk.bf16.gmra.mxu0 %vm301_vm0, %v3511_v55  ;;  %1279 = vmatmul.mubr.bf16.gmra.mxu1 %v1017_v59 }
 0x103   :  { %v778_v2 = vmul.f32 0.1, %v499_v61  ;;  %v905_v3 = vmax.f32 %v497_v56, %v777_v60  ;;  %v503_v9 = vadd.f32 %v502_v0, %v3808_v54 }
 0x104   :  { %v504_v4 = vpop.f32.mrf.mxu0 }
 0x105   :  { %v906_v6 = vmax.f32 %v499_v61, %v778_v2  ;;  %v505_v7 = vadd.f32 %v504_v4, %v3804_v53  ;;  %v1019_v14 = vpack.c.bf16 %v905_v3, %v903_v8  ;;  %v779_v18 = vmul.f32 0.1, %v503_v9  ;;  %v3516_v2 = vld [vmem:[%s4632_s5 + $0x18] sm:$0xff]  }
 0x106   :  { %v506_v10 = vpop.f32.mrf.mxu0  ;;  %3289 = vmatprep.subr.bf16.mxu0 %v3516_v2 }
 0x107   :  { %v507_v11 = vadd.f32 %v506_v10, %v3808_v54  ;;  %v1020_v12 = vpack.c.bf16 %v906_v6, %v904_v5  ;;  %v780_v15 = vmul.f32 0.1, %v505_v7  ;;  %v907_v26 = vmax.f32 %v503_v9, %v779_v18  ;;  %3290 = vmatpush3.bf16.msra.mxu0 %v3516_v2 }
 0x108   :  { %v508_v13 = vpop.f32.mrf.mxu0 }
 0x109   :  { %v781_v16 = vmul.f32 0.1, %v507_v11  ;;  %v509_v17 = vadd.f32 %v508_v13, %v3804_v53  ;;  %1286 = vmatprep.mubr.bf16.mxu1 %v1020_v12  ;;  %v908_v23 = vmax.f32 %v505_v7, %v780_v15  ;;  %v3517_v15 = vld [vmem:[%s4632_s5 + $0x10] sm:$0xff]  }
 0x10a   :  { %v512_v19 = vpop.f32.mrf.mxu0  ;;  %1287 = vmatmul.mubr.bf16.gmra.mxu1 %v1019_v14  ;;  %3291 = vmatprep.subr.bf16.mxu0 %v3517_v15 }
 0x10b   :  { %v782_v20 = vmul.f32 0.1, %v509_v17  ;;  %v909_v21 = vmax.f32 %v507_v11, %v781_v16  ;;  %v513_v27 = vadd.f32 %v512_v19, %v3808_v54  ;;  %3292 = vmatpush3.bf16.msra.mxu0 %v3517_v15 }
 0x10c   :  { %v514_v22 = vpop.f32.mrf.mxu0 }
 0x10d   :  { %v910_v24 = vmax.f32 %v509_v17, %v782_v20  ;;  %v515_v25 = vadd.f32 %v514_v22, %v3804_v53  ;;  %v1021_v32 = vpack.c.bf16 %v909_v21, %v907_v26  ;;  %v783_v36 = vmul.f32 0.1, %v513_v27 }
 0x10e   :  { %v516_v28 = vpop.f32.mrf.mxu0 }
 0x10f   :  { %v517_v29 = vadd.f32 %v516_v28, %v3808_v54  ;;  %v1022_v30 = vpack.c.bf16 %v910_v24, %v908_v23  ;;  %v784_v33 = vmul.f32 0.1, %v515_v25  ;;  %v911_v44 = vmax.f32 %v513_v27, %v783_v36 }
 0x110   :  { %v518_v31 = vpop.f32.mrf.mxu0 }
 0x111   :  { %v785_v34 = vmul.f32 0.1, %v517_v29  ;;  %v519_v35 = vadd.f32 %v518_v31, %v3804_v53  ;;  %1294 = vmatprep.mubr.bf16.mxu1 %v1022_v30  ;;  %v912_v41 = vmax.f32 %v515_v25, %v784_v33  ;;  %v3518_v25 = vld [vmem:[%s4632_s5 + $0x8] sm:$0xff]  }
 0x112   :  { %v522_v37 = vpop.f32.mrf.mxu0  ;;  %1295 = vmatmul.mubr.bf16.gmra.mxu1 %v1021_v32  ;;  %3293 = vmatprep.subr.bf16.mxu0 %v3518_v25 }
 0x113   :  { %v786_v38 = vmul.f32 0.1, %v519_v35  ;;  %v913_v39 = vmax.f32 %v517_v29, %v785_v34  ;;  %v523_v45 = vadd.f32 %v522_v37, %v3808_v54  ;;  %3294 = vmatpush3.bf16.msra.mxu0 %v3518_v25 }
 0x114   :  { %v524_v40 = vpop.f32.mrf.mxu0 }
 0x115   :  { %v914_v42 = vmax.f32 %v519_v35, %v786_v38  ;;  %v525_v43 = vadd.f32 %v524_v40, %v3804_v53  ;;  %v1023_v52 = vpack.c.bf16 %v913_v39, %v911_v44  ;;  %v787_v58 = vmul.f32 0.1, %v523_v45  ;;  %v3519_v35 = vld [vmem:[%s4632_s5] sm:$0xff]  }
 0x116   :  { %v526_v46 = vpop.f32.mrf.mxu0  ;;  %3295 = vmatprep.subr.bf16.mxu0 %v3519_v35 }
 0x117   :  { %v527_v47 = vadd.f32 %v526_v46, %v3808_v54  ;;  %v1024_v49 = vpack.c.bf16 %v914_v42, %v912_v41  ;;  %v788_v55 = vmul.f32 0.1, %v525_v43  ;;  %v915_v3 = vmax.f32 %v523_v45, %v787_v58  ;;  %3296 = vmatpush3.bf16.msra.mxu0 %v3519_v35 }
 0x118   :  { %v528_v51 = vpop.f32.mrf.mxu0 }
 0x119   :  { %v789_v56 = vmul.f32 0.1, %v527_v47  ;;  %v529_v57 = vadd.f32 %v528_v51, %v3804_v53  ;;  %1302 = vmatprep.mubr.bf16.mxu1 %v1024_v49  ;;  %v916_v62 = vmax.f32 %v525_v43, %v788_v55 }
 0x11a   :  { %v532_v59 = vpop.f32.mrf.mxu0  ;;  %1303 = vmatmul.mubr.bf16.gmra.mxu1 %v1023_v52 }
 0x11b   :  { %v790_v1 = vmul.f32 0.1, %v529_v57  ;;  %v917_v60 = vmax.f32 %v527_v47, %v789_v56  ;;  %v533_v4 = vadd.f32 %v532_v59, %v3808_v54 }
 0x11c   :  { %v534_v61 = vpop.f32.mrf.mxu0 }
 0x11d   :  { %v918_v63 = vmax.f32 %v529_v57, %v790_v1  ;;  %v535_v0 = vadd.f32 %v534_v61, %v3804_v53  ;;  %v1025_v9 = vpack.c.bf16 %v917_v60, %v915_v3  ;;  %v791_v13 = vmul.f32 0.1, %v533_v4 }
 0x11e   :  { %v536_v5 = vpop.f32.mrf.mxu0 }
 0x11f   :  { %v537_v6 = vadd.f32 %v536_v5, %v3808_v54  ;;  %v1026_v7 = vpack.c.bf16 %v918_v63, %v916_v62  ;;  %v792_v10 = vmul.f32 0.1, %v535_v0  ;;  %v919_v22 = vmax.f32 %v533_v4, %v791_v13 }
 0x120   :  { %v538_v8 = vpop.f32.mrf.mxu0 }
 0x121   :  { %v793_v11 = vmul.f32 0.1, %v537_v6  ;;  %v539_v12 = vadd.f32 %v538_v8, %v3804_v53  ;;  %1310 = vmatprep.mubr.bf16.mxu1 %v1026_v7  ;;  %v920_v19 = vmax.f32 %v535_v0, %v792_v10 }
 0x122   :  { %v542_v14 = vpop.f32.mrf.mxu0  ;;  %1311 = vmatmul.mubr.bf16.gmra.mxu1 %v1025_v9 }
 0x123   :  { %v794_v16 = vmul.f32 0.1, %v539_v12  ;;  %v921_v17 = vmax.f32 %v537_v6, %v793_v11  ;;  %v543_v23 = vadd.f32 %v542_v14, %v3808_v54 }
 0x124   :  { %v544_v18 = vpop.f32.mrf.mxu0 }
 0x125   :  { %v922_v20 = vmax.f32 %v539_v12, %v794_v16  ;;  %v545_v21 = vadd.f32 %v544_v18, %v3804_v53  ;;  %v1027_v29 = vpack.c.bf16 %v921_v17, %v919_v22  ;;  %v795_v33 = vmul.f32 0.1, %v543_v23 }
 0x126   :  { %v546_v24 = vpop.f32.mrf.mxu0 }
 0x127   :  { %v547_v26 = vadd.f32 %v546_v24, %v3808_v54  ;;  %v1028_v27 = vpack.c.bf16 %v922_v20, %v920_v19  ;;  %v796_v30 = vmul.f32 0.1, %v545_v21  ;;  %v923_v42 = vmax.f32 %v543_v23, %v795_v33 }
 0x128   :  { %v548_v28 = vpop.f32.mrf.mxu0 }
 0x129   :  { %v797_v31 = vmul.f32 0.1, %v547_v26  ;;  %v549_v32 = vadd.f32 %v548_v28, %v3804_v53  ;;  %1318 = vmatprep.mubr.bf16.mxu1 %v1028_v27  ;;  %v924_v39 = vmax.f32 %v545_v21, %v796_v30 }
 0x12a   :  { %v552_v34 = vpop.f32.mrf.mxu0  ;;  %1319 = vmatmul.mubr.bf16.gmra.mxu1 %v1027_v29 }
 0x12b   :  { %v798_v36 = vmul.f32 0.1, %v549_v32  ;;  %v925_v37 = vmax.f32 %v547_v26, %v797_v31  ;;  %v553_v43 = vadd.f32 %v552_v34, %v3808_v54 }
 0x12c   :  { %v554_v38 = vpop.f32.mrf.mxu0 }
 0x12d   :  { %v926_v40 = vmax.f32 %v549_v32, %v798_v36  ;;  %v555_v41 = vadd.f32 %v554_v38, %v3804_v53  ;;  %v1029_v49 = vpack.c.bf16 %v925_v37, %v923_v42  ;;  %v799_v56 = vmul.f32 0.1, %v553_v43 }
 0x12e   :  { %v556_v44 = vpop.f32.mrf.mxu0 }
 0x12f   :  { %v557_v45 = vadd.f32 %v556_v44, %v3808_v54  ;;  %v1030_v46 = vpack.c.bf16 %v926_v40, %v924_v39  ;;  %v800_v51 = vmul.f32 0.1, %v555_v41  ;;  %v927_v63 = vmax.f32 %v553_v43, %v799_v56 }
 0x130   :  { %v558_v47 = vpop.f32.mrf.mxu0 }
 0x131   :  { %v801_v52 = vmul.f32 0.1, %v557_v45  ;;  %v559_v55 = vadd.f32 %v558_v47, %v3804_v53  ;;  %1326 = vmatprep.mubr.bf16.mxu1 %v1030_v46  ;;  %v928_v60 = vmax.f32 %v555_v41, %v800_v51 }
 0x132   :  { %v562_v57 = vpop.f32.mrf.mxu0  ;;  %1327 = vmatmul.mubr.bf16.gmra.mxu1 %v1029_v49 }
 0x133   :  { %v802_v58 = vmul.f32 0.1, %v559_v55  ;;  %v929_v59 = vmax.f32 %v557_v45, %v801_v52  ;;  %v563_v0 = vadd.f32 %v562_v57, %v3808_v54 }
 0x134   :  { %v564_v1 = vpop.f32.mrf.mxu0 }
 0x135   :  { %v930_v61 = vmax.f32 %v559_v55, %v802_v58  ;;  %v565_v62 = vadd.f32 %v564_v1, %v3804_v53  ;;  %v1031_v6 = vpack.c.bf16 %v929_v59, %v927_v63  ;;  %v803_v10 = vmul.f32 0.1, %v563_v0 }
 0x136   :  { %v566_v2 = vpop.f32.mrf.mxu0 }
 0x137   :  { %v567_v3 = vadd.f32 %v566_v2, %v3808_v54  ;;  %v1032_v4 = vpack.c.bf16 %v930_v61, %v928_v60  ;;  %v804_v7 = vmul.f32 0.1, %v565_v62  ;;  %v931_v18 = vmax.f32 %v563_v0, %v803_v10 }
 0x138   :  { %v568_v5 = vpop.f32.mrf.mxu0 }
 0x139   :  { %v805_v8 = vmul.f32 0.1, %v567_v3  ;;  %v569_v9 = vadd.f32 %v568_v5, %v3804_v53  ;;  %1334 = vmatprep.mubr.bf16.mxu1 %v1032_v4  ;;  %v932_v15 = vmax.f32 %v565_v62, %v804_v7 }
 0x13a   :  { %v572_v11 = vpop.f32.mrf.mxu0  ;;  %1335 = vmatmul.mubr.bf16.gmra.mxu1 %v1031_v6 }
 0x13b   :  { %v806_v12 = vmul.f32 0.1, %v569_v9  ;;  %v933_v13 = vmax.f32 %v567_v3, %v805_v8  ;;  %v573_v19 = vadd.f32 %v572_v11, %v3808_v54 }
 0x13c   :  { %v574_v14 = vpop.f32.mrf.mxu0 }
 0x13d   :  { %v934_v16 = vmax.f32 %v569_v9, %v806_v12  ;;  %v575_v17 = vadd.f32 %v574_v14, %v3804_v53  ;;  %v1033_v24 = vpack.c.bf16 %v933_v13, %v931_v18  ;;  %v807_v28 = vmul.f32 0.1, %v573_v19 }
 0x13e   :  { %v576_v20 = vpop.f32.mrf.mxu0 }
 0x13f   :  { %v577_v21 = vadd.f32 %v576_v20, %v3808_v54  ;;  %v1034_v22 = vpack.c.bf16 %v934_v16, %v932_v15  ;;  %v808_v25 = vmul.f32 0.1, %v575_v17  ;;  %v935_v36 = vmax.f32 %v573_v19, %v807_v28 }
 0x140   :  { %v578_v23 = vpop.f32.mrf.mxu0 }
 0x141   :  { %v809_v26 = vmul.f32 0.1, %v577_v21  ;;  %v579_v27 = vadd.f32 %v578_v23, %v3804_v53  ;;  %1342 = vmatprep.mubr.bf16.mxu1 %v1034_v22  ;;  %v936_v33 = vmax.f32 %v575_v17, %v808_v25 }
 0x142   :  { %v582_v29 = vpop.f32.mrf.mxu0  ;;  %1343 = vmatmul.mubr.bf16.gmra.mxu1 %v1033_v24 }
 0x143   :  { %v810_v30 = vmul.f32 0.1, %v579_v27  ;;  %v937_v31 = vmax.f32 %v577_v21, %v809_v26  ;;  %v583_v37 = vadd.f32 %v582_v29, %v3808_v54 }
 0x144   :  { %v584_v32 = vpop.f32.mrf.mxu0 }
 0x145   :  { %v938_v34 = vmax.f32 %v579_v27, %v810_v30  ;;  %v585_v35 = vadd.f32 %v584_v32, %v3804_v53  ;;  %v1035_v42 = vpack.c.bf16 %v937_v31, %v935_v36  ;;  %v811_v46 = vmul.f32 0.1, %v583_v37 }
 0x146   :  { %v586_v38 = vpop.f32.mrf.mxu0 }
 0x147   :  { %v587_v39 = vadd.f32 %v586_v38, %v3808_v54  ;;  %v1036_v40 = vpack.c.bf16 %v938_v34, %v936_v33  ;;  %v812_v43 = vmul.f32 0.1, %v585_v35  ;;  %v939_v58 = vmax.f32 %v583_v37, %v811_v46 }
 0x148   :  { %v588_v41 = vpop.f32.mrf.mxu0 }
 0x149   :  { %v813_v44 = vmul.f32 0.1, %v587_v39  ;;  %v589_v45 = vadd.f32 %v588_v41, %v3804_v53  ;;  %1350 = vmatprep.mubr.bf16.mxu1 %v1036_v40  ;;  %v940_v55 = vmax.f32 %v585_v35, %v812_v43 }
 0x14a   :  { %v592_v47 = vpop.f32.mrf.mxu0  ;;  %1351 = vmatmul.mubr.bf16.gmra.mxu1 %v1035_v42 }
 0x14b   :  { %v814_v49 = vmul.f32 0.1, %v589_v45  ;;  %v941_v51 = vmax.f32 %v587_v39, %v813_v44  ;;  %v593_v59 = vadd.f32 %v592_v47, %v3808_v54 }
 0x14c   :  { %v594_v52 = vpop.f32.mrf.mxu0 }
 0x14d   :  { %v942_v56 = vmax.f32 %v589_v45, %v814_v49  ;;  %v595_v57 = vadd.f32 %v594_v52, %v3804_v53  ;;  %v1037_v63 = vpack.c.bf16 %v941_v51, %v939_v58  ;;  %v815_v4 = vmul.f32 0.1, %v593_v59 }
 0x14e   :  { %v596_v1 = vpop.f32.mrf.mxu0 }
 0x14f   :  { %v597_v60 = vadd.f32 %v596_v1, %v3808_v54  ;;  %v1038_v61 = vpack.c.bf16 %v942_v56, %v940_v55  ;;  %v816_v0 = vmul.f32 0.1, %v595_v57  ;;  %v943_v12 = vmax.f32 %v593_v59, %v815_v4 }
 0x150   :  { %v598_v62 = vpop.f32.mrf.mxu0 }
 0x151   :  { %v817_v2 = vmul.f32 0.1, %v597_v60  ;;  %v599_v3 = vadd.f32 %v598_v62, %v3804_v53  ;;  %1358 = vmatprep.mubr.bf16.mxu1 %v1038_v61  ;;  %v944_v9 = vmax.f32 %v595_v57, %v816_v0 }
 0x152   :  { %v602_v5 = vpop.f32.mrf.mxu0  ;;  %1359 = vmatmul.mubr.bf16.gmra.mxu1 %v1037_v63 }
 0x153   :  { %v818_v6 = vmul.f32 0.1, %v599_v3  ;;  %v945_v7 = vmax.f32 %v597_v60, %v817_v2  ;;  %v603_v13 = vadd.f32 %v602_v5, %v3808_v54 }
 0x154   :  { %v604_v8 = vpop.f32.mrf.mxu0 }
 0x155   :  { %v946_v10 = vmax.f32 %v599_v3, %v818_v6  ;;  %v605_v11 = vadd.f32 %v604_v8, %v3804_v53  ;;  %v1039_v18 = vpack.c.bf16 %v945_v7, %v943_v12  ;;  %v819_v22 = vmul.f32 0.1, %v603_v13 }
 0x156   :  { %v606_v14 = vpop.f32.mrf.mxu0 }
 0x157   :  { %v607_v15 = vadd.f32 %v606_v14, %v3808_v54  ;;  %v1040_v16 = vpack.c.bf16 %v946_v10, %v944_v9  ;;  %v820_v19 = vmul.f32 0.1, %v605_v11  ;;  %v947_v30 = vmax.f32 %v603_v13, %v819_v22 }
 0x158   :  { %v608_v17 = vpop.f32.mrf.mxu0 }
 0x159   :  { %v821_v20 = vmul.f32 0.1, %v607_v15  ;;  %v609_v21 = vadd.f32 %v608_v17, %v3804_v53  ;;  %1366 = vmatprep.mubr.bf16.mxu1 %v1040_v16  ;;  %v948_v27 = vmax.f32 %v605_v11, %v820_v19 }
 0x15a   :  { %v612_v23 = vpop.f32.mrf.mxu0  ;;  %1367 = vmatmul.mubr.bf16.gmra.mxu1 %v1039_v18 }
 0x15b   :  { %v822_v24 = vmul.f32 0.1, %v609_v21  ;;  %v949_v25 = vmax.f32 %v607_v15, %v821_v20  ;;  %v613_v31 = vadd.f32 %v612_v23, %v3808_v54 }
 0x15c   :  { %v614_v26 = vpop.f32.mrf.mxu0 }
 0x15d   :  { %v950_v28 = vmax.f32 %v609_v21, %v822_v24  ;;  %v615_v29 = vadd.f32 %v614_v26, %v3804_v53  ;;  %v1041_v36 = vpack.c.bf16 %v949_v25, %v947_v30  ;;  %v823_v40 = vmul.f32 0.1, %v613_v31 }
 0x15e   :  { %v616_v32 = vpop.f32.mrf.mxu0 }
 0x15f   :  { %v617_v33 = vadd.f32 %v616_v32, %v3808_v54  ;;  %v1042_v34 = vpack.c.bf16 %v950_v28, %v948_v27  ;;  %v824_v37 = vmul.f32 0.1, %v615_v29  ;;  %v951_v49 = vmax.f32 %v613_v31, %v823_v40 }
 0x160   :  { %v618_v35 = vpop.f32.mrf.mxu0 }
 0x161   :  { %v825_v38 = vmul.f32 0.1, %v617_v33  ;;  %v619_v39 = vadd.f32 %v618_v35, %v3804_v53  ;;  %1374 = vmatprep.mubr.bf16.mxu1 %v1042_v34  ;;  %v952_v45 = vmax.f32 %v615_v29, %v824_v37 }
 0x162   :  { %v622_v41 = vpop.f32.mrf.mxu0  ;;  %1375 = vmatmul.mubr.bf16.gmra.mxu1 %v1041_v36 }
 0x163   :  { %v826_v42 = vmul.f32 0.1, %v619_v39  ;;  %v953_v43 = vmax.f32 %v617_v33, %v825_v38  ;;  %v623_v51 = vadd.f32 %v622_v41, %v3808_v54 }
 0x164   :  { %v624_v44 = vpop.f32.mrf.mxu0 }
 0x165   :  { %v954_v46 = vmax.f32 %v619_v39, %v826_v42  ;;  %v625_v47 = vadd.f32 %v624_v44, %v3804_v53  ;;  %v1043_v58 = vpack.c.bf16 %v953_v43, %v951_v49  ;;  %v827_v61 = vmul.f32 0.1, %v623_v51 }
 0x166   :  { %v626_v52 = vpop.f32.mrf.mxu0 }
 0x167   :  { %v627_v55 = vadd.f32 %v626_v52, %v3808_v54  ;;  %v1044_v56 = vpack.c.bf16 %v954_v46, %v952_v45  ;;  %v828_v59 = vmul.f32 0.1, %v625_v47  ;;  %v955_v6 = vmax.f32 %v623_v51, %v827_v61 }
 0x168   :  { %v628_v57 = vpop.f32.mrf.mxu0 }
 0x169   :  { %v829_v1 = vmul.f32 0.1, %v627_v55  ;;  %v629_v60 = vadd.f32 %v628_v57, %v3804_v53  ;;  %1382 = vmatprep.mubr.bf16.mxu1 %v1044_v56  ;;  %v956_v3 = vmax.f32 %v625_v47, %v828_v59 }
 0x16a   :  { %v632_v62 = vpop.f32.mrf.mxu0  ;;  %1383 = vmatmul.mubr.bf16.gmra.mxu1 %v1043_v58 }
 0x16b   :  { %v830_v63 = vmul.f32 0.1, %v629_v60  ;;  %v957_v0 = vmax.f32 %v627_v55, %v829_v1  ;;  %v633_v7 = vadd.f32 %v632_v62, %v3808_v54 }
 0x16c   :  { %v634_v2 = vpop.f32.mrf.mxu0 }
 0x16d   :  { %v958_v4 = vmax.f32 %v629_v60, %v830_v63  ;;  %v635_v5 = vadd.f32 %v634_v2, %v3804_v53  ;;  %v1045_v12 = vpack.c.bf16 %v957_v0, %v955_v6  ;;  %v831_v16 = vmul.f32 0.1, %v633_v7 }
 0x16e   :  { %v636_v8 = vpop.f32.mrf.mxu0 }
 0x16f   :  { %v637_v9 = vadd.f32 %v636_v8, %v3808_v54  ;;  %v1046_v10 = vpack.c.bf16 %v958_v4, %v956_v3  ;;  %v832_v13 = vmul.f32 0.1, %v635_v5  ;;  %v959_v24 = vmax.f32 %v633_v7, %v831_v16 }
 0x170   :  { %v638_v11 = vpop.f32.mrf.mxu0 }
 0x171   :  { %v833_v14 = vmul.f32 0.1, %v637_v9  ;;  %v639_v15 = vadd.f32 %v638_v11, %v3804_v53  ;;  %1390 = vmatprep.mubr.bf16.mxu1 %v1046_v10  ;;  %v960_v21 = vmax.f32 %v635_v5, %v832_v13 }
 0x172   :  { %v642_v17 = vpop.f32.mrf.mxu0  ;;  %1391 = vmatmul.mubr.bf16.gmra.mxu1 %v1045_v12 }
 0x173   :  { %v834_v18 = vmul.f32 0.1, %v639_v15  ;;  %v961_v19 = vmax.f32 %v637_v9, %v833_v14  ;;  %v643_v25 = vadd.f32 %v642_v17, %v3808_v54  ;;  %v3962_v9 = vld [vmem:[%s4634_s7 + $0x38] sm:$0xff]  }
 0x174   :  { %v644_v20 = vpop.f32.mrf.mxu0  ;;  %3441 = vmatprep.subr.bf16.mxu1 %v3962_v9  ;;  %3361 = vmatprep.subr.bf16.mxu0 %v3962_v9 }
 0x175   :  { %v962_v22 = vmax.f32 %v639_v15, %v834_v18  ;;  %v645_v23 = vadd.f32 %v644_v20, %v3804_v53  ;;  %v1047_v30 = vpack.c.bf16 %v961_v19, %v959_v24  ;;  %v835_v34 = vmul.f32 0.1, %v643_v25  ;;  %3449 = vmatpush3.bf16.msra.mxu1 %v3962_v9 }
 0x176   :  { %v646_v26 = vpop.f32.mrf.mxu0 }
 0x177   :  { %v647_v27 = vadd.f32 %v646_v26, %v3808_v54  ;;  %v1048_v28 = vpack.c.bf16 %v962_v22, %v960_v21  ;;  %v836_v31 = vmul.f32 0.1, %v645_v23  ;;  %v963_v42 = vmax.f32 %v643_v25, %v835_v34 }
 0x178   :  { %v648_v29 = vpop.f32.mrf.mxu0 }
 0x179   :  { %v837_v32 = vmul.f32 0.1, %v647_v27  ;;  %v649_v33 = vadd.f32 %v648_v29, %v3804_v53  ;;  %1398 = vmatprep.mubr.bf16.mxu1 %v1048_v28  ;;  %v964_v39 = vmax.f32 %v645_v23, %v836_v31 }
 0x17a   :  { %v652_v35 = vpop.f32.mrf.mxu0  ;;  %1399 = vmatmul.mubr.bf16.gmra.mxu1 %v1047_v30 }
 0x17b   :  { %v838_v36 = vmul.f32 0.1, %v649_v33  ;;  %v965_v37 = vmax.f32 %v647_v27, %v837_v32  ;;  %v653_v43 = vadd.f32 %v652_v35, %v3808_v54 }
 0x17c   :  { %v654_v38 = vpop.f32.mrf.mxu0 }
 0x17d   :  { %v966_v40 = vmax.f32 %v649_v33, %v838_v36  ;;  %v655_v41 = vadd.f32 %v654_v38, %v3804_v53  ;;  %v1049_v49 = vpack.c.bf16 %v965_v37, %v963_v42  ;;  %v839_v56 = vmul.f32 0.1, %v653_v43 }
 0x17e   :  { %v656_v44 = vpop.f32.mrf.mxu0 }
 0x17f   :  { %v657_v45 = vadd.f32 %v656_v44, %v3808_v54  ;;  %v1050_v46 = vpack.c.bf16 %v966_v40, %v964_v39  ;;  %v840_v51 = vmul.f32 0.1, %v655_v41  ;;  %v967_v0 = vmax.f32 %v653_v43, %v839_v56 }
 0x180   :  { %v658_v47 = vpop.f32.mrf.mxu0 }
 0x181   :  { %v841_v52 = vmul.f32 0.1, %v657_v45  ;;  %v659_v55 = vadd.f32 %v658_v47, %v3804_v53  ;;  %1406 = vmatprep.mubr.bf16.mxu1 %v1050_v46  ;;  %v968_v61 = vmax.f32 %v655_v41, %v840_v51  ;;  %v3979_v46 = vld [vmem:[%s4635_s4] ss:$0 sm:$0xff] }
 0x182   :  { %v662_v57 = vpop.f32.mrf.mxu0  ;;  %1407 = vmatmul.mubr.bf16.gmra.mxu1 %v1049_v49 }
 0x183   :  { %v842_v58 = vmul.f32 0.1, %v659_v55  ;;  %v663_v59 = vadd.f32 %v662_v57, %v3808_v54  ;;  %v969_v1 = vmax.f32 %v657_v45, %v841_v52 }
 0x184   :  { %v664_v60 = vpop.f32.mrf.mxu0 }
 0x185   :  { %v970_v62 = vmax.f32 %v659_v55, %v842_v58  ;;  %v665_v63 = vadd.f32 %v664_v60, %v3804_v53  ;;  %v843_v3 = vmul.f32 0.1, %v663_v59  ;;  %v1051_v8 = vpack.c.bf16 %v969_v1, %v967_v0 }
 0x186   :  { %v666_v2 = vpop.f32.mrf.mxu0 }
 0x187   :  { %v844_v4 = vmul.f32 0.1, %v665_v63  ;;  %v667_v5 = vadd.f32 %v666_v2, %v3808_v54  ;;  %v1052_v6 = vpack.c.bf16 %v970_v62, %v968_v61  ;;  %v971_v19 = vmax.f32 %v663_v59, %v843_v3 }
 0x188   :  { %v668_v7 = vpop.f32.mrf.mxu0 }
 0x189   :  { %v845_v10 = vmul.f32 0.1, %v667_v5  ;;  %v669_v11 = vadd.f32 %v668_v7, %v3804_v53  ;;  %1414 = vmatprep.mubr.bf16.mxu1 %v1052_v6  ;;  %v972_v16 = vmax.f32 %v665_v63, %v844_v4 }
 0x18a   :  { %v672_v12 = vpop.f32.mrf.mxu0  ;;  %1415 = vmatmul.mubr.bf16.gmra.mxu1 %v1051_v8 }
 0x18b   :  { %v846_v13 = vmul.f32 0.1, %v669_v11  ;;  %v973_v14 = vmax.f32 %v667_v5, %v845_v10  ;;  %v673_v20 = vadd.f32 %v672_v12, %v3808_v54 }
 0x18c   :  { %v674_v15 = vpop.f32.mrf.mxu0 }
 0x18d   :  { %v974_v17 = vmax.f32 %v669_v11, %v846_v13  ;;  %v675_v18 = vadd.f32 %v674_v15, %v3804_v53  ;;  %v1053_v25 = vpack.c.bf16 %v973_v14, %v971_v19  ;;  %v847_v29 = vmul.f32 0.1, %v673_v20 }
 0x18e   :  { %v676_v21 = vpop.f32.mrf.mxu0 }
 0x18f   :  { %v677_v22 = vadd.f32 %v676_v21, %v3808_v54  ;;  %v1054_v23 = vpack.c.bf16 %v974_v17, %v972_v16  ;;  %v848_v26 = vmul.f32 0.1, %v675_v18  ;;  %v975_v36 = vmax.f32 %v673_v20, %v847_v29 }
 0x190   :  { %v678_v24 = vpop.f32.mrf.mxu0 }
 0x191   :  { %v849_v27 = vmul.f32 0.1, %v677_v22  ;;  %v679_v28 = vadd.f32 %v678_v24, %v3804_v53  ;;  %1422 = vmatprep.mubr.bf16.mxu1 %v1054_v23  ;;  %v976_v34 = vmax.f32 %v675_v18, %v848_v26 }
 0x192   :  { %v682_v30 = vpop.f32.mrf.mxu0  ;;  %1423 = vmatmul.mubr.bf16.gmra.mxu1 %v1053_v25 }
 0x193   :  { %v850_v31 = vmul.f32 0.1, %v679_v28  ;;  %v977_v32 = vmax.f32 %v677_v22, %v849_v27  ;;  %v683_v39 = vadd.f32 %v682_v30, %v3808_v54 }
 0x194   :  { %v684_v33 = vpop.f32.mrf.mxu0 }
 0x195   :  { %v978_v35 = vmax.f32 %v679_v28, %v850_v31  ;;  %v685_v37 = vadd.f32 %v684_v33, %v3804_v53  ;;  %v1055_v43 = vpack.c.bf16 %v977_v32, %v975_v36  ;;  %v851_v52 = vmul.f32 0.1, %v683_v39 }
 0x196   :  { %v686_v38 = vpop.f32.mrf.mxu0 }
 0x197   :  { %v687_v40 = vadd.f32 %v686_v38, %v3808_v54  ;;  %v1056_v41 = vpack.c.bf16 %v978_v35, %v976_v34  ;;  %v852_v47 = vmul.f32 0.1, %v685_v37  ;;  %v979_v0 = vmax.f32 %v683_v39, %v851_v52  ;;  %v3521_v34 = vld [vmem:[%s4634_s7 + $0x30] sm:$0xff]  }
 0x198   :  { %v688_v42 = vpop.f32.mrf.mxu0  ;;  %3442 = vmatprep.subr.bf16.mxu1 %v3521_v34 }
 0x199   :  { %v853_v44 = vmul.f32 0.1, %v687_v40  ;;  %v689_v45 = vadd.f32 %v688_v42, %v3804_v53  ;;  %1430 = vmatprep.mubr.bf16.mxu1 %v1056_v41  ;;  %v980_v60 = vmax.f32 %v685_v37, %v852_v47  ;;  %3450 = vmatpush3.bf16.msra.mxu1 %v3521_v34 }
 0x19a   :  { %v692_v49 = vpop.f32.mrf.mxu0  ;;  %v1240_v51 = vpop.f32.mrf.mxu1  ;;  %1431 = vmatmul.mubr.bf16.gmra.mxu1 %v1055_v43 }
 0x19b   :  { %v854_v55 = vmul.f32 0.1, %v689_v45  ;;  %v1241_v56 = vadd.f32 %v3979_v46, %v1240_v51  ;;  %v981_v59 = vmax.f32 %v687_v40, %v853_v44  ;;  %v693_v2 = vadd.f32 %v692_v49, %v3808_v54 }
 0x19c   :  { %v694_v57 = vpop.f32.mrf.mxu0  ;;  %v1242_v58 = vpop.f32.mrf.mxu1 }
 0x19d   :  { %v982_v1 = vmax.f32 %v689_v45, %v854_v55  ;;  %v695_v61 = vadd.f32 %v694_v57, %v3804_v53  ;;  %v1495_v4 = vmul.f32 0.1, %v1241_v56  ;;  %v1057_v12 = vpack.c.bf16 %v981_v59, %v979_v0 }
 0x19e   :  { %v696_v62 = vpop.f32.mrf.mxu0  ;;  %v1243_v63 = vpop.f32.mrf.mxu1  ;;  %v855_v17 = vmul.f32 0.1, %v693_v2 }
 0x19f   :  { %v697_v3 = vadd.f32 %v696_v62, %v3808_v54  ;;  %v1244_v5 = vadd.f32 %v3979_v46, %v1243_v63  ;;  %v1058_v8 = vpack.c.bf16 %v982_v1, %v980_v60  ;;  %v856_v13 = vmul.f32 0.1, %v695_v61 }
 0x1a0   :  { %v698_v6 = vpop.f32.mrf.mxu0  ;;  %v1245_v7 = vpop.f32.mrf.mxu1  ;;  %v1559_v19 = vmax.f32 %v1241_v56, %v1495_v4  ;;  %v983_v31 = vmax.f32 %v693_v2, %v855_v17 }
 0x1a1   :  { %v857_v10 = vmul.f32 0.1, %v697_v3  ;;  %v699_v11 = vadd.f32 %v698_v6, %v3804_v53  ;;  %v1496_v14 = vmul.f32 0.1, %v1244_v5  ;;  %1438 = vmatprep.mubr.bf16.mxu1 %v1058_v8  ;;  %v984_v26 = vmax.f32 %v695_v61, %v856_v13 }
 0x1a2   :  { %v702_v15 = vpop.f32.mrf.mxu0  ;;  %v1248_v16 = vpop.f32.mrf.mxu1  ;;  %1439 = vmatmul.mubr.bf16.gmra.mxu1 %v1057_v12 }
 0x1a3   :  { %v858_v18 = vmul.f32 0.1, %v699_v11  ;;  %v1560_v20 = vmax.f32 %v1244_v5, %v1496_v14  ;;  %v1249_v21 = vadd.f32 %v3979_v46, %v1248_v16  ;;  %v985_v24 = vmax.f32 %v697_v3, %v857_v10 }
 0x1a4   :  { %v704_v22 = vpop.f32.mrf.mxu0  ;;  %v1250_v23 = vpop.f32.mrf.mxu1  ;;  %v703_v32 = vadd.f32 %v702_v15, %v3808_v54 }
 0x1a5   :  { %v986_v25 = vmax.f32 %v699_v11, %v858_v18  ;;  %v705_v27 = vadd.f32 %v704_v22, %v3804_v53  ;;  %v1623_v30 = vpack.c.bf16 %v1560_v20, %v1559_v19  ;;  %v1497_v35 = vmul.f32 0.1, %v1249_v21 }
 0x1a6   :  { %v706_v28 = vpop.f32.mrf.mxu0  ;;  %v1251_v29 = vpop.f32.mrf.mxu1  ;;  %v1059_v42 = vpack.c.bf16 %v985_v24, %v983_v31  ;;  %v859_v49 = vmul.f32 0.1, %v703_v32 }
 0x1a7   :  { %v707_v33 = vadd.f32 %v706_v28, %v3808_v54  ;;  %v1252_v36 = vadd.f32 %v3979_v46, %v1251_v29  ;;  %3297 = vmatprep.mubr.bf16.mxu0 %v1623_v30  ;;  %v1060_v39 = vpack.c.bf16 %v986_v25, %v984_v26  ;;  %v860_v43 = vmul.f32 0.1, %v705_v27 }
 0x1a8   :  { %v708_v37 = vpop.f32.mrf.mxu0  ;;  %v1253_v38 = vpop.f32.mrf.mxu1  ;;  %v1561_v52 = vmax.f32 %v1249_v21, %v1497_v35  ;;  %v987_v3 = vmax.f32 %v703_v32, %v859_v49 }
 0x1a9   :  { %v861_v40 = vmul.f32 0.1, %v707_v33  ;;  %v709_v41 = vadd.f32 %v708_v37, %v3804_v53  ;;  %v1498_v44 = vmul.f32 0.1, %v1252_v36  ;;  %1446 = vmatprep.mubr.bf16.mxu1 %v1060_v39  ;;  %v988_v60 = vmax.f32 %v705_v27, %v860_v43 }
 0x1aa   :  { %v712_v45 = vpop.f32.mrf.mxu0  ;;  %v1256_v47 = vpop.f32.mrf.mxu1  ;;  %1447 = vmatmul.mubr.bf16.gmra.mxu1 %v1059_v42 }
 0x1ab   :  { %v862_v51 = vmul.f32 0.1, %v709_v41  ;;  %v1562_v55 = vmax.f32 %v1252_v36, %v1498_v44  ;;  %v1257_v56 = vadd.f32 %v3979_v46, %v1256_v47  ;;  %v989_v59 = vmax.f32 %v707_v33, %v861_v40 }
 0x1ac   :  { %v714_v57 = vpop.f32.mrf.mxu0  ;;  %v1258_v58 = vpop.f32.mrf.mxu1  ;;  %v713_v62 = vadd.f32 %v712_v45, %v3808_v54 }
 0x1ad   :  { %v990_v1 = vmax.f32 %v709_v41, %v862_v51  ;;  %v1624_v61 = vpack.c.bf16 %v1562_v55, %v1561_v52  ;;  %v715_v63 = vadd.f32 %v714_v57, %v3804_v53  ;;  %v1499_v5 = vmul.f32 0.1, %v1257_v56 }
 0x1ae   :  { %v716_v0 = vpop.f32.mrf.mxu0  ;;  %v1259_v2 = vpop.f32.mrf.mxu1  ;;  %v1061_v13 = vpack.c.bf16 %v989_v59, %v987_v3  ;;  %v863_v14 = vmul.f32 0.1, %v713_v62 }
 0x1af   :  { %v717_v4 = vadd.f32 %v716_v0, %v3808_v54  ;;  %v1260_v6 = vadd.f32 %v3979_v46, %v1259_v2  ;;  %3298 = vmatmul.mubr.bf16.vlgmr.msra.gmra.mxu0 %v1624_v61  ;;  %v1062_v10 = vpack.c.bf16 %v990_v1, %v988_v60  ;;  %v864_v15 = vmul.f32 0.1, %v715_v63 }
 0x1b0   :  { %v718_v7 = vpop.f32.mrf.mxu0  ;;  %v1261_v8 = vpop.f32.mrf.mxu1  ;;  %3362 = vmatpush3.bf16.msra.mxu0 %v3962_v9  ;;  %v1563_v21 = vmax.f32 %v1257_v56, %v1499_v5  ;;  %v991_v27 = vmax.f32 %v713_v62, %v863_v14 }
 0x1b1   :  { %v865_v11 = vmul.f32 0.1, %v717_v4  ;;  %v719_v12 = vadd.f32 %v718_v7, %v3804_v53  ;;  %v1500_v16 = vmul.f32 0.1, %v1260_v6  ;;  %1454 = vmatprep.mubr.bf16.mxu1 %v1062_v10  ;;  %3363 = vmatprep.subr.bf16.mxu0 %v3521_v34  ;;  %v992_v9 = vmax.f32 %v715_v63, %v864_v15 }
 0x1b2   :  { %v722_v17 = vpop.f32.mrf.mxu0  ;;  %v1264_v18 = vpop.f32.mrf.mxu1  ;;  %1455 = vmatmul.mubr.bf16.gmra.mxu1 %v1061_v13 }
 0x1b3   :  { %v866_v19 = vmul.f32 0.1, %v719_v12  ;;  %v1265_v20 = vadd.f32 %v3979_v46, %v1264_v18  ;;  %v993_v22 = vmax.f32 %v717_v4, %v865_v11  ;;  %v1564_v23 = vmax.f32 %v1260_v6, %v1500_v16 }
 0x1b4   :  { %v724_v24 = vpop.f32.mrf.mxu0  ;;  %v1266_v25 = vpop.f32.mrf.mxu1  ;;  %3364 = vmatpush3.bf16.msra.mxu0 %v3521_v34  ;;  %v723_v32 = vadd.f32 %v722_v17, %v3808_v54 }
 0x1b5   :  { %v994_v26 = vmax.f32 %v719_v12, %v866_v19  ;;  %v725_v28 = vadd.f32 %v724_v24, %v3804_v53  ;;  %v1625_v31 = vpack.c.bf16 %v1564_v23, %v1563_v21  ;;  %v1501_v33 = vmul.f32 0.1, %v1265_v20 }
 0x1b6   :  { %v726_v29 = vpop.f32.mrf.mxu0  ;;  %v1267_v30 = vpop.f32.mrf.mxu1  ;;  %v1063_v37 = vpack.c.bf16 %v993_v22, %v991_v27  ;;  %v867_v47 = vmul.f32 0.1, %v723_v32 }
 0x1b7   :  { %v727_v35 = vadd.f32 %v726_v29, %v3808_v54  ;;  %v1268_v36 = vadd.f32 %v3979_v46, %v1267_v30  ;;  %3301 = vmatprep.mubr.bf16.mxu0 %v1625_v31  ;;  %v1064_v40 = vpack.c.bf16 %v994_v26, %v992_v9  ;;  %v868_v34 = vmul.f32 0.1, %v725_v28 }
 0x1b8   :  { %v728_v38 = vpop.f32.mrf.mxu0  ;;  %v1269_v39 = vpop.f32.mrf.mxu1  ;;  %v1565_v49 = vmax.f32 %v1265_v20, %v1501_v33  ;;  %v995_v2 = vmax.f32 %v723_v32, %v867_v47 }
 0x1b9   :  { %v869_v41 = vmul.f32 0.1, %v727_v35  ;;  %v1502_v42 = vmul.f32 0.1, %v1268_v36  ;;  %v729_v43 = vadd.f32 %v728_v38, %v3804_v53  ;;  %1462 = vmatprep.mubr.bf16.mxu1 %v1064_v40  ;;  %v996_v58 = vmax.f32 %v725_v28, %v868_v34 }
 0x1ba   :  { %v732_v44 = vpop.f32.mrf.mxu0  ;;  %v1272_v45 = vpop.f32.mrf.mxu1  ;;  %1463 = vmatmul.mubr.bf16.gmra.mxu1 %v1063_v37 }
 0x1bb   :  { %v1566_v51 = vmax.f32 %v1268_v36, %v1502_v42  ;;  %v870_v52 = vmul.f32 0.1, %v729_v43  ;;  %v1273_v55 = vadd.f32 %v3979_v46, %v1272_v45  ;;  %v997_v59 = vmax.f32 %v727_v35, %v869_v41  ;;  %v3522_v36 = vld [vmem:[%s4634_s7 + $0x28] sm:$0xff]  }
 0x1bc   :  { %v734_v56 = vpop.f32.mrf.mxu0  ;;  %v1274_v57 = vpop.f32.mrf.mxu1  ;;  %v733_v61 = vadd.f32 %v732_v44, %v3808_v54  ;;  %3443 = vmatprep.subr.bf16.mxu1 %v3522_v36  ;;  %3365 = vmatprep.subr.bf16.mxu0 %v3522_v36 }
 0x1bd   :  { %v1626_v1 = vpack.c.bf16 %v1566_v51, %v1565_v49  ;;  %v998_v60 = vmax.f32 %v729_v43, %v870_v52  ;;  %v735_v62 = vadd.f32 %v734_v56, %v3804_v53  ;;  %v1503_v6 = vmul.f32 0.1, %v1273_v55  ;;  %3451 = vmatpush3.bf16.msra.mxu1 %v3522_v36  ;;  %3366 = vmatpush3.bf16.msra.mxu0 %v3522_v36 }
 0x1be   :  { %v736_v63 = vpop.f32.mrf.mxu0  ;;  %v1275_v0 = vpop.f32.mrf.mxu1  ;;  %v1065_v10 = vpack.c.bf16 %v997_v59, %v995_v2  ;;  %v871_v14 = vmul.f32 0.1, %v733_v61 }
 0x1bf   :  { %v737_v3 = vadd.f32 %v736_v63, %v3808_v54  ;;  %v1276_v4 = vadd.f32 %v3979_v46, %v1275_v0  ;;  %3302 = vmatmul.mubr.bf16.gmra.mxu0 %v1626_v1  ;;  %v1066_v5 = vpack.c.bf16 %v998_v60, %v996_v58  ;;  %v872_v15 = vmul.f32 0.1, %v735_v62 }
 0x1c0   :  { %v738_v7 = vpop.f32.mrf.mxu0  ;;  %v1277_v8 = vpop.f32.mrf.mxu1  ;;  %v1567_v20 = vmax.f32 %v1273_v55, %v1503_v6  ;;  %v999_v27 = vmax.f32 %v733_v61, %v871_v14 }
 0x1c1   :  { %v873_v11 = vmul.f32 0.1, %v737_v3  ;;  %v1504_v12 = vmul.f32 0.1, %v1276_v4  ;;  %v739_v13 = vadd.f32 %v738_v7, %v3804_v53  ;;  %1470 = vmatprep.mubr.bf16.mxu1 %v1066_v5  ;;  %v1000_v9 = vmax.f32 %v735_v62, %v872_v15 }
 0x1c2   :  { %v742_v16 = vpop.f32.mrf.mxu0  ;;  %v1280_v17 = vpop.f32.mrf.mxu1  ;;  %1471 = vmatmul.mubr.bf16.gmra.mxu1 %v1065_v10 }
 0x1c3   :  { %v1568_v18 = vmax.f32 %v1276_v4, %v1504_v12  ;;  %v874_v19 = vmul.f32 0.1, %v739_v13  ;;  %v1001_v21 = vmax.f32 %v737_v3, %v873_v11  ;;  %v1281_v22 = vadd.f32 %v3979_v46, %v1280_v17 }
 0x1c4   :  { %v744_v23 = vpop.f32.mrf.mxu0  ;;  %v1282_v24 = vpop.f32.mrf.mxu1  ;;  %v743_v28 = vadd.f32 %v742_v16, %v3808_v54 }
 0x1c5   :  { %v1002_v25 = vmax.f32 %v739_v13, %v874_v19  ;;  %v745_v26 = vadd.f32 %v744_v23, %v3804_v53  ;;  %v1627_v31 = vpack.c.bf16 %v1568_v18, %v1567_v20  ;;  %v1505_v32 = vmul.f32 0.1, %v1281_v22 }
 0x1c6   :  { %v746_v29 = vpop.f32.mrf.mxu0  ;;  %v1283_v30 = vpop.f32.mrf.mxu1  ;;  %v1067_v37 = vpack.c.bf16 %v1001_v21, %v999_v27  ;;  %v875_v44 = vmul.f32 0.1, %v743_v28 }
 0x1c7   :  { %v747_v33 = vadd.f32 %v746_v29, %v3808_v54  ;;  %v1284_v35 = vadd.f32 %v3979_v46, %v1283_v30  ;;  %3305 = vmatprep.mubr.bf16.mxu0 %v1627_v31  ;;  %v1068_v40 = vpack.c.bf16 %v1002_v25, %v1000_v9  ;;  %v876_v34 = vmul.f32 0.1, %v745_v26 }
 0x1c8   :  { %v748_v38 = vpop.f32.mrf.mxu0  ;;  %v1285_v39 = vpop.f32.mrf.mxu1  ;;  %v1569_v45 = vmax.f32 %v1281_v22, %v1505_v32 }
 0x1c9   :  { %v877_v41 = vmul.f32 0.1, %v747_v33  ;;  %v1506_v42 = vmul.f32 0.1, %v1284_v35  ;;  %v749_v43 = vadd.f32 %v748_v38, %v3804_v53  ;;  %1478 = vmatprep.mubr.bf16.mxu1 %v1068_v40  ;;  %v1004_v55 = vmax.f32 %v745_v26, %v876_v34 }
 0x1ca   :  { %v1288_v54 = vpop.f32.mrf.mxu1  ;;  %1479 = vmatmul.mubr.bf16.gmra.mxu1 %v1067_v37  ;;  %v1003_v53 = vmax.f32 %v743_v28, %v875_v44 }
 0x1cb   :  { %v1570_v47 = vmax.f32 %v1284_v35, %v1506_v42  ;;  %v878_v49 = vmul.f32 0.1, %v749_v43  ;;  %v1289_v51 = vadd.f32 %v3979_v46, %v1288_v54  ;;  %v1005_v56 = vmax.f32 %v747_v33, %v877_v41  ;;  %v3523_v35 = vld [vmem:[%s4634_s7 + $0x20] sm:$0xff]  }
 0x1cc   :  { %v1290_v52 = vpop.f32.mrf.mxu1  ;;  %3444 = vmatprep.subr.bf16.mxu1 %v3523_v35  ;;  %3367 = vmatprep.subr.bf16.mxu0 %v3523_v35 }
 0x1cd   :  { %v1628_v57 = vpack.c.bf16 %v1570_v47, %v1569_v45  ;;  %v1006_v58 = vmax.f32 %v749_v43, %v878_v49  ;;  %v1507_v1 = vmul.f32 0.1, %v1289_v51  ;;  %v1069_v63 = vpack.c.bf16 %v1005_v56, %v1003_v53  ;;  %3452 = vmatpush3.bf16.msra.mxu1 %v3523_v35  ;;  %3368 = vmatpush3.bf16.msra.mxu0 %v3523_v35 }
 0x1ce   :  { %v1291_v59 = vpop.f32.mrf.mxu1 }
 0x1cf   :  { %v1292_v60 = vadd.f32 %v3979_v46, %v1291_v59  ;;  %3306 = vmatmul.mubr.bf16.gmra.mxu0 %v1628_v57  ;;  %v1070_v61 = vpack.c.bf16 %v1006_v58, %v1004_v55  ;;  %v1571_v3 = vmax.f32 %v1289_v51, %v1507_v1 }
 0x1d0   :  { %v1293_v62 = vpop.f32.mrf.mxu1 }
 0x1d1   :  { %v1508_v0 = vmul.f32 0.1, %v1292_v60  ;;  %1486 = vmatprep.mubr.bf16.mxu1 %v1070_v61 }
 0x1d2   :  { %v1296_v2 = vpop.f32.mrf.mxu1  ;;  %1487 = vmatmul.mubr.bf16.gmra.mxu1 %v1069_v63 }
 0x1d3   :  { %v1572_v4 = vmax.f32 %v1292_v60, %v1508_v0  ;;  %v1297_v5 = vadd.f32 %v3979_v46, %v1296_v2 }
 0x1d4   :  { %v1298_v6 = vpop.f32.mrf.mxu1 }
 0x1d5   :  { %v1629_v7 = vpack.c.bf16 %v1572_v4, %v1571_v3  ;;  %v1509_v10 = vmul.f32 0.1, %v1297_v5 }
 0x1d6   :  { %v1299_v8 = vpop.f32.mrf.mxu1 }
 0x1d7   :  { %v1300_v11 = vadd.f32 %v3979_v46, %v1299_v8  ;;  %3309 = vmatprep.mubr.bf16.mxu0 %v1629_v7  ;;  %v1573_v15 = vmax.f32 %v1297_v5, %v1509_v10 }
 0x1d8   :  { %v1301_v12 = vpop.f32.mrf.mxu1 }
 0x1d9   :  { %v1510_v13 = vmul.f32 0.1, %v1300_v11 }
 0x1da   :  { %v1304_v14 = vpop.f32.mrf.mxu1 }
 0x1db   :  { %v1574_v16 = vmax.f32 %v1300_v11, %v1510_v13  ;;  %v1305_v17 = vadd.f32 %v3979_v46, %v1304_v14 }
 0x1dc   :  { %v1306_v18 = vpop.f32.mrf.mxu1 }
 0x1dd   :  { %v1630_v19 = vpack.c.bf16 %v1574_v16, %v1573_v15  ;;  %v1511_v21 = vmul.f32 0.1, %v1305_v17 }
 0x1de   :  { %v1307_v20 = vpop.f32.mrf.mxu1 }
 0x1df   :  { %v1308_v22 = vadd.f32 %v3979_v46, %v1307_v20  ;;  %3310 = vmatmul.mubr.bf16.gmra.mxu0 %v1630_v19  ;;  %v1575_v26 = vmax.f32 %v1305_v17, %v1511_v21 }
 0x1e0   :  { %v1309_v23 = vpop.f32.mrf.mxu1 }
 0x1e1   :  { %v1512_v24 = vmul.f32 0.1, %v1308_v22 }
 0x1e2   :  { %v1312_v25 = vpop.f32.mrf.mxu1 }
 0x1e3   :  { %v1576_v27 = vmax.f32 %v1308_v22, %v1512_v24  ;;  %v1313_v9 = vadd.f32 %v3979_v46, %v1312_v25  ;;  %v3524_v24 = vld [vmem:[%s4634_s7 + $0x18] sm:$0xff]  }
 0x1e4   :  { %v1314_v28 = vpop.f32.mrf.mxu1  ;;  %3445 = vmatprep.subr.bf16.mxu1 %v3524_v24  ;;  %3369 = vmatprep.subr.bf16.mxu0 %v3524_v24 }
 0x1e5   :  { %v1631_v29 = vpack.c.bf16 %v1576_v27, %v1575_v26  ;;  %v1513_v31 = vmul.f32 0.1, %v1313_v9  ;;  %3453 = vmatpush3.bf16.msra.mxu1 %v3524_v24  ;;  %3370 = vmatpush3.bf16.msra.mxu0 %v3524_v24 }
 0x1e6   :  { %v1315_v30 = vpop.f32.mrf.mxu1 }
 0x1e7   :  { %v1316_v32 = vadd.f32 %v3979_v46, %v1315_v30  ;;  %3313 = vmatprep.mubr.bf16.mxu0 %v1631_v29  ;;  %v1577_v38 = vmax.f32 %v1313_v9, %v1513_v31 }
 0x1e8   :  { %v1317_v33 = vpop.f32.mrf.mxu1 }
 0x1e9   :  { %v1514_v36 = vmul.f32 0.1, %v1316_v32 }
 0x1ea   :  { %v1320_v37 = vpop.f32.mrf.mxu1 }
 0x1eb   :  { %v1578_v39 = vmax.f32 %v1316_v32, %v1514_v36  ;;  %v1321_v40 = vadd.f32 %v3979_v46, %v1320_v37 }
 0x1ec   :  { %v1322_v34 = vpop.f32.mrf.mxu1 }
 0x1ed   :  { %v1632_v41 = vpack.c.bf16 %v1578_v39, %v1577_v38  ;;  %v1515_v43 = vmul.f32 0.1, %v1321_v40 }
 0x1ee   :  { %v1323_v42 = vpop.f32.mrf.mxu1 }
 0x1ef   :  { %v1324_v44 = vadd.f32 %v3979_v46, %v1323_v42  ;;  %3314 = vmatmul.mubr.bf16.gmra.mxu0 %v1632_v41  ;;  %v1579_v49 = vmax.f32 %v1321_v40, %v1515_v43  ;;  %v3525_v43 = vld [vmem:[%s4634_s7 + $0x10] sm:$0xff]  }
 0x1f0   :  { %v1325_v54 = vpop.f32.mrf.mxu1  ;;  %3371 = vmatprep.subr.bf16.mxu0 %v3525_v43  ;;  %3446 = vmatprep.subr.bf16.mxu1 %v3525_v43 }
 0x1f1   :  { %v1516_v45 = vmul.f32 0.1, %v1324_v44  ;;  %3372 = vmatpush3.bf16.msra.mxu0 %v3525_v43  ;;  %3454 = vmatpush3.bf16.msra.mxu1 %v3525_v43 }
 0x1f2   :  { %v1328_v47 = vpop.f32.mrf.mxu1 }
 0x1f3   :  { %v1580_v51 = vmax.f32 %v1324_v44, %v1516_v45  ;;  %v1329_v52 = vadd.f32 %v3979_v46, %v1328_v47 }
 0x1f4   :  { %v1330_v55 = vpop.f32.mrf.mxu1 }
 0x1f5   :  { %v1633_v56 = vpack.c.bf16 %v1580_v51, %v1579_v49  ;;  %v1517_v58 = vmul.f32 0.1, %v1329_v52 }
 0x1f6   :  { %v1331_v57 = vpop.f32.mrf.mxu1 }
 0x1f7   :  { %v1332_v59 = vadd.f32 %v3979_v46, %v1331_v57  ;;  %3317 = vmatprep.mubr.bf16.mxu0 %v1633_v56  ;;  %v1581_v61 = vmax.f32 %v1329_v52, %v1517_v58  ;;  %v3526_v52 = vld [vmem:[%s4634_s7 + $0x8] sm:$0xff]  }
 0x1f8   :  { %v1333_v53 = vpop.f32.mrf.mxu1  ;;  %3373 = vmatprep.subr.bf16.mxu0 %v3526_v52  ;;  %3447 = vmatprep.subr.bf16.mxu1 %v3526_v52 }
 0x1f9   :  { %v1518_v1 = vmul.f32 0.1, %v1332_v59  ;;  %3374 = vmatpush3.bf16.msra.mxu0 %v3526_v52  ;;  %3455 = vmatpush3.bf16.msra.mxu1 %v3526_v52  ;;  %v3527_v53 = vld [vmem:[%s4634_s7] sm:$0xff]  }
 0x1fa   :  { %v1336_v60 = vpop.f32.mrf.mxu1  ;;  %3375 = vmatprep.subr.bf16.mxu0 %v3527_v53  ;;  %3448 = vmatprep.subr.bf16.mxu1 %v3527_v53 }
 0x1fb   :  { %v1582_v62 = vmax.f32 %v1332_v59, %v1518_v1  ;;  %v1337_v63 = vadd.f32 %v3979_v46, %v1336_v60 }
 0x1fc   :  { %v1338_v0 = vpop.f32.mrf.mxu1 }
 0x1fd   :  { %v1634_v2 = vpack.c.bf16 %v1582_v62, %v1581_v61  ;;  %v1519_v4 = vmul.f32 0.1, %v1337_v63  ;;  %3376 = vmatpush3.bf16.msra.mxu0 %v3527_v53  ;;  %3456 = vmatpush3.bf16.msra.mxu1 %v3527_v53 }
 0x1fe   :  { %v1339_v3 = vpop.f32.mrf.mxu1 }
 0x1ff   :  { %v1340_v5 = vadd.f32 %v3979_v46, %v1339_v3  ;;  %3318 = vmatmul.mubr.bf16.gmra.mxu0 %v1634_v2  ;;  %v1583_v10 = vmax.f32 %v1337_v63, %v1519_v4 }
 0x200   :  { %v1341_v6 = vpop.f32.mrf.mxu1 }
 0x201   :  { %v1520_v7 = vmul.f32 0.1, %v1340_v5 }
 0x202   :  { %v1344_v8 = vpop.f32.mrf.mxu1 }
 0x203   :  { %v1584_v11 = vmax.f32 %v1340_v5, %v1520_v7  ;;  %v1345_v12 = vadd.f32 %v3979_v46, %v1344_v8 }
 0x204   :  { %v1346_v13 = vpop.f32.mrf.mxu1 }
 0x205   :  { %v1635_v14 = vpack.c.bf16 %v1584_v11, %v1583_v10  ;;  %v1521_v16 = vmul.f32 0.1, %v1345_v12 }
 0x206   :  { %v1347_v15 = vpop.f32.mrf.mxu1 }
 0x207   :  { %v1348_v17 = vadd.f32 %v3979_v46, %v1347_v15  ;;  %3321 = vmatprep.mubr.bf16.mxu0 %v1635_v14  ;;  %v1585_v21 = vmax.f32 %v1345_v12, %v1521_v16 }
 0x208   :  { %v1349_v18 = vpop.f32.mrf.mxu1 }
 0x209   :  { %v1522_v19 = vmul.f32 0.1, %v1348_v17 }
 0x20a   :  { %v1352_v20 = vpop.f32.mrf.mxu1 }
 0x20b   :  { %v1586_v22 = vmax.f32 %v1348_v17, %v1522_v19  ;;  %v1353_v23 = vadd.f32 %v3979_v46, %v1352_v20 }
 0x20c   :  { %v1354_v25 = vpop.f32.mrf.mxu1 }
 0x20d   :  { %v1636_v26 = vpack.c.bf16 %v1586_v22, %v1585_v21  ;;  %v1523_v9 = vmul.f32 0.1, %v1353_v23 }
 0x20e   :  { %v1355_v27 = vpop.f32.mrf.mxu1 }
 0x20f   :  { %v1356_v28 = vadd.f32 %v3979_v46, %v1355_v27  ;;  %3322 = vmatmul.mubr.bf16.gmra.mxu0 %v1636_v26  ;;  %v1587_v32 = vmax.f32 %v1353_v23, %v1523_v9 }
 0x210   :  { %v1357_v29 = vpop.f32.mrf.mxu1 }
 0x211   :  { %v1524_v30 = vmul.f32 0.1, %v1356_v28 }
 0x212   :  { %v1360_v31 = vpop.f32.mrf.mxu1 }
 0x213   :  { %v1588_v33 = vmax.f32 %v1356_v28, %v1524_v30  ;;  %v1361_v35 = vadd.f32 %v3979_v46, %v1360_v31 }
 0x214   :  { %v1362_v36 = vpop.f32.mrf.mxu1 }
 0x215   :  { %v1637_v37 = vpack.c.bf16 %v1588_v33, %v1587_v32  ;;  %v1525_v39 = vmul.f32 0.1, %v1361_v35 }
 0x216   :  { %v1363_v38 = vpop.f32.mrf.mxu1 }
 0x217   :  { %v1364_v40 = vadd.f32 %v3979_v46, %v1363_v38  ;;  %3325 = vmatprep.mubr.bf16.mxu0 %v1637_v37  ;;  %v1589_v44 = vmax.f32 %v1361_v35, %v1525_v39 }
 0x218   :  { %v1365_v34 = vpop.f32.mrf.mxu1 }
 0x219   :  { %v1526_v41 = vmul.f32 0.1, %v1364_v40 }
 0x21a   :  { %v1368_v42 = vpop.f32.mrf.mxu1 }
 0x21b   :  { %v1590_v54 = vmax.f32 %v1364_v40, %v1526_v41  ;;  %v1369_v45 = vadd.f32 %v3979_v46, %v1368_v42 }
 0x21c   :  { %v1370_v47 = vpop.f32.mrf.mxu1 }
 0x21d   :  { %v1638_v49 = vpack.c.bf16 %v1590_v54, %v1589_v44  ;;  %v1527_v55 = vmul.f32 0.1, %v1369_v45 }
 0x21e   :  { %v1371_v51 = vpop.f32.mrf.mxu1 }
 0x21f   :  { %v1372_v56 = vadd.f32 %v3979_v46, %v1371_v51  ;;  %3326 = vmatmul.mubr.bf16.gmra.mxu0 %v1638_v49  ;;  %v1591_v1 = vmax.f32 %v1369_v45, %v1527_v55 }
 0x220   :  { %v1373_v57 = vpop.f32.mrf.mxu1 }
 0x221   :  { %v1528_v58 = vmul.f32 0.1, %v1372_v56 }
 0x222   :  { %v1376_v59 = vpop.f32.mrf.mxu1 }
 0x223   :  { %v1592_v60 = vmax.f32 %v1372_v56, %v1528_v58  ;;  %v1377_v61 = vadd.f32 %v3979_v46, %v1376_v59 }
 0x224   :  { %v1378_v62 = vpop.f32.mrf.mxu1 }
 0x225   :  { %v1639_v63 = vpack.c.bf16 %v1592_v60, %v1591_v1  ;;  %v1529_v2 = vmul.f32 0.1, %v1377_v61 }
 0x226   :  { %v1379_v0 = vpop.f32.mrf.mxu1 }
 0x227   :  { %v1380_v3 = vadd.f32 %v3979_v46, %v1379_v0  ;;  %3329 = vmatprep.mubr.bf16.mxu0 %v1639_v63  ;;  %v1593_v7 = vmax.f32 %v1377_v61, %v1529_v2 }
 0x228   :  { %v1381_v4 = vpop.f32.mrf.mxu1 }
 0x229   :  { %v1530_v5 = vmul.f32 0.1, %v1380_v3 }
 0x22a   :  { %v1384_v6 = vpop.f32.mrf.mxu1 }
 0x22b   :  { %v1594_v8 = vmax.f32 %v1380_v3, %v1530_v5  ;;  %v1385_v10 = vadd.f32 %v3979_v46, %v1384_v6 }
 0x22c   :  { %v1386_v11 = vpop.f32.mrf.mxu1 }
 0x22d   :  { %v1640_v12 = vpack.c.bf16 %v1594_v8, %v1593_v7  ;;  %v1531_v14 = vmul.f32 0.1, %v1385_v10 }
 0x22e   :  { %v1387_v13 = vpop.f32.mrf.mxu1 }
 0x22f   :  { %v1388_v15 = vadd.f32 %v3979_v46, %v1387_v13  ;;  %3330 = vmatmul.mubr.bf16.gmra.mxu0 %v1640_v12  ;;  %v1595_v19 = vmax.f32 %v1385_v10, %v1531_v14 }
 0x230   :  { %v1389_v16 = vpop.f32.mrf.mxu1 }
 0x231   :  { %v1532_v17 = vmul.f32 0.1, %v1388_v15 }
 0x232   :  { %v1392_v18 = vpop.f32.mrf.mxu1 }
 0x233   :  { %v1596_v20 = vmax.f32 %v1388_v15, %v1532_v17  ;;  %v1393_v21 = vadd.f32 %v3979_v46, %v1392_v18 }
 0x234   :  { %v1394_v22 = vpop.f32.mrf.mxu1 }
 0x235   :  { %v1641_v23 = vpack.c.bf16 %v1596_v20, %v1595_v19  ;;  %v1533_v25 = vmul.f32 0.1, %v1393_v21 }
 0x236   :  { %v1395_v24 = vpop.f32.mrf.mxu1 }
 0x237   :  { %v1396_v26 = vadd.f32 %v3979_v46, %v1395_v24  ;;  %3333 = vmatprep.mubr.bf16.mxu0 %v1641_v23  ;;  %v1597_v29 = vmax.f32 %v1393_v21, %v1533_v25 }
 0x238   :  { %v1397_v27 = vpop.f32.mrf.mxu1 }
 0x239   :  { %v1534_v9 = vmul.f32 0.1, %v1396_v26 }
 0x23a   :  { %v1400_v28 = vpop.f32.mrf.mxu1 }
 0x23b   :  { %v1598_v30 = vmax.f32 %v1396_v26, %v1534_v9  ;;  %v1401_v31 = vadd.f32 %v3979_v46, %v1400_v28 }
 0x23c   :  { %v1402_v32 = vpop.f32.mrf.mxu1 }
 0x23d   :  { %v1642_v33 = vpack.c.bf16 %v1598_v30, %v1597_v29  ;;  %v1535_v36 = vmul.f32 0.1, %v1401_v31 }
 0x23e   :  { %v1403_v35 = vpop.f32.mrf.mxu1 }
 0x23f   :  { %v1404_v37 = vadd.f32 %v3979_v46, %v1403_v35  ;;  %3334 = vmatmul.mubr.bf16.gmra.mxu0 %v1642_v33  ;;  %v1599_v34 = vmax.f32 %v1401_v31, %v1535_v36 }
 0x240   :  { %v1405_v38 = vpop.f32.mrf.mxu1 }
 0x241   :  { %v1536_v39 = vmul.f32 0.1, %v1404_v37 }
 0x242   :  { %v1408_v40 = vpop.f32.mrf.mxu1 }
 0x243   :  { %v1600_v41 = vmax.f32 %v1404_v37, %v1536_v39  ;;  %v1409_v42 = vadd.f32 %v3979_v46, %v1408_v40 }
 0x244   :  { %v1410_v43 = vpop.f32.mrf.mxu1 }
 0x245   :  { %v1643_v44 = vpack.c.bf16 %v1600_v41, %v1599_v34  ;;  %v1537_v45 = vmul.f32 0.1, %v1409_v42 }
 0x246   :  { %v1411_v54 = vpop.f32.mrf.mxu1 }
 0x247   :  { %v1412_v47 = vadd.f32 %v3979_v46, %v1411_v54  ;;  %3337 = vmatprep.mubr.bf16.mxu0 %v1643_v44  ;;  %v1601_v55 = vmax.f32 %v1409_v42, %v1537_v45 }
 0x248   :  { %v1413_v49 = vpop.f32.mrf.mxu1 }
 0x249   :  { %v1538_v51 = vmul.f32 0.1, %v1412_v47 }
 0x24a   :  { %v1416_v52 = vpop.f32.mrf.mxu1 }
 0x24b   :  { %v1602_v56 = vmax.f32 %v1412_v47, %v1538_v51  ;;  %v1417_v57 = vadd.f32 %v3979_v46, %v1416_v52 }
 0x24c   :  { %v1418_v58 = vpop.f32.mrf.mxu1 }
 0x24d   :  { %v1644_v59 = vpack.c.bf16 %v1602_v56, %v1601_v55  ;;  %v1539_v1 = vmul.f32 0.1, %v1417_v57 }
 0x24e   :  { %v1419_v53 = vpop.f32.mrf.mxu1 }
 0x24f   :  { %v1420_v60 = vadd.f32 %v3979_v46, %v1419_v53  ;;  %3338 = vmatmul.mubr.bf16.gmra.mxu0 %v1644_v59  ;;  %v1603_v0 = vmax.f32 %v1417_v57, %v1539_v1 }
 0x250   :  { %v1421_v61 = vpop.f32.mrf.mxu1 }
 0x251   :  { %v1540_v62 = vmul.f32 0.1, %v1420_v60 }
 0x252   :  { %v1424_v63 = vpop.f32.mrf.mxu1 }
 0x253   :  { %v1604_v2 = vmax.f32 %v1420_v60, %v1540_v62  ;;  %v1425_v3 = vadd.f32 %v3979_v46, %v1424_v63 }
 0x254   :  { %v1426_v4 = vpop.f32.mrf.mxu1 }
 0x255   :  { %v1645_v5 = vpack.c.bf16 %v1604_v2, %v1603_v0  ;;  %v1541_v7 = vmul.f32 0.1, %v1425_v3 }
 0x256   :  { %v1427_v6 = vpop.f32.mrf.mxu1 }
 0x257   :  { %v1428_v8 = vadd.f32 %v3979_v46, %v1427_v6  ;;  %3341 = vmatprep.mubr.bf16.mxu0 %v1645_v5  ;;  %v1605_v13 = vmax.f32 %v1425_v3, %v1541_v7  ;;  %v3528_v5 = vld [vmem:[%s4635_s4] ss:$0 sm:$0xff] }
 0x258   :  { %v1429_v10 = vpop.f32.mrf.mxu1 }
 0x259   :  { %v1542_v11 = vmul.f32 0.1, %v1428_v8 }
 0x25a   :  { %v1432_v12 = vpop.f32.mrf.mxu1 }
 0x25b   :  { %v1606_v14 = vmax.f32 %v1428_v8, %v1542_v11  ;;  %v1433_v15 = vadd.f32 %v3979_v46, %v1432_v12 }
 0x25c   :  { %v1434_v16 = vpop.f32.mrf.mxu1 }
 0x25d   :  { %v1646_v17 = vpack.c.bf16 %v1606_v14, %v1605_v13  ;;  %v1543_v19 = vmul.f32 0.1, %v1433_v15 }
 0x25e   :  { %v1435_v18 = vpop.f32.mrf.mxu1 }
 0x25f   :  { %v1436_v20 = vadd.f32 %v3979_v46, %v1435_v18  ;;  %3342 = vmatmul.mubr.bf16.gmra.mxu0 %v1646_v17  ;;  %v1607_v23 = vmax.f32 %v1433_v15, %v1543_v19 }
 0x260   :  { %v1437_v21 = vpop.f32.mrf.mxu1 }
 0x261   :  { %v1544_v22 = vmul.f32 0.1, %v1436_v20 }
 0x262   :  { %v1440_v25 = vpop.f32.mrf.mxu1 }
 0x263   :  { %v1608_v24 = vmax.f32 %v1436_v20, %v1544_v22  ;;  %v1441_v26 = vadd.f32 %v3979_v46, %v1440_v25 }
 0x264   :  { %v1442_v27 = vpop.f32.mrf.mxu1 }
 0x265   :  { %v1647_v9 = vpack.c.bf16 %v1608_v24, %v1607_v23  ;;  %v1545_v29 = vmul.f32 0.1, %v1441_v26 }
 0x266   :  { %v1443_v28 = vpop.f32.mrf.mxu1 }
 0x267   :  { %3345 = vmatprep.mubr.bf16.mxu0 %v1647_v9  ;;  %v1444_v30 = vadd.f32 %v3979_v46, %v1443_v28  ;;  %v1609_v35 = vmax.f32 %v1441_v26, %v1545_v29 }
 0x268   :  { %v1445_v31 = vpop.f32.mrf.mxu1 }
 0x269   :  { %v1546_v32 = vmul.f32 0.1, %v1444_v30 }
 0x26a   :  { %v1448_v33 = vpop.f32.mrf.mxu1 }
 0x26b   :  { %v1610_v36 = vmax.f32 %v1444_v30, %v1546_v32  ;;  %v1449_v37 = vadd.f32 %v3979_v46, %v1448_v33 }
 0x26c   :  { %v1450_v38 = vpop.f32.mrf.mxu1 }
 0x26d   :  { %v1648_v39 = vpack.c.bf16 %v1610_v36, %v1609_v35  ;;  %v1547_v34 = vmul.f32 0.1, %v1449_v37  ;;  %v4096_v36 = vld [vmem:[%s4636_s6] ss:$0 sm:$0xff] }
 0x26e   :  { %v1451_v40 = vpop.f32.mrf.mxu1 }
 0x26f   :  { %v1452_v41 = vadd.f32 %v3979_v46, %v1451_v40  ;;  %3346 = vmatmul.mubr.bf16.gmra.mxu0 %v1648_v39  ;;  %v1611_v54 = vmax.f32 %v1449_v37, %v1547_v34  ;;  %v4082_v49 = vpop.f32.mrf.mxu0 }
 0x270   :  { %v1453_v42 = vpop.f32.mrf.mxu1 }
 0x271   :  { %v1548_v43 = vmul.f32 0.1, %v1452_v41  ;;  %v1760_v58 = vpop.f32.mrf.mxu0 }
 0x272   :  { %v1456_v44 = vpop.f32.mrf.mxu1  ;;  %v1761_v42 = vadd.f32 %v4096_v36, %v1760_v58 }
 0x273   :  { %v1612_v45 = vmax.f32 %v1452_v41, %v1548_v43  ;;  %v1457_v47 = vadd.f32 %v3979_v46, %v1456_v44  ;;  %v3300_v63 = vpop.f32.mrf.mxu0 }
 0x274   :  { %v1458_v51 = vpop.f32.mrf.mxu1 }
 0x275   :  { %v1649_v52 = vpack.c.bf16 %v1612_v45, %v1611_v54  ;;  %v1549_v56 = vmul.f32 0.1, %v1457_v47  ;;  %v1763_v7 = vpop.f32.mrf.mxu0 }
 0x276   :  { %v1459_v55 = vpop.f32.mrf.mxu1  ;;  %v1764_v38 = vadd.f32 %v4096_v36, %v1763_v7 }
 0x277   :  { %v1460_v57 = vadd.f32 %v3979_v46, %v1459_v55  ;;  %3349 = vmatprep.mubr.bf16.mxu0 %v1649_v52  ;;  %v1613_v60 = vmax.f32 %v1457_v47, %v1549_v56  ;;  %v2015_v55 = vmul.f32 0.1, %v1761_v42  ;;  %v1772_v56 = vadd.f32 %v3300_v63, %v4096_v36 }
 0x278   :  { %v1461_v59 = vpop.f32.mrf.mxu1  ;;  %v2016_v45 = vmul.f32 0.1, %v1764_v38 }
 0x279   :  { %v1550_v53 = vmul.f32 0.1, %v1460_v57 }
 0x27a   :  { %v1464_v1 = vpop.f32.mrf.mxu1 }
 0x27b   :  { %v1614_v61 = vmax.f32 %v1460_v57, %v1550_v53  ;;  %v1465_v62 = vadd.f32 %v3979_v46, %v1464_v1  ;;  %v1769_v1 = vadd.f32 %v4082_v49, %v4096_v36 }
 0x27c   :  { %v1466_v0 = vpop.f32.mrf.mxu1 }
 0x27d   :  { %v1650_v2 = vpack.c.bf16 %v1614_v61, %v1613_v60  ;;  %v1551_v4 = vmul.f32 0.1, %v1465_v62  ;;  %v2080_v60 = vmax.f32 %v1764_v38, %v2016_v45  ;;  %v2079_v0 = vmax.f32 %v1761_v42, %v2015_v55 }
 0x27e   :  { %v1467_v3 = vpop.f32.mrf.mxu1 }
 0x27f   :  { %v1468_v6 = vadd.f32 %v3528_v5, %v1467_v3  ;;  %3350 = vmatmul.mubr.bf16.gmra.mxu0 %v1650_v2  ;;  %v4089_v11 = vpop.f32.mrf.mxu0  ;;  %v1615_v13 = vmax.f32 %v1465_v62, %v1551_v4  ;;  %v2018_v2 = vmul.f32 0.1, %v1772_v56 }
 0x280   :  { %v1469_v8 = vpop.f32.mrf.mxu1 }
 0x281   :  { %v1552_v10 = vmul.f32 0.1, %v1468_v6  ;;  %v1776_v17 = vpop.f32.mrf.mxu0  ;;  %v2143_v8 = vpack.c.bf16 %v2080_v60, %v2079_v0 }
 0x282   :  { %v1472_v12 = vpop.f32.mrf.mxu1  ;;  %v1777_v3 = vadd.f32 %v4096_v36, %v1776_v17 }
 0x283   :  { %v1616_v14 = vmax.f32 %v1468_v6, %v1552_v10  ;;  %v1473_v46 = vadd.f32 %v3528_v5, %v1472_v12  ;;  %v3304_v23 = vpop.f32.mrf.mxu0  ;;  %v2017_v6 = vmul.f32 0.1, %v1769_v1  ;;  %v2082_v10 = vmax.f32 %v1772_v56, %v2018_v2 }
 0x284   :  { %v1474_v15 = vpop.f32.mrf.mxu1  ;;  %v2019_v12 = vmul.f32 0.1, %v1777_v3 }
 0x285   :  { %v1651_v16 = vpack.c.bf16 %v1616_v14, %v1615_v13  ;;  %v1553_v19 = vmul.f32 0.1, %v1473_v46  ;;  %v1779_v29 = vpop.f32.mrf.mxu0  ;;  %v1788_v13 = vadd.f32 %v3304_v23, %v4096_v36 }
 0x286   :  { %v1475_v18 = vpop.f32.mrf.mxu1  ;;  %v1780_v58 = vadd.f32 %v4096_v36, %v1779_v29 }
 0x287   :  { %v1476_v20 = vadd.f32 %v3528_v5, %v1475_v18  ;;  %3353 = vmatprep.mubr.bf16.mxu0 %v1651_v16  ;;  %v1617_v25 = vmax.f32 %v1473_v46, %v1553_v19  ;;  %v2081_v46 = vmax.f32 %v1769_v1, %v2017_v6  ;;  %v1785_v19 = vadd.f32 %v4089_v11, %v4096_v36 }
 0x288   :  { %v1477_v21 = vpop.f32.mrf.mxu1  ;;  %v2020_v7 = vmul.f32 0.1, %v1780_v58  ;;  %v2022_v23 = vmul.f32 0.1, %v1788_v13 }
 0x289   :  { %v1554_v22 = vmul.f32 0.1, %v1476_v20  ;;  %v2144_v21 = vpack.c.bf16 %v2082_v10, %v2081_v46 }
 0x28a   :  { %v1480_v24 = vpop.f32.mrf.mxu1  ;;  %v2084_v15 = vmax.f32 %v1780_v58, %v2020_v7 }
 0x28b   :  { %v1618_v26 = vmax.f32 %v1476_v20, %v1554_v22  ;;  %v1481_v27 = vadd.f32 %v3528_v5, %v1480_v24  ;;  %v2083_v22 = vmax.f32 %v1777_v3, %v2019_v12 }
 0x28c   :  { %v1482_v9 = vpop.f32.mrf.mxu1 }
 0x28d   :  { %v1652_v28 = vpack.c.bf16 %v1618_v26, %v1617_v25  ;;  %v1555_v31 = vmul.f32 0.1, %v1481_v27 }
 0x28e   :  { %v1483_v30 = vpop.f32.mrf.mxu1 }
 0x28f   :  { %v1484_v32 = vadd.f32 %v3528_v5, %v1483_v30  ;;  %3354 = vmatmul.mubr.bf16.gmra.mxu0 %v1652_v28  ;;  %v4091_v33 = vpop.f32.mrf.mxu0  ;;  %v1619_v40 = vmax.f32 %v1481_v27, %v1555_v31  ;;  %v2145_v30 = vpack.c.bf16 %v2084_v15, %v2083_v22  ;;  %v2021_v31 = vmul.f32 0.1, %v1785_v19 }
 0x290   :  { %v1485_v35 = vpop.f32.mrf.mxu1 }
 0x291   :  { %v1556_v37 = vmul.f32 0.1, %v1484_v32  ;;  %v1792_v43 = vpop.f32.mrf.mxu0  ;;  %v2085_v42 = vmax.f32 %v1785_v19, %v2021_v31 }
 0x292   :  { %v1488_v39 = vpop.f32.mrf.mxu1  ;;  %v1793_v24 = vadd.f32 %v4096_v36, %v1792_v43  ;;  %v1801_v43 = vadd.f32 %v4091_v33, %v4096_v36 }
 0x293   :  { %v1620_v34 = vmax.f32 %v1484_v32, %v1556_v37  ;;  %v1489_v41 = vadd.f32 %v3528_v5, %v1488_v39  ;;  %v3308_v57 = vpop.f32.mrf.mxu0  ;;  %v2086_v37 = vmax.f32 %v1788_v13, %v2022_v23 }
 0x294   :  { %v1490_v44 = vpop.f32.mrf.mxu1  ;;  %v2023_v35 = vmul.f32 0.1, %v1793_v24  ;;  %v1804_v38 = vadd.f32 %v3308_v57, %v4096_v36  ;;  %v2025_v56 = vmul.f32 0.1, %v1801_v43 }
 0x295   :  { %v1653_v54 = vpack.c.bf16 %v1620_v34, %v1619_v40  ;;  %v1557_v51 = vmul.f32 0.1, %v1489_v41  ;;  %v1795_v4 = vpop.f32.mrf.mxu0 }
 0x296   :  { %v1491_v47 = vpop.f32.mrf.mxu1  ;;  %v1796_v16 = vadd.f32 %v4096_v36, %v1795_v4  ;;  %v2089_v33 = vmax.f32 %v1801_v43, %v2025_v56 }
 0x297   :  { %v1492_v52 = vadd.f32 %v3528_v5, %v1491_v47  ;;  %3357 = vmatprep.mubr.bf16.mxu0 %v1653_v54  ;;  %v1621_v61 = vmax.f32 %v1489_v41, %v1557_v51  ;;  %v2087_v54 = vmax.f32 %v1793_v24, %v2023_v35  ;;  %v2146_v47 = vpack.c.bf16 %v2086_v37, %v2085_v42 }
 0x298   :  { %v1493_v59 = vpop.f32.mrf.mxu1  ;;  %v2024_v28 = vmul.f32 0.1, %v1796_v16  ;;  %v2026_v51 = vmul.f32 0.1, %v1804_v38 }
 0x299   :  { %v1558_v53 = vmul.f32 0.1, %v1492_v52 }
 0x29a   :  { %v2088_v34 = vmax.f32 %v1796_v16, %v2024_v28  ;;  %v2090_v59 = vmax.f32 %v1804_v38, %v2026_v51 }
 0x29b   :  { %v1622_v62 = vmax.f32 %v1492_v52, %v1558_v53 }
 0x29c   :  { %v2147_v55 = vpack.c.bf16 %v2088_v34, %v2087_v54 }
 0x29d   :  { %v1654_v5 = vpack.c.bf16 %v1622_v62, %v1621_v61  ;;  %v2148_v62 = vpack.c.bf16 %v2090_v59, %v2089_v33 }
 0x29f   :  { %v3311_v63 = vpop.f32.mrf.mxu0  ;;  %3358 = vmatmul.mubr.bf16.gmra.mxu0 %v1654_v5 }
 0x2a0   :  { %3377 = vmatprep.mubr.bf16.mxu0 %v2143_v8  ;;  %v1817_v17 = vadd.f32 %v3311_v63, %v4096_v36 }
 0x2a1   :  { %v1808_v49 = vpop.f32.mrf.mxu0 }
 0x2a2   :  { %v1809_v14 = vadd.f32 %v4096_v36, %v1808_v49  ;;  %v2029_v29 = vmul.f32 0.1, %v1817_v17 }
 0x2a3   :  { %v3312_v18 = vpop.f32.mrf.mxu0 }
 0x2a4   :  { %v1820_v20 = vadd.f32 %v3312_v18, %v4096_v36  ;;  %v2027_v26 = vmul.f32 0.1, %v1809_v14  ;;  %v2093_v41 = vmax.f32 %v1817_v17, %v2029_v29 }
 0x2a5   :  { %v1811_v25 = vpop.f32.mrf.mxu0 }
 0x2a6   :  { %v2030_v27 = vmul.f32 0.1, %v1820_v20  ;;  %v1812_v9 = vadd.f32 %v4096_v36, %v1811_v25  ;;  %v2091_v39 = vmax.f32 %v1809_v14, %v2027_v26 }
 0x2a7   :  { %3378 = vmatmul.mubr.bf16.vlgmr.msra.gmra.mxu0 %v2144_v21 }
 0x2a8   :  { %v2028_v32 = vmul.f32 0.1, %v1812_v9  ;;  %v2094_v11 = vmax.f32 %v1820_v20, %v2030_v27  ;;  %3381 = vmatprep.mubr.bf16.mxu0 %v2145_v30 }
 0x2aa   :  { %v2092_v40 = vmax.f32 %v1812_v9, %v2028_v32  ;;  %v2150_v45 = vpack.c.bf16 %v2094_v11, %v2093_v41 }
 0x2ac   :  { %v2149_v44 = vpack.c.bf16 %v2092_v40, %v2091_v39 }
 0x2ae   :  { %3389 = vmatprep.mubr.bf16.mxu1 %v2149_v44 }
 0x2af   :  { %v3315_v52 = vpop.f32.mrf.mxu0  ;;  %3390 = vmatmul.mubr.bf16.vlgmr.msra.gmra.mxu1 %v2150_v45  ;;  %3382 = vmatmul.mubr.bf16.gmra.mxu0 %v2146_v47 }
 0x2b0   :  { %3385 = vmatprep.mubr.bf16.mxu0 %v2147_v55  ;;  %v1833_v1 = vadd.f32 %v3315_v52, %v4096_v36 }
 0x2b1   :  { %v1824_v57 = vpop.f32.mrf.mxu0 }
 0x2b2   :  { %v1825_v53 = vadd.f32 %v4096_v36, %v1824_v57  ;;  %v2033_v4 = vmul.f32 0.1, %v1833_v1 }
 0x2b3   :  { %v3316_v60 = vpop.f32.mrf.mxu0 }
 0x2b4   :  { %v1836_v58 = vadd.f32 %v3316_v60, %v4096_v36  ;;  %v2031_v0 = vmul.f32 0.1, %v1825_v53  ;;  %v2097_v8 = vmax.f32 %v1833_v1, %v2033_v4 }
 0x2b5   :  { %v1827_v61 = vpop.f32.mrf.mxu0 }
 0x2b6   :  { %v2034_v2 = vmul.f32 0.1, %v1836_v58  ;;  %v1828_v3 = vadd.f32 %v4096_v36, %v1827_v61  ;;  %v2095_v7 = vmax.f32 %v1825_v53, %v2031_v0 }
 0x2b7   :  { %3386 = vmatmul.mubr.bf16.gmra.mxu0 %v2148_v62 }
 0x2b8   :  { %v2032_v5 = vmul.f32 0.1, %v1828_v3  ;;  %v2098_v6 = vmax.f32 %v1836_v58, %v2034_v2 }
 0x2ba   :  { %v2096_v63 = vmax.f32 %v1828_v3, %v2032_v5  ;;  %v2152_v12 = vpack.c.bf16 %v2098_v6, %v2097_v8 }
 0x2bc   :  { %v2151_v10 = vpack.c.bf16 %v2096_v63, %v2095_v7 }
 0x2be   :  { %3393 = vmatprep.mubr.bf16.mxu1 %v2151_v10 }
 0x2bf   :  { %v3319_v49 = vpop.f32.mrf.mxu0  ;;  %3394 = vmatmul.mubr.bf16.gmra.mxu1 %v2152_v12 }
 0x2c0   :  { %v1849_v46 = vadd.f32 %v3319_v49, %v4096_v36 }
 0x2c1   :  { %v1840_v13 = vpop.f32.mrf.mxu0 }
 0x2c2   :  { %v1841_v14 = vadd.f32 %v4096_v36, %v1840_v13  ;;  %v2037_v21 = vmul.f32 0.1, %v1849_v46 }
 0x2c3   :  { %v3320_v15 = vpop.f32.mrf.mxu0 }
 0x2c4   :  { %v1852_v16 = vadd.f32 %v3320_v15, %v4096_v36  ;;  %v2035_v18 = vmul.f32 0.1, %v1841_v14  ;;  %v2101_v26 = vmax.f32 %v1849_v46, %v2037_v21 }
 0x2c5   :  { %v1843_v17 = vpop.f32.mrf.mxu0 }
 0x2c6   :  { %v2038_v19 = vmul.f32 0.1, %v1852_v16  ;;  %v1844_v20 = vadd.f32 %v4096_v36, %v1843_v17  ;;  %v2099_v25 = vmax.f32 %v1841_v14, %v2035_v18 }
 0x2c8   :  { %v2036_v22 = vmul.f32 0.1, %v1844_v20  ;;  %v2102_v24 = vmax.f32 %v1852_v16, %v2038_v19 }
 0x2ca   :  { %v2100_v23 = vmax.f32 %v1844_v20, %v2036_v22  ;;  %v2154_v9 = vpack.c.bf16 %v2102_v24, %v2101_v26 }
 0x2cc   :  { %v2153_v27 = vpack.c.bf16 %v2100_v23, %v2099_v25 }
 0x2ce   :  { %3397 = vmatprep.mubr.bf16.mxu1 %v2153_v27 }
 0x2cf   :  { %v3323_v28 = vpop.f32.mrf.mxu0  ;;  %3398 = vmatmul.mubr.bf16.gmra.mxu1 %v2154_v9 }
 0x2d0   :  { %v1865_v31 = vadd.f32 %v3323_v28, %v4096_v36 }
 0x2d1   :  { %v1856_v29 = vpop.f32.mrf.mxu0 }
 0x2d2   :  { %v1857_v30 = vadd.f32 %v4096_v36, %v1856_v29  ;;  %v2041_v40 = vmul.f32 0.1, %v1865_v31 }
 0x2d3   :  { %v3324_v32 = vpop.f32.mrf.mxu0 }
 0x2d4   :  { %v1868_v35 = vadd.f32 %v3324_v32, %v4096_v36  ;;  %v2039_v37 = vmul.f32 0.1, %v1857_v30  ;;  %v2105_v44 = vmax.f32 %v1865_v31, %v2041_v40 }
 0x2d5   :  { %v1859_v11 = vpop.f32.mrf.mxu0 }
 0x2d6   :  { %v2042_v38 = vmul.f32 0.1, %v1868_v35  ;;  %v1860_v39 = vadd.f32 %v4096_v36, %v1859_v11  ;;  %v2103_v42 = vmax.f32 %v1857_v30, %v2039_v37 }
 0x2d8   :  { %v2040_v34 = vmul.f32 0.1, %v1860_v39  ;;  %v2106_v41 = vmax.f32 %v1868_v35, %v2042_v38 }
 0x2da   :  { %v2104_v43 = vmax.f32 %v1860_v39, %v2040_v34  ;;  %v2156_v45 = vpack.c.bf16 %v2106_v41, %v2105_v44 }
 0x2dc   :  { %v2155_v54 = vpack.c.bf16 %v2104_v43, %v2103_v42 }
 0x2de   :  { %3401 = vmatprep.mubr.bf16.mxu1 %v2155_v54 }
 0x2df   :  { %v3327_v47 = vpop.f32.mrf.mxu0  ;;  %3402 = vmatmul.mubr.bf16.gmra.mxu1 %v2156_v45 }
 0x2e0   :  { %v1881_v55 = vadd.f32 %v3327_v47, %v4096_v36 }
 0x2e1   :  { %v1872_v51 = vpop.f32.mrf.mxu0 }
 0x2e2   :  { %v1873_v52 = vadd.f32 %v4096_v36, %v1872_v51  ;;  %v2045_v33 = vmul.f32 0.1, %v1881_v55 }
 0x2e3   :  { %v3328_v56 = vpop.f32.mrf.mxu0 }
 0x2e4   :  { %v1884_v57 = vadd.f32 %v3328_v56, %v4096_v36  ;;  %v2043_v53 = vmul.f32 0.1, %v1873_v52  ;;  %v2109_v2 = vmax.f32 %v1881_v55, %v2045_v33 }
 0x2e5   :  { %v1875_v59 = vpop.f32.mrf.mxu0 }
 0x2e6   :  { %v2046_v1 = vmul.f32 0.1, %v1884_v57  ;;  %v1876_v60 = vadd.f32 %v4096_v36, %v1875_v59  ;;  %v2107_v62 = vmax.f32 %v1873_v52, %v2043_v53 }
 0x2e8   :  { %v2044_v58 = vmul.f32 0.1, %v1876_v60  ;;  %v2110_v61 = vmax.f32 %v1884_v57, %v2046_v1 }
 0x2ea   :  { %v2108_v0 = vmax.f32 %v1876_v60, %v2044_v58  ;;  %v2158_v4 = vpack.c.bf16 %v2110_v61, %v2109_v2 }
 0x2ec   :  { %v2157_v3 = vpack.c.bf16 %v2108_v0, %v2107_v62 }
 0x2ee   :  { %3405 = vmatprep.mubr.bf16.mxu1 %v2157_v3 }
 0x2ef   :  { %v3331_v5 = vpop.f32.mrf.mxu0  ;;  %3406 = vmatmul.mubr.bf16.gmra.mxu1 %v2158_v4 }
 0x2f0   :  { %v1897_v63 = vadd.f32 %v3331_v5, %v4096_v36 }
 0x2f1   :  { %v1888_v6 = vpop.f32.mrf.mxu0 }
 0x2f2   :  { %v1889_v7 = vadd.f32 %v4096_v36, %v1888_v6  ;;  %v2049_v46 = vmul.f32 0.1, %v1897_v63 }
 0x2f3   :  { %v3332_v8 = vpop.f32.mrf.mxu0 }
 0x2f4   :  { %v1900_v10 = vadd.f32 %v3332_v8, %v4096_v36  ;;  %v2047_v49 = vmul.f32 0.1, %v1889_v7  ;;  %v2113_v19 = vmax.f32 %v1897_v63, %v2049_v46 }
 0x2f5   :  { %v1891_v12 = vpop.f32.mrf.mxu0 }
 0x2f6   :  { %v2050_v13 = vmul.f32 0.1, %v1900_v10  ;;  %v1892_v14 = vadd.f32 %v4096_v36, %v1891_v12  ;;  %v2111_v17 = vmax.f32 %v1889_v7, %v2047_v49 }
 0x2f8   :  { %v2048_v15 = vmul.f32 0.1, %v1892_v14  ;;  %v2114_v16 = vmax.f32 %v1900_v10, %v2050_v13 }
 0x2fa   :  { %v2112_v18 = vmax.f32 %v1892_v14, %v2048_v15  ;;  %v2160_v21 = vpack.c.bf16 %v2114_v16, %v2113_v19 }
 0x2fc   :  { %v2159_v20 = vpack.c.bf16 %v2112_v18, %v2111_v17 }
 0x2fe   :  { %3409 = vmatprep.mubr.bf16.mxu1 %v2159_v20 }
 0x2ff   :  { %v3335_v22 = vpop.f32.mrf.mxu0  ;;  %3410 = vmatmul.mubr.bf16.gmra.mxu1 %v2160_v21 }
 0x300   :  { %v1913_v23 = vadd.f32 %v3335_v22, %v4096_v36 }
 0x301   :  { %v1904_v24 = vpop.f32.mrf.mxu0 }
 0x302   :  { %v1905_v25 = vadd.f32 %v4096_v36, %v1904_v24  ;;  %v2053_v31 = vmul.f32 0.1, %v1913_v23 }
 0x303   :  { %v3336_v26 = vpop.f32.mrf.mxu0 }
 0x304   :  { %v1916_v27 = vadd.f32 %v3336_v26, %v4096_v36  ;;  %v2051_v28 = vmul.f32 0.1, %v1905_v25  ;;  %v2117_v38 = vmax.f32 %v1913_v23, %v2053_v31 }
 0x305   :  { %v1907_v9 = vpop.f32.mrf.mxu0 }
 0x306   :  { %v2054_v29 = vmul.f32 0.1, %v1916_v27  ;;  %v1908_v30 = vadd.f32 %v4096_v36, %v1907_v9  ;;  %v2115_v11 = vmax.f32 %v1905_v25, %v2051_v28 }
 0x308   :  { %v2052_v32 = vmul.f32 0.1, %v1908_v30  ;;  %v2118_v35 = vmax.f32 %v1916_v27, %v2054_v29 }
 0x30a   :  { %v2116_v37 = vmax.f32 %v1908_v30, %v2052_v32  ;;  %v2162_v40 = vpack.c.bf16 %v2118_v35, %v2117_v38 }
 0x30c   :  { %v2161_v39 = vpack.c.bf16 %v2116_v37, %v2115_v11 }
 0x30e   :  { %3413 = vmatprep.mubr.bf16.mxu1 %v2161_v39 }
 0x30f   :  { %v3339_v34 = vpop.f32.mrf.mxu0  ;;  %3414 = vmatmul.mubr.bf16.gmra.mxu1 %v2162_v40 }
 0x310   :  { %v1929_v43 = vadd.f32 %v3339_v34, %v4096_v36 }
 0x311   :  { %v1920_v41 = vpop.f32.mrf.mxu0 }
 0x312   :  { %v1921_v42 = vadd.f32 %v4096_v36, %v1920_v41  ;;  %v2057_v55 = vmul.f32 0.1, %v1929_v43 }
 0x313   :  { %v3340_v44 = vpop.f32.mrf.mxu0 }
 0x314   :  { %v1932_v54 = vadd.f32 %v3340_v44, %v4096_v36  ;;  %v2055_v47 = vmul.f32 0.1, %v1921_v42  ;;  %v2121_v1 = vmax.f32 %v1929_v43, %v2057_v55 }
 0x315   :  { %v1923_v45 = vpop.f32.mrf.mxu0 }
 0x316   :  { %v2058_v51 = vmul.f32 0.1, %v1932_v54  ;;  %v1924_v52 = vadd.f32 %v4096_v36, %v1923_v45  ;;  %v2119_v59 = vmax.f32 %v1921_v42, %v2055_v47 }
 0x318   :  { %v2056_v56 = vmul.f32 0.1, %v1924_v52  ;;  %v2122_v57 = vmax.f32 %v1932_v54, %v2058_v51 }
 0x31a   :  { %v2120_v53 = vmax.f32 %v1924_v52, %v2056_v56  ;;  %v2164_v33 = vpack.c.bf16 %v2122_v57, %v2121_v1 }
 0x31c   :  { %v2163_v60 = vpack.c.bf16 %v2120_v53, %v2119_v59 }
 0x31e   :  { %3417 = vmatprep.mubr.bf16.mxu1 %v2163_v60 }
 0x31f   :  { %v3343_v58 = vpop.f32.mrf.mxu0  ;;  %3418 = vmatmul.mubr.bf16.gmra.mxu1 %v2164_v33 }
 0x320   :  { %v1945_v0 = vadd.f32 %v3343_v58, %v4096_v36 }
 0x321   :  { %v1936_v61 = vpop.f32.mrf.mxu0 }
 0x322   :  { %v1937_v62 = vadd.f32 %v4096_v36, %v1936_v61  ;;  %v2061_v63 = vmul.f32 0.1, %v1945_v0 }
 0x323   :  { %v3344_v2 = vpop.f32.mrf.mxu0 }
 0x324   :  { %v1948_v3 = vadd.f32 %v3344_v2, %v4096_v36  ;;  %v2059_v5 = vmul.f32 0.1, %v1937_v62  ;;  %v2125_v13 = vmax.f32 %v1945_v0, %v2061_v63 }
 0x325   :  { %v1939_v4 = vpop.f32.mrf.mxu0 }
 0x326   :  { %v2062_v6 = vmul.f32 0.1, %v1948_v3  ;;  %v1940_v7 = vadd.f32 %v4096_v36, %v1939_v4  ;;  %v2123_v12 = vmax.f32 %v1937_v62, %v2059_v5 }
 0x328   :  { %v2060_v8 = vmul.f32 0.1, %v1940_v7  ;;  %v2126_v10 = vmax.f32 %v1948_v3, %v2062_v6 }
 0x32a   :  { %v2124_v49 = vmax.f32 %v1940_v7, %v2060_v8  ;;  %v2166_v46 = vpack.c.bf16 %v2126_v10, %v2125_v13 }
 0x32c   :  { %v2165_v14 = vpack.c.bf16 %v2124_v49, %v2123_v12 }
 0x32e   :  { %3421 = vmatprep.mubr.bf16.mxu1 %v2165_v14 }
 0x32f   :  { %3422 = vmatmul.mubr.bf16.gmra.mxu1 %v2166_v46  ;;  %v3347_v15 = vpop.f32.mrf.mxu0 }
 0x330   :  { %v1961_v18 = vadd.f32 %v3347_v15, %v4096_v36  ;;  %v4167_v15 = vld [vmem:[%s4637_s8] ss:$0 sm:$0xff] }
 0x331   :  { %v1952_v16 = vpop.f32.mrf.mxu0 }
 0x332   :  { %v1953_v17 = vadd.f32 %v4096_v36, %v1952_v16  ;;  %v2065_v23 = vmul.f32 0.1, %v1961_v18 }
 0x333   :  { %v3348_v19 = vpop.f32.mrf.mxu0 }
 0x334   :  { %v1964_v20 = vadd.f32 %v3348_v19, %v4096_v36  ;;  %v2063_v22 = vmul.f32 0.1, %v1953_v17  ;;  %v2129_v29 = vmax.f32 %v1961_v18, %v2065_v23 }
 0x335   :  { %v1955_v21 = vpop.f32.mrf.mxu0 }
 0x336   :  { %v2066_v24 = vmul.f32 0.1, %v1964_v20  ;;  %v1956_v25 = vadd.f32 %v4096_v36, %v1955_v21  ;;  %v2127_v9 = vmax.f32 %v1953_v17, %v2063_v22 }
 0x338   :  { %v2064_v26 = vmul.f32 0.1, %v1956_v25  ;;  %v2130_v27 = vmax.f32 %v1964_v20, %v2066_v24 }
 0x33a   :  { %v2128_v28 = vmax.f32 %v1956_v25, %v2064_v26  ;;  %v2168_v31 = vpack.c.bf16 %v2130_v27, %v2129_v29  ;;  %v2695_v29 = vld [vmem:[%s4638_s9] sm:$0x1] }
 0x33c   :  { %v2167_v30 = vpack.c.bf16 %v2128_v28, %v2127_v9 }
 0x33e   :  { %3425 = vmatprep.mubr.bf16.mxu1 %v2167_v30 }
 0x33f   :  { %v3351_v32 = vpop.f32.mrf.mxu0  ;;  %3426 = vmatmul.mubr.bf16.gmra.mxu1 %v2168_v31 }
 0x340   :  { %v1977_v37 = vadd.f32 %v3351_v32, %v4096_v36 }
 0x341   :  { %v1968_v35 = vpop.f32.mrf.mxu0 }
 0x342   :  { %v1969_v11 = vadd.f32 %v4096_v36, %v1968_v35  ;;  %v2069_v43 = vmul.f32 0.1, %v1977_v37 }
 0x343   :  { %v3352_v38 = vpop.f32.mrf.mxu0 }
 0x344   :  { %v1980_v39 = vadd.f32 %v3352_v38, %v4096_v36  ;;  %v2067_v34 = vmul.f32 0.1, %v1969_v11  ;;  %v2133_v51 = vmax.f32 %v1977_v37, %v2069_v43 }
 0x345   :  { %v1971_v40 = vpop.f32.mrf.mxu0 }
 0x346   :  { %v2070_v41 = vmul.f32 0.1, %v1980_v39  ;;  %v1972_v42 = vadd.f32 %v4096_v36, %v1971_v40  ;;  %v2131_v45 = vmax.f32 %v1969_v11, %v2067_v34 }
 0x348   :  { %v2068_v44 = vmul.f32 0.1, %v1972_v42  ;;  %v2134_v54 = vmax.f32 %v1980_v39, %v2070_v41  ;;  %v2696_v39 = vunpack.c.l.bf16 %v2695_v29 }
 0x34a   :  { %v2132_v47 = vmax.f32 %v1972_v42, %v2068_v44  ;;  %v2170_v55 = vpack.c.bf16 %v2134_v54, %v2133_v51 }
 0x34c   :  { %v2169_v52 = vpack.c.bf16 %v2132_v47, %v2131_v45 }
 0x34e   :  { %3429 = vmatprep.mubr.bf16.mxu1 %v2169_v52 }
 0x34f   :  { %v3355_v56 = vpop.f32.mrf.mxu0  ;;  %3430 = vmatmul.mubr.bf16.gmra.mxu1 %v2170_v55 }
 0x350   :  { %v1993_v53 = vadd.f32 %v3355_v56, %v4096_v36  ;;  %v4181_v56 = vrot.slane %v2696_v39, %v113_v50 }
 0x351   :  { %v1984_v57 = vpop.f32.mrf.mxu0 }
 0x352   :  { %v1985_v59 = vadd.f32 %v4096_v36, %v1984_v57  ;;  %v2073_v0 = vmul.f32 0.1, %v1993_v53 }
 0x353   :  { %v3356_v1 = vpop.f32.mrf.mxu0 }
 0x354   :  { %v1996_v60 = vadd.f32 %v3356_v1, %v4096_v36  ;;  %v2071_v58 = vmul.f32 0.1, %v1985_v59  ;;  %v2137_v6 = vmax.f32 %v1993_v53, %v2073_v0 }
 0x355   :  { %v1987_v33 = vpop.f32.mrf.mxu0 }
 0x356   :  { %v2074_v61 = vmul.f32 0.1, %v1996_v60  ;;  %v1988_v62 = vadd.f32 %v4096_v36, %v1987_v33  ;;  %v2135_v4 = vmax.f32 %v1985_v59, %v2071_v58 }
 0x358   :  { %v2072_v2 = vmul.f32 0.1, %v1988_v62  ;;  %v2138_v3 = vmax.f32 %v1996_v60, %v2074_v61 }
 0x35a   :  { %v2136_v5 = vmax.f32 %v1988_v62, %v2072_v2  ;;  %v2172_v63 = vpack.c.bf16 %v2138_v3, %v2137_v6 }
 0x35c   :  { %v2171_v7 = vpack.c.bf16 %v2136_v5, %v2135_v4 }
 0x35e   :  { %3433 = vmatprep.mubr.bf16.mxu1 %v2171_v7 }
 0x35f   :  { %v3359_v8 = vpop.f32.mrf.mxu0  ;;  %3434 = vmatmul.mubr.bf16.gmra.mxu1 %v2172_v63 }
 0x360   :  { %v2009_v49 = vadd.f32 %v3359_v8, %v4096_v36 }
 0x361   :  { %v2000_v10 = vpop.f32.mrf.mxu0 }
 0x362   :  { %v2001_v12 = vadd.f32 %v4096_v36, %v2000_v10  ;;  %v2077_v19 = vmul.f32 0.1, %v2009_v49 }
 0x363   :  { %v3360_v13 = vpop.f32.mrf.mxu0 }
 0x364   :  { %v2012_v14 = vadd.f32 %v3360_v13, %v4096_v36  ;;  %v2075_v16 = vmul.f32 0.1, %v2001_v12  ;;  %v2141_v27 = vmax.f32 %v2009_v49, %v2077_v19 }
 0x365   :  { %v2003_v46 = vpop.f32.mrf.mxu0 }
 0x366   :  { %v2078_v17 = vmul.f32 0.1, %v2012_v14  ;;  %v2004_v18 = vadd.f32 %v4096_v36, %v2003_v46  ;;  %v2139_v23 = vmax.f32 %v2001_v12, %v2075_v16 }
 0x367   :  { %v3379_v20 = vpop.f32.mrf.mxu0 }
 0x368   :  { %v2076_v21 = vmul.f32 0.1, %v2004_v18  ;;  %v2289_v22 = vadd.f32 %v3379_v20, %v4167_v15  ;;  %v2142_v24 = vmax.f32 %v2012_v14, %v2078_v17 }
 0x369   :  { %v2280_v25 = vpop.f32.mrf.mxu0 }
 0x36a   :  { %v2140_v26 = vmax.f32 %v2004_v18, %v2076_v21  ;;  %v2281_v9 = vadd.f32 %v4167_v15, %v2280_v25  ;;  %v2537_v30 = vmul.f32 0.1, %v2289_v22  ;;  %v2174_v32 = vpack.c.bf16 %v2142_v24, %v2141_v27 }
 0x36b   :  { %v3380_v28 = vpop.f32.mrf.mxu0 }
 0x36c   :  { %v2292_v36 = vadd.f32 %v3380_v28, %v4167_v15  ;;  %v2173_v31 = vpack.c.bf16 %v2140_v26, %v2139_v23  ;;  %v2535_v40 = vmul.f32 0.1, %v2281_v9  ;;  %v2601_v41 = vmax.f32 %v2289_v22, %v2537_v30 }
 0x36d   :  { %v2283_v35 = vpop.f32.mrf.mxu0 }
 0x36e   :  { %v2538_v11 = vmul.f32 0.1, %v2292_v36  ;;  %v2284_v37 = vadd.f32 %v4167_v15, %v2283_v35  ;;  %3437 = vmatprep.mubr.bf16.mxu1 %v2173_v31  ;;  %v2599_v57 = vmax.f32 %v2281_v9, %v2535_v40 }
 0x36f   :  { %v3391_v38 = vpop.f32.mrf.mxu1  ;;  %v3383_v34 = vpop.f32.mrf.mxu0  ;;  %3438 = vmatmul.mubr.bf16.gmra.mxu1 %v2174_v32 }
 0x370   :  { %v2602_v42 = vmax.f32 %v2292_v36, %v2538_v11  ;;  %v2536_v43 = vmul.f32 0.1, %v2284_v37  ;;  %v2305_v44 = vadd.f32 %v3383_v34, %v4167_v15  ;;  %v2337_v45 = vadd.f32 %v3391_v38, %v4167_v15 }
 0x371   :  { %v2328_v54 = vpop.f32.mrf.mxu1  ;;  %v2296_v47 = vpop.f32.mrf.mxu0 }
 0x372   :  { %v2600_v51 = vmax.f32 %v2284_v37, %v2536_v43  ;;  %v2664_v55 = vpack.c.bf16 %v2602_v42, %v2601_v41  ;;  %v2541_v1 = vmul.f32 0.1, %v2305_v44  ;;  %v2297_v60 = vadd.f32 %v4167_v15, %v2296_v47 }
 0x373   :  { %v3392_v52 = vpop.f32.mrf.mxu1  ;;  %v3384_v59 = vpop.f32.mrf.mxu0  ;;  %v2549_v62 = vmul.f32 0.1, %v2337_v45  ;;  %v2329_v6 = vadd.f32 %v4167_v15, %v2328_v54 }
 0x374   :  { %v2340_v53 = vadd.f32 %v3392_v52, %v4167_v15  ;;  %v2308_v33 = vadd.f32 %v3384_v59, %v4167_v15  ;;  %v2699_v61 = vunpack.c.l.bf16 %v2664_v55  ;;  %v2663_v3 = vpack.c.bf16 %v2600_v51, %v2599_v57 }
 0x375   :  { %v2331_v58 = vpop.f32.mrf.mxu1  ;;  %v2299_v2 = vpop.f32.mrf.mxu0  ;;  %v2700_v10 = vunpack.c.h.bf16 %v2664_v55  ;;  %v2605_v12 = vmax.f32 %v2305_v44, %v2541_v1  ;;  %v2539_v49 = vmul.f32 0.1, %v2297_v60  ;;  %v2613_v46 = vmax.f32 %v2337_v45, %v2549_v62 }
 0x376   :  { %v2550_v0 = vmul.f32 0.1, %v2340_v53  ;;  %v2542_v4 = vmul.f32 0.1, %v2308_v33  ;;  %v2300_v48 = vadd.f32 %v4167_v15, %v2299_v2  ;;  %v2332_v50 = vadd.f32 %v4167_v15, %v2331_v58 }
 0x377   :  { %v2767_v5 = vmul.f32 %v4181_v56, %v2699_v61  ;;  %v3387_v63 = vpop.f32.mrf.mxu0  ;;  %v2697_v8 = vunpack.c.l.bf16 %v2663_v3  ;;  %v2698_v18 = vunpack.c.h.bf16 %v2663_v3  ;;  %v2768_v22 = vmul.f32 %v4181_v56, %v2700_v10 }
 0x378   :  { %v2614_v7 = vmax.f32 %v2340_v53, %v2550_v0  ;;  %v2606_v13 = vmax.f32 %v2308_v33, %v2542_v4  ;;  %v2540_v14 = vmul.f32 0.1, %v2300_v48  ;;  %v2548_v21 = vmul.f32 0.1, %v2332_v50 }
 0x379   :  { %2833 = vadd.xlane.f32.xlu1 %v2767_v5  ;;  %v2312_v16 = vpop.f32.mrf.mxu0  ;;  %v2765_v17 = vmul.f32 %v4181_v56, %v2697_v8  ;;  %v2603_v23 = vmax.f32 %v2297_v60, %v2539_v49  ;;  %v2547_v26 = vmul.f32 0.1, %v2329_v6  ;;  %v2321_v9 = vadd.f32 %v3387_v63, %v4167_v15 }
 0x37a   :  { %v2666_v19 = vpack.c.bf16 %v2606_v13, %v2605_v12  ;;  %v2604_v20 = vmax.f32 %v2300_v48, %v2540_v14  ;;  %v2670_v24 = vpack.c.bf16 %v2614_v7, %v2613_v46  ;;  %v2766_v29 = vmul.f32 %v4181_v56, %v2698_v18 }
 0x37b   :  { %2829 = vadd.xlane.f32.xlu0 %v2765_v17  ;;  %v3388_v25 = vpop.f32.mrf.mxu0  ;;  %v2612_v32 = vmax.f32 %v2332_v50, %v2548_v21  ;;  %v2611_v40 = vmax.f32 %v2329_v6, %v2547_v26  ;;  %v2545_v41 = vmul.f32 0.1, %v2321_v9  ;;  %v2313_v42 = vadd.f32 %v4167_v15, %v2312_v16 }
 0x37c   :  { %v2324_v27 = vadd.f32 %v3388_v25, %v4167_v15  ;;  %v2704_v30 = vunpack.c.h.bf16 %v2666_v19  ;;  %v2703_v36 = vunpack.c.l.bf16 %v2666_v19  ;;  %v2665_v31 = vpack.c.bf16 %v2604_v20, %v2603_v23 }
 0x37d   :  { %2835 = vadd.xlane.f32.xlu1 %v2768_v22  ;;  %v2315_v28 = vpop.f32.mrf.mxu0  ;;  %v2712_v39 = vunpack.c.h.bf16 %v2670_v24  ;;  %v2711_v44 = vunpack.c.l.bf16 %v2670_v24  ;;  %v2669_v54 = vpack.c.bf16 %v2612_v32, %v2611_v40  ;;  %v16_v51 = vstv %s4639_s10 }
 0x37e   :  { %v2546_v11 = vmul.f32 0.1, %v2324_v27  ;;  %v2316_v37 = vadd.f32 %v4167_v15, %v2315_v28  ;;  %v2772_v38 = vmul.f32 %v4181_v56, %v2704_v30  ;;  %v2771_v43 = vmul.f32 %v4181_v56, %v2703_v36  ;;  %17 = vst [vmem:[#allocation2] sm:$0x1] %v16_v51 }
 0x37f   :  { %v3395_v35 = vpop.f32.mrf.mxu1  ;;  %2831 = vadd.xlane.f32.xlu0 %v2766_v29  ;;  %v2702_v47 = vunpack.c.h.bf16 %v2665_v31  ;;  %v2780_v59 = vmul.f32 %v4181_v56, %v2712_v39  ;;  %v2609_v60 = vmax.f32 %v2321_v9, %v2545_v41  ;;  %v2543_v33 = vmul.f32 0.1, %v2313_v42 }
 0x380   :  { %v2610_v52 = vmax.f32 %v2324_v27, %v2546_v11  ;;  %v2544_v55 = vmul.f32 0.1, %v2316_v37  ;;  %v2353_v53 = vadd.f32 %v3395_v35, %v4167_v15  ;;  %v2779_v58 = vmul.f32 %v4181_v56, %v2711_v44 }
 0x381   :  { %v2344_v34 = vpop.f32.mrf.mxu1  ;;  %2843 = vadd.xlane.f32.xlu1 %v2772_v38  ;;  %v2701_v61 = vunpack.c.l.bf16 %v2665_v31  ;;  %v2770_v0 = vmul.f32 %v4181_v56, %v2702_v47  ;;  %v2710_v48 = vunpack.c.h.bf16 %v2669_v54  ;;  %v2607_v5 = vmax.f32 %v2313_v42, %v2543_v33 }
 0x382   :  { %v2668_v2 = vpack.c.bf16 %v2610_v52, %v2609_v60  ;;  %v2608_v3 = vmax.f32 %v2316_v37, %v2544_v55  ;;  %v2553_v50 = vmul.f32 0.1, %v2353_v53  ;;  %v2345_v6 = vadd.f32 %v4167_v15, %v2344_v34 }
 0x383   :  { %v3396_v45 = vpop.f32.mrf.mxu1  ;;  %2841 = vadd.xlane.f32.xlu0 %v2771_v43  ;;  %v2769_v7 = vmul.f32 %v4181_v56, %v2701_v61  ;;  %v2709_v63 = vunpack.c.l.bf16 %v2669_v54  ;;  %v2778_v49 = vmul.f32 %v4181_v56, %v2710_v48 }
 0x384   :  { %v2356_v57 = vadd.f32 %v3396_v45, %v4167_v15  ;;  %v2667_v10 = vpack.c.bf16 %v2608_v3, %v2607_v5  ;;  %v2708_v13 = vunpack.c.h.bf16 %v2668_v2  ;;  %v2617_v14 = vmax.f32 %v2353_v53, %v2553_v50 }
 0x385   :  { %v2347_v1 = vpop.f32.mrf.mxu1  ;;  %2859 = vadd.xlane.f32.xlu1 %v2780_v59  ;;  %v2551_v46 = vmul.f32 0.1, %v2345_v6  ;;  %v2777_v16 = vmul.f32 %v4181_v56, %v2709_v63  ;;  %v2707_v17 = vunpack.c.l.bf16 %v2668_v2 }
 0x386   :  { %v2554_v62 = vmul.f32 0.1, %v2356_v57  ;;  %v2348_v4 = vadd.f32 %v4167_v15, %v2347_v1  ;;  %v2776_v22 = vmul.f32 %v4181_v56, %v2708_v13  ;;  %v2706_v24 = vunpack.c.h.bf16 %v2667_v10 }
 0x387   :  { %2857 = vadd.xlane.f32.xlu0 %v2779_v58  ;;  %v2615_v23 = vmax.f32 %v2345_v6, %v2551_v46  ;;  %v2775_v27 = vmul.f32 %v4181_v56, %v2707_v17  ;;  %v2705_v9 = vunpack.c.l.bf16 %v2667_v10 }
 0x388   :  { %v2618_v8 = vmax.f32 %v2356_v57, %v2554_v62  ;;  %v2552_v12 = vmul.f32 0.1, %v2348_v4  ;;  %v2774_v32 = vmul.f32 %v4181_v56, %v2706_v24 }
 0x389   :  { %2839 = vadd.xlane.f32.xlu1 %v2770_v0  ;;  %v2773_v40 = vmul.f32 %v4181_v56, %v2705_v9 }
 0x38a   :  { %v2672_v18 = vpack.c.bf16 %v2618_v8, %v2617_v14  ;;  %v2616_v20 = vmax.f32 %v2348_v4, %v2552_v12 }
 0x38b   :  { %2837 = vadd.xlane.f32.xlu0 %v2769_v7 }
 0x38c   :  { %v2716_v29 = vunpack.c.h.bf16 %v2672_v18  ;;  %v2671_v30 = vpack.c.bf16 %v2616_v20, %v2615_v23  ;;  %v2715_v11 = vunpack.c.l.bf16 %v2672_v18 }
 0x38d   :  { %2855 = vadd.xlane.f32.xlu1 %v2778_v49 }
 0x38e   :  { %v2784_v34 = vmul.f32 %v4181_v56, %v2716_v29  ;;  %v2714_v44 = vunpack.c.h.bf16 %v2671_v30  ;;  %v2783_v54 = vmul.f32 %v4181_v56, %v2715_v11  ;;  %v2713_v52 = vunpack.c.l.bf16 %v2671_v30 }
 0x38f   :  { %v3399_v19 = vpop.f32.mrf.mxu1  ;;  %2853 = vadd.xlane.f32.xlu0 %v2777_v16 }
 0x390   :  { %v2369_v21 = vadd.f32 %v3399_v19, %v4167_v15  ;;  %v2782_v57 = vmul.f32 %v4181_v56, %v2714_v44  ;;  %v2781_v53 = vmul.f32 %v4181_v56, %v2713_v52 }
 0x391   :  { %v2360_v25 = vpop.f32.mrf.mxu1  ;;  %2851 = vadd.xlane.f32.xlu1 %v2776_v22 }
 0x392   :  { %v2361_v26 = vadd.f32 %v4167_v15, %v2360_v25  ;;  %v2557_v36 = vmul.f32 0.1, %v2369_v21 }
 0x393   :  { %v3400_v28 = vpop.f32.mrf.mxu1  ;;  %2849 = vadd.xlane.f32.xlu0 %v2775_v27 }
 0x394   :  { %v2372_v31 = vadd.f32 %v3400_v28, %v4167_v15  ;;  %v2555_v37 = vmul.f32 0.1, %v2361_v26  ;;  %v2621_v41 = vmax.f32 %v2369_v21, %v2557_v36 }
 0x395   :  { %v2363_v35 = vpop.f32.mrf.mxu1  ;;  %2847 = vadd.xlane.f32.xlu1 %v2774_v32 }
 0x396   :  { %v2558_v38 = vmul.f32 0.1, %v2372_v31  ;;  %v2364_v39 = vadd.f32 %v4167_v15, %v2363_v35  ;;  %v2619_v45 = vmax.f32 %v2361_v26, %v2555_v37 }
 0x397   :  { %2845 = vadd.xlane.f32.xlu0 %v2773_v40 }
 0x398   :  { %v2622_v42 = vmax.f32 %v2372_v31, %v2558_v38  ;;  %v2556_v43 = vmul.f32 0.1, %v2364_v39 }
 0x399   :  { %2867 = vadd.xlane.f32.xlu1 %v2784_v34 }
 0x39a   :  { %v2674_v47 = vpack.c.bf16 %v2622_v42, %v2621_v41  ;;  %v2620_v51 = vmax.f32 %v2364_v39, %v2556_v43 }
 0x39b   :  { %2865 = vadd.xlane.f32.xlu0 %v2783_v54 }
 0x39c   :  { %v2673_v55 = vpack.c.bf16 %v2620_v51, %v2619_v45  ;;  %v2720_v59 = vunpack.c.h.bf16 %v2674_v47  ;;  %v2719_v60 = vunpack.c.l.bf16 %v2674_v47 }
 0x39d   :  { %2863 = vadd.xlane.f32.xlu1 %v2782_v57 }
 0x39e   :  { %v2788_v1 = vmul.f32 %v4181_v56, %v2720_v59  ;;  %v2718_v61 = vunpack.c.h.bf16 %v2673_v55  ;;  %v2787_v2 = vmul.f32 %v4181_v56, %v2719_v60  ;;  %v2717_v3 = vunpack.c.l.bf16 %v2673_v55 }
 0x39f   :  { %v3403_v33 = vpop.f32.mrf.mxu1  ;;  %2861 = vadd.xlane.f32.xlu0 %v2781_v53 }
 0x3a0   :  { %v2385_v58 = vadd.f32 %v3403_v33, %v4167_v15  ;;  %v2786_v5 = vmul.f32 %v4181_v56, %v2718_v61  ;;  %v2785_v10 = vmul.f32 %v4181_v56, %v2717_v3 }
 0x3a1   :  { %v2376_v62 = vpop.f32.mrf.mxu1  ;;  %2875 = vadd.xlane.f32.xlu1 %v2788_v1 }
 0x3a2   :  { %v2377_v0 = vadd.f32 %v4167_v15, %v2376_v62  ;;  %v2561_v48 = vmul.f32 0.1, %v2385_v58 }
 0x3a3   :  { %v3404_v4 = vpop.f32.mrf.mxu1  ;;  %2873 = vadd.xlane.f32.xlu0 %v2787_v2 }
 0x3a4   :  { %v2388_v50 = vadd.f32 %v3404_v4, %v4167_v15  ;;  %v2559_v7 = vmul.f32 0.1, %v2377_v0  ;;  %v2625_v12 = vmax.f32 %v2385_v58, %v2561_v48 }
 0x3a5   :  { %v2379_v6 = vpop.f32.mrf.mxu1  ;;  %2871 = vadd.xlane.f32.xlu1 %v2786_v5 }
 0x3a6   :  { %v2562_v63 = vmul.f32 0.1, %v2388_v50  ;;  %v2380_v8 = vadd.f32 %v4167_v15, %v2379_v6  ;;  %v2623_v14 = vmax.f32 %v2377_v0, %v2559_v7 }
 0x3a7   :  { %2869 = vadd.xlane.f32.xlu0 %v2785_v10 }
 0x3a8   :  { %v2626_v49 = vmax.f32 %v2388_v50, %v2562_v63  ;;  %v2560_v13 = vmul.f32 0.1, %v2380_v8 }
 0x3aa   :  { %v2676_v46 = vpack.c.bf16 %v2626_v49, %v2625_v12  ;;  %v2624_v16 = vmax.f32 %v2380_v8, %v2560_v13 }
 0x3ac   :  { %v2675_v17 = vpack.c.bf16 %v2624_v16, %v2623_v14  ;;  %v2724_v18 = vunpack.c.h.bf16 %v2676_v46  ;;  %v2723_v19 = vunpack.c.l.bf16 %v2676_v46 }
 0x3ae   :  { %v2792_v20 = vmul.f32 %v4181_v56, %v2724_v18  ;;  %v2791_v21 = vmul.f32 %v4181_v56, %v2723_v19  ;;  %v2722_v22 = vunpack.c.h.bf16 %v2675_v17  ;;  %v2721_v24 = vunpack.c.l.bf16 %v2675_v17 }
 0x3af   :  { %v3407_v25 = vpop.f32.mrf.mxu1 }
 0x3b0   :  { %v2401_v23 = vadd.f32 %v3407_v25, %v4167_v15  ;;  %2883 = vadd.xlane.f32.xlu1 %v2792_v20  ;;  %2881 = vadd.xlane.f32.xlu0 %v2791_v21  ;;  %v2790_v9 = vmul.f32 %v4181_v56, %v2722_v22  ;;  %v2789_v28 = vmul.f32 %v4181_v56, %v2721_v24 }
 0x3b1   :  { %v2392_v26 = vpop.f32.mrf.mxu1 }
 0x3b2   :  { %v2393_v27 = vadd.f32 %v4167_v15, %v2392_v26  ;;  %v2565_v30 = vmul.f32 0.1, %v2401_v23 }
 0x3b3   :  { %v3408_v29 = vpop.f32.mrf.mxu1 }
 0x3b4   :  { %v2404_v36 = vadd.f32 %v3408_v29, %v4167_v15  ;;  %2879 = vadd.xlane.f32.xlu1 %v2790_v9  ;;  %2877 = vadd.xlane.f32.xlu0 %v2789_v28  ;;  %v2563_v32 = vmul.f32 0.1, %v2393_v27  ;;  %v2629_v37 = vmax.f32 %v2401_v23, %v2565_v30 }
 0x3b5   :  { %v2395_v31 = vpop.f32.mrf.mxu1 }
 0x3b6   :  { %v2566_v35 = vmul.f32 0.1, %v2404_v36  ;;  %v2396_v11 = vadd.f32 %v4167_v15, %v2395_v31  ;;  %v2627_v40 = vmax.f32 %v2393_v27, %v2563_v32 }
 0x3b8   :  { %v2630_v38 = vmax.f32 %v2404_v36, %v2566_v35  ;;  %v2564_v39 = vmul.f32 0.1, %v2396_v11 }
 0x3ba   :  { %v2678_v34 = vpack.c.bf16 %v2630_v38, %v2629_v37  ;;  %v2628_v41 = vmax.f32 %v2396_v11, %v2564_v39 }
 0x3bc   :  { %v2677_v42 = vpack.c.bf16 %v2628_v41, %v2627_v40  ;;  %v2728_v43 = vunpack.c.h.bf16 %v2678_v34  ;;  %v2727_v44 = vunpack.c.l.bf16 %v2678_v34 }
 0x3be   :  { %v2796_v54 = vmul.f32 %v4181_v56, %v2728_v43  ;;  %v2795_v45 = vmul.f32 %v4181_v56, %v2727_v44  ;;  %v2726_v47 = vunpack.c.h.bf16 %v2677_v42  ;;  %v2725_v51 = vunpack.c.l.bf16 %v2677_v42 }
 0x3bf   :  { %v3411_v52 = vpop.f32.mrf.mxu1 }
 0x3c0   :  { %v2417_v55 = vadd.f32 %v3411_v52, %v4167_v15  ;;  %2891 = vadd.xlane.f32.xlu1 %v2796_v54  ;;  %2889 = vadd.xlane.f32.xlu0 %v2795_v45  ;;  %v2794_v53 = vmul.f32 %v4181_v56, %v2726_v47  ;;  %v2793_v1 = vmul.f32 %v4181_v56, %v2725_v51 }
 0x3c1   :  { %v2408_v57 = vpop.f32.mrf.mxu1 }
 0x3c2   :  { %v2409_v59 = vadd.f32 %v4167_v15, %v2408_v57  ;;  %v2569_v33 = vmul.f32 0.1, %v2417_v55 }
 0x3c3   :  { %v3412_v60 = vpop.f32.mrf.mxu1 }
 0x3c4   :  { %v2420_v58 = vadd.f32 %v3412_v60, %v4167_v15  ;;  %2887 = vadd.xlane.f32.xlu1 %v2794_v53  ;;  %2885 = vadd.xlane.f32.xlu0 %v2793_v1  ;;  %v2567_v62 = vmul.f32 0.1, %v2409_v59  ;;  %v2633_v3 = vmax.f32 %v2417_v55, %v2569_v33 }
 0x3c5   :  { %v2411_v61 = vpop.f32.mrf.mxu1 }
 0x3c6   :  { %v2570_v0 = vmul.f32 0.1, %v2420_v58  ;;  %v2412_v2 = vadd.f32 %v4167_v15, %v2411_v61  ;;  %v2631_v50 = vmax.f32 %v2409_v59, %v2567_v62 }
 0x3c8   :  { %v2634_v4 = vmax.f32 %v2420_v58, %v2570_v0  ;;  %v2568_v48 = vmul.f32 0.1, %v2412_v2 }
 0x3ca   :  { %v2680_v5 = vpack.c.bf16 %v2634_v4, %v2633_v3  ;;  %v2632_v6 = vmax.f32 %v2412_v2, %v2568_v48 }
 0x3cc   :  { %v2679_v7 = vpack.c.bf16 %v2632_v6, %v2631_v50  ;;  %v2732_v63 = vunpack.c.h.bf16 %v2680_v5  ;;  %v2731_v8 = vunpack.c.l.bf16 %v2680_v5 }
 0x3ce   :  { %v2800_v10 = vmul.f32 %v4181_v56, %v2732_v63  ;;  %v2799_v12 = vmul.f32 %v4181_v56, %v2731_v8  ;;  %v2730_v49 = vunpack.c.h.bf16 %v2679_v7  ;;  %v2729_v13 = vunpack.c.l.bf16 %v2679_v7 }
 0x3cf   :  { %v3415_v14 = vpop.f32.mrf.mxu1 }
 0x3d0   :  { %v2433_v46 = vadd.f32 %v3415_v14, %v4167_v15  ;;  %2899 = vadd.xlane.f32.xlu1 %v2800_v10  ;;  %2897 = vadd.xlane.f32.xlu0 %v2799_v12  ;;  %v2798_v18 = vmul.f32 %v4181_v56, %v2730_v49  ;;  %v2797_v19 = vmul.f32 %v4181_v56, %v2729_v13 }
 0x3d1   :  { %v2424_v16 = vpop.f32.mrf.mxu1 }
 0x3d2   :  { %v2425_v17 = vadd.f32 %v4167_v15, %v2424_v16  ;;  %v2573_v21 = vmul.f32 0.1, %v2433_v46 }
 0x3d3   :  { %v3416_v20 = vpop.f32.mrf.mxu1 }
 0x3d4   :  { %v2436_v22 = vadd.f32 %v3416_v20, %v4167_v15  ;;  %2895 = vadd.xlane.f32.xlu1 %v2798_v18  ;;  %2893 = vadd.xlane.f32.xlu0 %v2797_v19  ;;  %v2571_v25 = vmul.f32 0.1, %v2425_v17  ;;  %v2637_v27 = vmax.f32 %v2433_v46, %v2573_v21 }
 0x3d5   :  { %v2427_v24 = vpop.f32.mrf.mxu1 }
 0x3d6   :  { %v2574_v23 = vmul.f32 0.1, %v2436_v22  ;;  %v2428_v26 = vadd.f32 %v4167_v15, %v2427_v24  ;;  %v2635_v29 = vmax.f32 %v2425_v17, %v2571_v25 }
 0x3d8   :  { %v2638_v9 = vmax.f32 %v2436_v22, %v2574_v23  ;;  %v2572_v28 = vmul.f32 0.1, %v2428_v26 }
 0x3da   :  { %v2682_v30 = vpack.c.bf16 %v2638_v9, %v2637_v27  ;;  %v2636_v36 = vmax.f32 %v2428_v26, %v2572_v28 }
 0x3dc   :  { %v2681_v31 = vpack.c.bf16 %v2636_v36, %v2635_v29  ;;  %v2736_v32 = vunpack.c.h.bf16 %v2682_v30  ;;  %v2735_v35 = vunpack.c.l.bf16 %v2682_v30  ;;  %v4274_v30 = vld [vmem:[#allocation2] ss:$0 sm:$0xff] }
 0x3de   :  { %v2804_v11 = vmul.f32 %v4181_v56, %v2736_v32  ;;  %v2803_v37 = vmul.f32 %v4181_v56, %v2735_v35  ;;  %v2734_v38 = vunpack.c.h.bf16 %v2681_v31  ;;  %v2733_v39 = vunpack.c.l.bf16 %v2681_v31 }
 0x3df   :  { %v3419_v40 = vpop.f32.mrf.mxu1 }
 0x3e0   :  { %v2449_v34 = vadd.f32 %v3419_v40, %v4167_v15  ;;  %2907 = vadd.xlane.f32.xlu1 %v2804_v11  ;;  %2905 = vadd.xlane.f32.xlu0 %v2803_v37  ;;  %v2802_v43 = vmul.f32 %v4181_v56, %v2734_v38  ;;  %v2801_v44 = vmul.f32 %v4181_v56, %v2733_v39 }
 0x3e1   :  { %v2440_v41 = vpop.f32.mrf.mxu1 }
 0x3e2   :  { %v2441_v42 = vadd.f32 %v4167_v15, %v2440_v41  ;;  %v2577_v45 = vmul.f32 0.1, %v2449_v34 }
 0x3e3   :  { %v3420_v54 = vpop.f32.mrf.mxu1 }
 0x3e4   :  { %v2452_v47 = vadd.f32 %v3420_v54, %v4167_v15  ;;  %2903 = vadd.xlane.f32.xlu1 %v2802_v43  ;;  %2901 = vadd.xlane.f32.xlu0 %v2801_v44  ;;  %v2575_v52 = vmul.f32 0.1, %v2441_v42  ;;  %v2641_v59 = vmax.f32 %v2449_v34, %v2577_v45 }
 0x3e5   :  { %v2443_v51 = vpop.f32.mrf.mxu1 }
 0x3e6   :  { %v2578_v55 = vmul.f32 0.1, %v2452_v47  ;;  %v2444_v57 = vadd.f32 %v4167_v15, %v2443_v51  ;;  %v2639_v60 = vmax.f32 %v2441_v42, %v2575_v52 }
 0x3e8   :  { %v2642_v53 = vmax.f32 %v2452_v47, %v2578_v55  ;;  %v2576_v1 = vmul.f32 0.1, %v2444_v57 }
 0x3ea   :  { %v2684_v33 = vpack.c.bf16 %v2642_v53, %v2641_v59  ;;  %v2640_v58 = vmax.f32 %v2444_v57, %v2576_v1 }
 0x3ec   :  { %v2683_v61 = vpack.c.bf16 %v2640_v58, %v2639_v60  ;;  %v2740_v62 = vunpack.c.h.bf16 %v2684_v33  ;;  %v2739_v0 = vunpack.c.l.bf16 %v2684_v33 }
 0x3ee   :  { %v2808_v2 = vmul.f32 %v4181_v56, %v2740_v62  ;;  %v2807_v3 = vmul.f32 %v4181_v56, %v2739_v0  ;;  %v2738_v4 = vunpack.c.h.bf16 %v2683_v61  ;;  %v2737_v48 = vunpack.c.l.bf16 %v2683_v61 }
 0x3ef   :  { %v3423_v50 = vpop.f32.mrf.mxu1 }
 0x3f0   :  { %v2465_v5 = vadd.f32 %v3423_v50, %v4167_v15  ;;  %2915 = vadd.xlane.f32.xlu1 %v2808_v2  ;;  %2913 = vadd.xlane.f32.xlu0 %v2807_v3  ;;  %v2806_v63 = vmul.f32 %v4181_v56, %v2738_v4  ;;  %v2805_v8 = vmul.f32 %v4181_v56, %v2737_v48 }
 0x3f1   :  { %v2456_v6 = vpop.f32.mrf.mxu1 }
 0x3f2   :  { %v2457_v7 = vadd.f32 %v4167_v15, %v2456_v6  ;;  %v2581_v12 = vmul.f32 0.1, %v2465_v5 }
 0x3f3   :  { %v3424_v10 = vpop.f32.mrf.mxu1 }
 0x3f4   :  { %v2468_v49 = vadd.f32 %v3424_v10, %v4167_v15  ;;  %2911 = vadd.xlane.f32.xlu1 %v2806_v63  ;;  %2909 = vadd.xlane.f32.xlu0 %v2805_v8  ;;  %v2579_v14 = vmul.f32 0.1, %v2457_v7  ;;  %v2645_v17 = vmax.f32 %v2465_v5, %v2581_v12 }
 0x3f5   :  { %v2459_v13 = vpop.f32.mrf.mxu1 }
 0x3f6   :  { %v2582_v46 = vmul.f32 0.1, %v2468_v49  ;;  %v2460_v16 = vadd.f32 %v4167_v15, %v2459_v13  ;;  %v2643_v20 = vmax.f32 %v2457_v7, %v2579_v14 }
 0x3f8   :  { %v2646_v18 = vmax.f32 %v2468_v49, %v2582_v46  ;;  %v2580_v19 = vmul.f32 0.1, %v2460_v16 }
 0x3fa   :  { %v2686_v21 = vpack.c.bf16 %v2646_v18, %v2645_v17  ;;  %v2644_v22 = vmax.f32 %v2460_v16, %v2580_v19 }
 0x3fc   :  { %v2685_v24 = vpack.c.bf16 %v2644_v22, %v2643_v20  ;;  %v2744_v25 = vunpack.c.h.bf16 %v2686_v21  ;;  %v2743_v23 = vunpack.c.l.bf16 %v2686_v21 }
 0x3fe   :  { %v2812_v26 = vmul.f32 %v4181_v56, %v2744_v25  ;;  %v2811_v27 = vmul.f32 %v4181_v56, %v2743_v23  ;;  %v2742_v9 = vunpack.c.h.bf16 %v2685_v24  ;;  %v2741_v28 = vunpack.c.l.bf16 %v2685_v24 }
 0x3ff   :  { %v3427_v29 = vpop.f32.mrf.mxu1 }
 0x400   :  { %2923 = vadd.xlane.f32.xlu1 %v2812_v26  ;;  %2921 = vadd.xlane.f32.xlu0 %v2811_v27  ;;  %v2481_v36 = vadd.f32 %v3427_v29, %v4167_v15  ;;  %v2810_v35 = vmul.f32 %v4181_v56, %v2742_v9  ;;  %v2809_v11 = vmul.f32 %v4181_v56, %v2741_v28 }
 0x401   :  { %v2472_v31 = vpop.f32.mrf.mxu1 }
 0x402   :  { %v2834_v32 = vpop.xlane.xlu1 %2833  ;;  %v2473_v37 = vadd.f32 %v4167_v15, %v2472_v31  ;;  %v2585_v40 = vmul.f32 0.1, %v2481_v36 }
 0x403   :  { %v2966_v38 = vadd.f32 %v4274_v30, %v2834_v32  ;;  %v3428_v39 = vpop.f32.mrf.mxu1 }
 0x404   :  { %2919 = vadd.xlane.f32.xlu1 %v2810_v35  ;;  %2917 = vadd.xlane.f32.xlu0 %v2809_v11  ;;  %v2484_v34 = vadd.f32 %v3428_v39, %v4167_v15  ;;  %v2830_v41 = vpop.xlane.xlu0 %2829  ;;  %v2583_v54 = vmul.f32 0.1, %v2473_v37  ;;  %v2649_v52 = vmax.f32 %v2481_v36, %v2585_v40 }
 0x405   :  { %3031 = vst.msk [vmem:[%s4640_s11 + $0x10] sm:$0xff] %vm3028_vm1, %v2966_v38  ;;  %v2964_v42 = vadd.f32 %v4274_v30, %v2830_v41  ;;  %v2475_v43 = vpop.f32.mrf.mxu1 }
 0x406   :  { %v2836_v44 = vpop.xlane.xlu1 %2835  ;;  %v2586_v45 = vmul.f32 0.1, %v2484_v34  ;;  %v2476_v47 = vadd.f32 %v4167_v15, %v2475_v43  ;;  %v2647_v1 = vmax.f32 %v2473_v37, %v2583_v54 }
 0x407   :  { %v2967_v51 = vadd.f32 %v4274_v30, %v2836_v44  ;;  %3029 = vst.msk [vmem:[%s4640_s11] sm:$0xff] %vm3028_vm1, %v2964_v42 }
 0x408   :  { %v2650_v55 = vmax.f32 %v2484_v34, %v2586_v45  ;;  %v2584_v57 = vmul.f32 0.1, %v2476_v47  ;;  %v2832_v59 = vpop.xlane.xlu0 %2831 }
 0x409   :  { %3032 = vst.msk [vmem:[%s4640_s11 + $0x18] sm:$0xff] %vm3028_vm1, %v2967_v51  ;;  %v2965_v53 = vadd.f32 %v4274_v30, %v2832_v59 }
 0x40a   :  { %v2688_v60 = vpack.c.bf16 %v2650_v55, %v2649_v52  ;;  %v2648_v33 = vmax.f32 %v2476_v47, %v2584_v57  ;;  %v2844_v58 = vpop.xlane.xlu1 %2843 }
 0x40b   :  { %3030 = vst.msk [vmem:[%s4640_s11 + $0x8] sm:$0xff] %vm3028_vm1, %v2965_v53  ;;  %v2971_v61 = vadd.f32 %v4274_v30, %v2844_v58 }
 0x40c   :  { %v2687_v62 = vpack.c.bf16 %v2648_v33, %v2647_v1  ;;  %v2842_v0 = vpop.xlane.xlu0 %2841  ;;  %v2748_v2 = vunpack.c.h.bf16 %v2688_v60  ;;  %v2747_v3 = vunpack.c.l.bf16 %v2688_v60 }
 0x40d   :  { %3036 = vst.msk [vmem:[%s4640_s11 + $0x38] sm:$0xff] %vm3028_vm1, %v2971_v61  ;;  %v2970_v4 = vadd.f32 %v4274_v30, %v2842_v0 }
 0x40e   :  { %v2860_v48 = vpop.xlane.xlu1 %2859  ;;  %v2816_v50 = vmul.f32 %v4181_v56, %v2748_v2  ;;  %v2815_v5 = vmul.f32 %v4181_v56, %v2747_v3  ;;  %v2746_v6 = vunpack.c.h.bf16 %v2687_v62  ;;  %v2745_v7 = vunpack.c.l.bf16 %v2687_v62 }
 0x40f   :  { %3035 = vst.msk [vmem:[%s4640_s11 + $0x30] sm:$0xff] %vm3028_vm1, %v2970_v4  ;;  %v2979_v63 = vadd.f32 %v4274_v30, %v2860_v48  ;;  %v3431_v8 = vpop.f32.mrf.mxu1 }
 0x410   :  { %v2497_v10 = vadd.f32 %v3431_v8, %v4167_v15  ;;  %v2858_v12 = vpop.xlane.xlu0 %2857  ;;  %2931 = vadd.xlane.f32.xlu1 %v2816_v50  ;;  %2929 = vadd.xlane.f32.xlu0 %v2815_v5  ;;  %v2814_v16 = vmul.f32 %v4181_v56, %v2746_v6  ;;  %v2813_v17 = vmul.f32 %v4181_v56, %v2745_v7 }
 0x411   :  { %3044 = vst.msk [vmem:[%s4640_s11 + $0x78] sm:$0xff] %vm3028_vm1, %v2979_v63  ;;  %v2978_v49 = vadd.f32 %v4274_v30, %v2858_v12  ;;  %v2488_v13 = vpop.f32.mrf.mxu1 }
 0x412   :  { %v2489_v14 = vadd.f32 %v4167_v15, %v2488_v13  ;;  %v2840_v46 = vpop.xlane.xlu1 %2839  ;;  %v2589_v20 = vmul.f32 0.1, %v2497_v10 }
 0x413   :  { %3043 = vst.msk [vmem:[%s4640_s11 + $0x70] sm:$0xff] %vm3028_vm1, %v2978_v49  ;;  %v2969_v18 = vadd.f32 %v4274_v30, %v2840_v46  ;;  %v3432_v19 = vpop.f32.mrf.mxu1 }
 0x414   :  { %v2500_v21 = vadd.f32 %v3432_v19, %v4167_v15  ;;  %v2838_v22 = vpop.xlane.xlu0 %2837  ;;  %2927 = vadd.xlane.f32.xlu1 %v2814_v16  ;;  %2925 = vadd.xlane.f32.xlu0 %v2813_v17  ;;  %v2587_v23 = vmul.f32 0.1, %v2489_v14  ;;  %v2653_v29 = vmax.f32 %v2497_v10, %v2589_v20 }
 0x415   :  { %3034 = vst.msk [vmem:[%s4640_s11 + $0x28] sm:$0xff] %vm3028_vm1, %v2969_v18  ;;  %v2968_v24 = vadd.f32 %v4274_v30, %v2838_v22  ;;  %v2491_v25 = vpop.f32.mrf.mxu1 }
 0x416   :  { %v2590_v26 = vmul.f32 0.1, %v2500_v21  ;;  %v2492_v27 = vadd.f32 %v4167_v15, %v2491_v25  ;;  %v2856_v9 = vpop.xlane.xlu1 %2855  ;;  %v2651_v11 = vmax.f32 %v2489_v14, %v2587_v23 }
 0x417   :  { %3033 = vst.msk [vmem:[%s4640_s11 + $0x20] sm:$0xff] %vm3028_vm1, %v2968_v24  ;;  %v2977_v28 = vadd.f32 %v4274_v30, %v2856_v9 }
 0x418   :  { %v2654_v36 = vmax.f32 %v2500_v21, %v2590_v26  ;;  %v2588_v31 = vmul.f32 0.1, %v2492_v27  ;;  %v2854_v32 = vpop.xlane.xlu0 %2853 }
 0x419   :  { %3042 = vst.msk [vmem:[%s4640_s11 + $0x68] sm:$0xff] %vm3028_vm1, %v2977_v28  ;;  %v2976_v35 = vadd.f32 %v4274_v30, %v2854_v32 }
 0x41a   :  { %v2690_v37 = vpack.c.bf16 %v2654_v36, %v2653_v29  ;;  %v2652_v38 = vmax.f32 %v2492_v27, %v2588_v31  ;;  %v2852_v39 = vpop.xlane.xlu1 %2851 }
 0x41b   :  { %3041 = vst.msk [vmem:[%s4640_s11 + $0x60] sm:$0xff] %vm3028_vm1, %v2976_v35  ;;  %v2975_v40 = vadd.f32 %v4274_v30, %v2852_v39 }
 0x41c   :  { %v2689_v34 = vpack.c.bf16 %v2652_v38, %v2651_v11  ;;  %v2850_v41 = vpop.xlane.xlu0 %2849  ;;  %v2752_v42 = vunpack.c.h.bf16 %v2690_v37  ;;  %v2751_v43 = vunpack.c.l.bf16 %v2690_v37  ;;  %v3529_v11 = vld [vmem:[%s4637_s8] ss:$0 sm:$0xff] }
 0x41d   :  { %3040 = vst.msk [vmem:[%s4640_s11 + $0x58] sm:$0xff] %vm3028_vm1, %v2975_v40  ;;  %v2974_v44 = vadd.f32 %v4274_v30, %v2850_v41 }
 0x41e   :  { %v2848_v54 = vpop.xlane.xlu1 %2847  ;;  %v2820_v45 = vmul.f32 %v4181_v56, %v2752_v42  ;;  %v2819_v47 = vmul.f32 %v4181_v56, %v2751_v43  ;;  %v2750_v51 = vunpack.c.h.bf16 %v2689_v34  ;;  %v2749_v52 = vunpack.c.l.bf16 %v2689_v34 }
 0x41f   :  { %3039 = vst.msk [vmem:[%s4640_s11 + $0x50] sm:$0xff] %vm3028_vm1, %v2974_v44  ;;  %v2973_v55 = vadd.f32 %v4274_v30, %v2848_v54  ;;  %v3435_v57 = vpop.f32.mrf.mxu1 }
 0x420   :  { %v2513_v59 = vadd.f32 %v3435_v57, %v4167_v15  ;;  %v2846_v53 = vpop.xlane.xlu0 %2845  ;;  %2939 = vadd.xlane.f32.xlu1 %v2820_v45  ;;  %2937 = vadd.xlane.f32.xlu0 %v2819_v47  ;;  %v2818_v61 = vmul.f32 %v4181_v56, %v2750_v51  ;;  %v2817_v62 = vmul.f32 %v4181_v56, %v2749_v52 }
 0x421   :  { %3038 = vst.msk [vmem:[%s4640_s11 + $0x48] sm:$0xff] %vm3028_vm1, %v2973_v55  ;;  %v2972_v1 = vadd.f32 %v4274_v30, %v2846_v53  ;;  %v2504_v60 = vpop.f32.mrf.mxu1 }
 0x422   :  { %v2505_v33 = vadd.f32 %v4167_v15, %v2504_v60  ;;  %v2868_v58 = vpop.xlane.xlu1 %2867  ;;  %v2593_v3 = vmul.f32 0.1, %v2513_v59 }
 0x423   :  { %3037 = vst.msk [vmem:[%s4640_s11 + $0x40] sm:$0xff] %vm3028_vm1, %v2972_v1  ;;  %v2983_v0 = vadd.f32 %v4274_v30, %v2868_v58  ;;  %v3436_v2 = vpop.f32.mrf.mxu1 }
 0x424   :  { %v2516_v4 = vadd.f32 %v3436_v2, %v4167_v15  ;;  %v2866_v48 = vpop.xlane.xlu0 %2865  ;;  %2935 = vadd.xlane.f32.xlu1 %v2818_v61  ;;  %2933 = vadd.xlane.f32.xlu0 %v2817_v62  ;;  %v2591_v6 = vmul.f32 0.1, %v2505_v33  ;;  %v2657_v12 = vmax.f32 %v2513_v59, %v2593_v3 }
 0x425   :  { %3048 = vst.msk [vmem:[%s4640_s11 + $0x98] sm:$0xff] %vm3028_vm1, %v2983_v0  ;;  %v2982_v50 = vadd.f32 %v4274_v30, %v2866_v48  ;;  %v2507_v5 = vpop.f32.mrf.mxu1 }
 0x426   :  { %v2594_v7 = vmul.f32 0.1, %v2516_v4  ;;  %v2508_v63 = vadd.f32 %v4167_v15, %v2507_v5  ;;  %v2864_v8 = vpop.xlane.xlu1 %2863  ;;  %v2655_v15 = vmax.f32 %v2505_v33, %v2591_v6 }
 0x427   :  { %3047 = vst.msk [vmem:[%s4640_s11 + $0x90] sm:$0xff] %vm3028_vm1, %v2982_v50  ;;  %v2981_v10 = vadd.f32 %v4274_v30, %v2864_v8 }
 0x428   :  { %v2658_v49 = vmax.f32 %v2516_v4, %v2594_v7  ;;  %v2592_v13 = vmul.f32 0.1, %v2508_v63  ;;  %v2862_v14 = vpop.xlane.xlu0 %2861 }
 0x429   :  { %3046 = vst.msk [vmem:[%s4640_s11 + $0x88] sm:$0xff] %vm3028_vm1, %v2981_v10  ;;  %v2980_v46 = vadd.f32 %v4274_v30, %v2862_v14 }
 0x42a   :  { %v2692_v16 = vpack.c.bf16 %v2658_v49, %v2657_v12  ;;  %v2656_v17 = vmax.f32 %v2508_v63, %v2592_v13  ;;  %v2876_v18 = vpop.xlane.xlu1 %2875 }
 0x42b   :  { %3045 = vst.msk [vmem:[%s4640_s11 + $0x80] sm:$0xff] %vm3028_vm1, %v2980_v46  ;;  %v2987_v19 = vadd.f32 %v4274_v30, %v2876_v18 }
 0x42c   :  { %v2691_v20 = vpack.c.bf16 %v2656_v17, %v2655_v15  ;;  %v2874_v21 = vpop.xlane.xlu0 %2873  ;;  %v2756_v22 = vunpack.c.h.bf16 %v2692_v16  ;;  %v2755_v24 = vunpack.c.l.bf16 %v2692_v16 }
 0x42d   :  { %3052 = vst.msk [vmem:[%s4640_s11 + $0xb8] sm:$0xff] %vm3028_vm1, %v2987_v19  ;;  %v2986_v25 = vadd.f32 %v4274_v30, %v2874_v21 }
 0x42e   :  { %v2872_v23 = vpop.xlane.xlu1 %2871  ;;  %v2824_v26 = vmul.f32 %v4181_v56, %v2756_v22  ;;  %v2823_v27 = vmul.f32 %v4181_v56, %v2755_v24  ;;  %v2754_v9 = vunpack.c.h.bf16 %v2691_v20  ;;  %v2753_v28 = vunpack.c.l.bf16 %v2691_v20 }
 0x42f   :  { %3051 = vst.msk [vmem:[%s4640_s11 + $0xb0] sm:$0xff] %vm3028_vm1, %v2986_v25  ;;  %v2985_v29 = vadd.f32 %v4274_v30, %v2872_v23  ;;  %v3439_v36 = vpop.f32.mrf.mxu1 }
 0x430   :  { %v2870_v31 = vpop.xlane.xlu0 %2869  ;;  %2947 = vadd.xlane.f32.xlu1 %v2824_v26  ;;  %2945 = vadd.xlane.f32.xlu0 %v2823_v27  ;;  %v2529_v37 = vadd.f32 %v3529_v11, %v3439_v36  ;;  %v2822_v39 = vmul.f32 %v4181_v56, %v2754_v9  ;;  %v2821_v40 = vmul.f32 %v4181_v56, %v2753_v28 }
 0x431   :  { %3050 = vst.msk [vmem:[%s4640_s11 + $0xa8] sm:$0xff] %vm3028_vm1, %v2985_v29  ;;  %v2984_v32 = vadd.f32 %v4274_v30, %v2870_v31  ;;  %v2520_v35 = vpop.f32.mrf.mxu1 }
 0x432   :  { %v2521_v38 = vadd.f32 %v3529_v11, %v2520_v35  ;;  %v2597_v43 = vmul.f32 0.1, %v2529_v37 }
 0x433   :  { %3049 = vst.msk [vmem:[%s4640_s11 + $0xa0] sm:$0xff] %vm3028_vm1, %v2984_v32  ;;  %v3440_v34 = vpop.f32.mrf.mxu1 }
 0x434   :  { %v2532_v41 = vadd.f32 %v3529_v11, %v3440_v34  ;;  %2943 = vadd.xlane.f32.xlu1 %v2822_v39  ;;  %2941 = vadd.xlane.f32.xlu0 %v2821_v40  ;;  %v2595_v44 = vmul.f32 0.1, %v2521_v38  ;;  %v2661_v53 = vmax.f32 %v2529_v37, %v2597_v43 }
 0x435   :  { %v2523_v42 = vpop.f32.mrf.mxu1 }
 0x436   :  { %v2598_v54 = vmul.f32 0.1, %v2532_v41  ;;  %v2524_v45 = vadd.f32 %v3529_v11, %v2523_v42  ;;  %v2659_v1 = vmax.f32 %v2521_v38, %v2595_v44 }
 0x438   :  { %v2662_v47 = vmax.f32 %v2532_v41, %v2598_v54  ;;  %v2596_v51 = vmul.f32 0.1, %v2524_v45 }
 0x439   :  { %v2884_v52 = vpop.xlane.xlu1 %2883  ;;  %v2882_v55 = vpop.xlane.xlu0 %2881 }
 0x43a   :  { %v2991_v57 = vadd.f32 %v4274_v30, %v2884_v52  ;;  %v2990_v59 = vadd.f32 %v4274_v30, %v2882_v55  ;;  %v2660_v60 = vmax.f32 %v2524_v45, %v2596_v51  ;;  %v2694_v33 = vpack.c.bf16 %v2662_v47, %v2661_v53 }
 0x43c   :  { %3056 = vst.msk [vmem:[%s4640_s11 + $0xd8] sm:$0xff] %vm3028_vm1, %v2991_v57  ;;  %3055 = vst.msk [vmem:[%s4640_s11 + $0xd0] sm:$0xff] %vm3028_vm1, %v2990_v59  ;;  %v2693_v58 = vpack.c.bf16 %v2660_v60, %v2659_v1  ;;  %v2760_v5 = vunpack.c.h.bf16 %v2694_v33  ;;  %v2759_v6 = vunpack.c.l.bf16 %v2694_v33 }
 0x43d   :  { %v2880_v61 = vpop.xlane.xlu1 %2879  ;;  %v2878_v62 = vpop.xlane.xlu0 %2877 }
 0x43e   :  { %v2989_v0 = vadd.f32 %v4274_v30, %v2880_v61  ;;  %v2988_v2 = vadd.f32 %v4274_v30, %v2878_v62  ;;  %v2758_v3 = vunpack.c.h.bf16 %v2693_v58  ;;  %v2757_v4 = vunpack.c.l.bf16 %v2693_v58 }
 0x43f   :  { %v2828_v7 = vmul.f32 %v4181_v56, %v2760_v5  ;;  %v2827_v63 = vmul.f32 %v4181_v56, %v2759_v6 }
 0x440   :  { %3054 = vst.msk [vmem:[%s4640_s11 + $0xc8] sm:$0xff] %vm3028_vm1, %v2989_v0  ;;  %3053 = vst.msk [vmem:[%s4640_s11 + $0xc0] sm:$0xff] %vm3028_vm1, %v2988_v2  ;;  %v2826_v48 = vmul.f32 %v4181_v56, %v2758_v3  ;;  %v2825_v50 = vmul.f32 %v4181_v56, %v2757_v4 }
 0x442   :  { %2951 = vadd.xlane.f32.xlu1 %v2826_v48  ;;  %2949 = vadd.xlane.f32.xlu0 %v2825_v50 }
 0x446   :  { %2955 = vadd.xlane.f32.xlu1 %v2828_v7  ;;  %2953 = vadd.xlane.f32.xlu0 %v2827_v63 }
 0x449   :  { %v2892_v8 = vpop.xlane.xlu1 %2891  ;;  %v2890_v10 = vpop.xlane.xlu0 %2889 }
 0x44a   :  { %v2995_v12 = vadd.f32 %v4274_v30, %v2892_v8  ;;  %v2994_v49 = vadd.f32 %v4274_v30, %v2890_v10 }
 0x44c   :  { %3060 = vst.msk [vmem:[%s4640_s11 + $0xf8] sm:$0xff] %vm3028_vm1, %v2995_v12  ;;  %3059 = vst.msk [vmem:[%s4640_s11 + $0xf0] sm:$0xff] %vm3028_vm1, %v2994_v49 }
 0x44d   :  { %v2888_v13 = vpop.xlane.xlu1 %2887  ;;  %v2886_v56 = vpop.xlane.xlu0 %2885 }
 0x44e   :  { %v2993_v14 = vadd.f32 %v4274_v30, %v2888_v13  ;;  %v2992_v46 = vadd.f32 %v4274_v30, %v2886_v56 }
 0x450   :  { %3058 = vst.msk [vmem:[%s4640_s11 + $0xe8] sm:$0xff] %vm3028_vm1, %v2993_v14  ;;  %3057 = vst.msk [vmem:[%s4640_s11 + $0xe0] sm:$0xff] %vm3028_vm1, %v2992_v46 }
 0x459   :  { %v2900_v15 = vpop.xlane.xlu1 %2899  ;;  %v2898_v16 = vpop.xlane.xlu0 %2897 }
 0x45a   :  { %v2999_v17 = vadd.f32 %v4274_v30, %v2900_v15  ;;  %v2998_v18 = vadd.f32 %v4274_v30, %v2898_v16 }
 0x45c   :  { %3064 = vst.msk [vmem:[%s4640_s11 + $0x118] sm:$0xff] %vm3028_vm1, %v2999_v17  ;;  %3063 = vst.msk [vmem:[%s4640_s11 + $0x110] sm:$0xff] %vm3028_vm1, %v2998_v18 }
 0x45d   :  { %v2896_v19 = vpop.xlane.xlu1 %2895  ;;  %v2894_v20 = vpop.xlane.xlu0 %2893 }
 0x45e   :  { %v2997_v21 = vadd.f32 %v4274_v30, %v2896_v19  ;;  %v2996_v22 = vadd.f32 %v4274_v30, %v2894_v20 }
 0x460   :  { %3062 = vst.msk [vmem:[%s4640_s11 + $0x108] sm:$0xff] %vm3028_vm1, %v2997_v21  ;;  %3061 = vst.msk [vmem:[%s4640_s11 + $0x100] sm:$0xff] %vm3028_vm1, %v2996_v22 }
 0x469   :  { %v2908_v24 = vpop.xlane.xlu1 %2907  ;;  %v2906_v25 = vpop.xlane.xlu0 %2905 }
 0x46a   :  { %v3003_v23 = vadd.f32 %v4274_v30, %v2908_v24  ;;  %v3002_v26 = vadd.f32 %v4274_v30, %v2906_v25 }
 0x46c   :  { %3068 = vst.msk [vmem:[%s4640_s11 + $0x138] sm:$0xff] %vm3028_vm1, %v3003_v23  ;;  %3067 = vst.msk [vmem:[%s4640_s11 + $0x130] sm:$0xff] %vm3028_vm1, %v3002_v26 }
 0x46d   :  { %v2904_v27 = vpop.xlane.xlu1 %2903  ;;  %v2902_v9 = vpop.xlane.xlu0 %2901 }
 0x46e   :  { %v3001_v28 = vadd.f32 %v4274_v30, %v2904_v27  ;;  %v3000_v29 = vadd.f32 %v4274_v30, %v2902_v9 }
 0x470   :  { %3066 = vst.msk [vmem:[%s4640_s11 + $0x128] sm:$0xff] %vm3028_vm1, %v3001_v28  ;;  %3065 = vst.msk [vmem:[%s4640_s11 + $0x120] sm:$0xff] %vm3028_vm1, %v3000_v29 }
 0x479   :  { %v2916_v36 = vpop.xlane.xlu1 %2915  ;;  %v2914_v31 = vpop.xlane.xlu0 %2913 }
 0x47a   :  { %v3007_v32 = vadd.f32 %v4274_v30, %v2916_v36  ;;  %v3006_v35 = vadd.f32 %v4274_v30, %v2914_v31 }
 0x47c   :  { %3072 = vst.msk [vmem:[%s4640_s11 + $0x158] sm:$0xff] %vm3028_vm1, %v3007_v32  ;;  %3071 = vst.msk [vmem:[%s4640_s11 + $0x150] sm:$0xff] %vm3028_vm1, %v3006_v35 }
 0x47d   :  { %v2912_v11 = vpop.xlane.xlu1 %2911  ;;  %v2910_v37 = vpop.xlane.xlu0 %2909 }
 0x47e   :  { %v3005_v38 = vadd.f32 %v4274_v30, %v2912_v11  ;;  %v3004_v39 = vadd.f32 %v4274_v30, %v2910_v37 }
 0x480   :  { %3070 = vst.msk [vmem:[%s4640_s11 + $0x148] sm:$0xff] %vm3028_vm1, %v3005_v38  ;;  %3069 = vst.msk [vmem:[%s4640_s11 + $0x140] sm:$0xff] %vm3028_vm1, %v3004_v39 }
 0x489   :  { %v2924_v40 = vpop.xlane.xlu1 %2923  ;;  %v2922_v34 = vpop.xlane.xlu0 %2921 }
 0x48a   :  { %v3011_v41 = vadd.f32 %v4274_v30, %v2924_v40  ;;  %v3010_v42 = vadd.f32 %v4274_v30, %v2922_v34 }
 0x48c   :  { %3076 = vst.msk [vmem:[%s4640_s11 + $0x178] sm:$0xff] %vm3028_vm1, %v3011_v41  ;;  %3075 = vst.msk [vmem:[%s4640_s11 + $0x170] sm:$0xff] %vm3028_vm1, %v3010_v42 }
 0x48d   :  { %v2920_v43 = vpop.xlane.xlu1 %2919  ;;  %v2918_v44 = vpop.xlane.xlu0 %2917 }
 0x48e   :  { %v3009_v54 = vadd.f32 %v4274_v30, %v2920_v43  ;;  %v3008_v45 = vadd.f32 %v4274_v30, %v2918_v44 }
 0x490   :  { %3074 = vst.msk [vmem:[%s4640_s11 + $0x168] sm:$0xff] %vm3028_vm1, %v3009_v54  ;;  %3073 = vst.msk [vmem:[%s4640_s11 + $0x160] sm:$0xff] %vm3028_vm1, %v3008_v45 }
 0x499   :  { %v2932_v47 = vpop.xlane.xlu1 %2931  ;;  %v2930_v51 = vpop.xlane.xlu0 %2929 }
 0x49a   :  { %v3015_v52 = vadd.f32 %v4274_v30, %v2932_v47  ;;  %v3014_v55 = vadd.f32 %v4274_v30, %v2930_v51 }
 0x49c   :  { %3080 = vst.msk [vmem:[%s4640_s11 + $0x198] sm:$0xff] %vm3028_vm1, %v3015_v52  ;;  %3079 = vst.msk [vmem:[%s4640_s11 + $0x190] sm:$0xff] %vm3028_vm1, %v3014_v55 }
 0x49d   :  { %v2928_v57 = vpop.xlane.xlu1 %2927  ;;  %v2926_v59 = vpop.xlane.xlu0 %2925 }
 0x49e   :  { %v3013_v53 = vadd.f32 %v4274_v30, %v2928_v57  ;;  %v3012_v1 = vadd.f32 %v4274_v30, %v2926_v59 }
 0x4a0   :  { %3078 = vst.msk [vmem:[%s4640_s11 + $0x188] sm:$0xff] %vm3028_vm1, %v3013_v53  ;;  %3077 = vst.msk [vmem:[%s4640_s11 + $0x180] sm:$0xff] %vm3028_vm1, %v3012_v1 }
 0x4a9   :  { %v2940_v60 = vpop.xlane.xlu1 %2939  ;;  %v2938_v33 = vpop.xlane.xlu0 %2937 }
 0x4aa   :  { %v3019_v58 = vadd.f32 %v4274_v30, %v2940_v60  ;;  %v3018_v61 = vadd.f32 %v4274_v30, %v2938_v33 }
 0x4ac   :  { %3084 = vst.msk [vmem:[%s4640_s11 + $0x1b8] sm:$0xff] %vm3028_vm1, %v3019_v58  ;;  %3083 = vst.msk [vmem:[%s4640_s11 + $0x1b0] sm:$0xff] %vm3028_vm1, %v3018_v61 }
 0x4ad   :  { %v2936_v62 = vpop.xlane.xlu1 %2935  ;;  %v2934_v0 = vpop.xlane.xlu0 %2933 }
 0x4ae   :  { %v3017_v2 = vadd.f32 %v4274_v30, %v2936_v62  ;;  %v3016_v3 = vadd.f32 %v4274_v30, %v2934_v0 }
 0x4b0   :  { %3082 = vst.msk [vmem:[%s4640_s11 + $0x1a8] sm:$0xff] %vm3028_vm1, %v3017_v2  ;;  %3081 = vst.msk [vmem:[%s4640_s11 + $0x1a0] sm:$0xff] %vm3028_vm1, %v3016_v3 }
 0x4b9   :  { %v2948_v4 = vpop.xlane.xlu1 %2947  ;;  %v2946_v48 = vpop.xlane.xlu0 %2945 }
 0x4ba   :  { %v3023_v50 = vadd.f32 %v4274_v30, %v2948_v4  ;;  %v3022_v5 = vadd.f32 %v4274_v30, %v2946_v48 }
 0x4bc   :  { %3088 = vst.msk [vmem:[%s4640_s11 + $0x1d8] sm:$0xff] %vm3028_vm1, %v3023_v50  ;;  %3087 = vst.msk [vmem:[%s4640_s11 + $0x1d0] sm:$0xff] %vm3028_vm1, %v3022_v5 }
 0x4bd   :  { %v2944_v6 = vpop.xlane.xlu1 %2943  ;;  %v2942_v7 = vpop.xlane.xlu0 %2941 }
 0x4be   :  { %v3021_v63 = vadd.f32 %v4274_v30, %v2944_v6  ;;  %v3020_v8 = vadd.f32 %v4274_v30, %v2942_v7 }
 0x4c0   :  { %3086 = vst.msk [vmem:[%s4640_s11 + $0x1c8] sm:$0xff] %vm3028_vm1, %v3021_v63  ;;  %3085 = vst.msk [vmem:[%s4640_s11 + $0x1c0] sm:$0xff] %vm3028_vm1, %v3020_v8 }
 0x4cb   :  { %v2952_v10 = vpop.xlane.xlu1 %2951  ;;  %v2950_v12 = vpop.xlane.xlu0 %2949 }
 0x4cc   :  { %v3025_v49 = vadd.f32 %v4274_v30, %v2952_v10  ;;  %v3024_v13 = vadd.f32 %v4274_v30, %v2950_v12 }
 0x4ce   :  { %3090 = vst.msk [vmem:[%s4640_s11 + $0x1e8] sm:$0xff] %vm3028_vm1, %v3025_v49  ;;  %3089 = vst.msk [vmem:[%s4640_s11 + $0x1e0] sm:$0xff] %vm3028_vm1, %v3024_v13 }
 0x4cf   :  { %v2956_v56 = vpop.xlane.xlu1 %2955  ;;  %v2954_v14 = vpop.xlane.xlu0 %2953 }
 0x4d0   :  { %v3027_v46 = vadd.f32 %v4274_v30, %v2956_v56  ;;  %v3026_v15 = vadd.f32 %v4274_v30, %v2954_v14 }
 0x4d2   :  { %3092 = vst.msk [vmem:[%s4640_s11 + $0x1f8] sm:$0xff] %vm3028_vm1, %v3027_v46  ;;  %3091 = vst.msk [vmem:[%s4640_s11 + $0x1f0] sm:$0xff] %vm3028_vm1, %v3026_v15 }

</bundles_post_ra>
